<compile_context>
chip_gen: v5e
topology: v5e:2x2
jax: 0.10.0
libtpu: 0.0.40
codegen_flags: <defaults>
</compile_context>

<pallas_src>
import math

import numpy as np
import jax
import jax.numpy as jnp
from jax import lax
from jax.experimental import pallas as pl
from jax.experimental.pallas import tpu as pltpu

jax.config.update("jax_default_matmul_precision", "highest")

# ----------------------------- model hyper-params (small, consistent w/ module) ---
BATCH = 2
SEQ = 8
N_VOCAB = 50
N_RELATIONS = 4
D_MODEL = 32        # == d_word_vec
N_LAYERS = 2
N_HEAD = 2
D_K = 16
D_V = 16
D_INNER = 64
PAD_IDX = 0
N_POSITION = 64
EPS = 1e-6

HD = N_HEAD * D_K    # 32  (fused q/k/v width per projection)
HDV = N_HEAD * D_V   # 32
NEG_INF = -1e9


# ----------------------------- fused encoder kernel -------------------------------

def _encoder_kernel(
    # constant (same block every layer step)
    doc_in_ref, rel_in_ref, mask_ref, enc_g_ref, enc_b_ref,
    # per-layer stacked weights (leading layer dim selected by the grid)
    wqkv_d_ref, wfc_d_ref, w1_d_ref, b1_d_ref, w2_d_ref, b2_d_ref,
    wq_r_ref, wkv_r_ref, wfc_r_ref, w1_r_ref, b1_r_ref, w2_r_ref, b2_r_ref,
    lng_ref, lnb_ref,
    # outputs
    doc_out_ref, rel_out_ref,
    # VMEM scratch carrying activations across layers
    doc_scr, rel_scr,
):
    layer = pl.program_id(0)
    scale = 1.0 / math.sqrt(D_K)

    def layer_norm(x, g, b):
        mu = jnp.mean(x, axis=-1, keepdims=True)
        var = jnp.mean(jnp.square(x - mu), axis=-1, keepdims=True)
        return (x - mu) * lax.rsqrt(var + EPS) * g + b

    @pl.when(layer == 0)
    def _init():
        # embedding dropout is identity at inference; fuse the encoder-input LayerNorm
        enc_g = enc_g_ref[...]
        enc_b = enc_b_ref[...]
        doc_scr[...] = layer_norm(doc_in_ref[...], enc_g, enc_b)
        for b in range(BATCH):
            rel_scr[b] = layer_norm(rel_in_ref[b], enc_g, enc_b)

    mask = mask_ref[...]                       # (B, S) float {0,1} key-padding mask

    def masked_softmax(s, key_mask):
        s = jnp.where(key_mask > 0.0, s, NEG_INF)     # masked_fill(mask==0, -1e9)
        s = s - jnp.max(s, axis=-1, keepdims=True)
        e = jnp.exp(s)
        return e * pl.reciprocal(jnp.sum(e, axis=-1, keepdims=True), approx=True)

    def attend_and_project(q, k, v, wfc, key_mask):
        # q:(Lq,H*D_K)  k:(Lk,H*D_K)  v:(Lk,H*D_V)  wfc:(H*D_V,D)  key_mask:(1,Lk)
        # All heads, with the output projection decomposed per head (no concat needed).
        out = None
        for h in range(N_HEAD):
            qh = q[:, h * D_K:(h + 1) * D_K]
            kh = k[:, h * D_K:(h + 1) * D_K]
            vh = v[:, h * D_V:(h + 1) * D_V]
            s = lax.dot_general(qh, kh, (((1,), (1,)), ((), ())),
                                preferred_element_type=jnp.float32) * scale
            p = masked_softmax(s, key_mask)
            oh = jnp.dot(p, vh, preferred_element_type=jnp.float32)
            oh = jnp.dot(oh, wfc[h * D_V:(h + 1) * D_V, :],
                         preferred_element_type=jnp.float32)
            out = oh if out is None else out + oh
        return out                              # (Lq, D)

    lng = lng_ref[...]                          # (4, D): [slf_attn, doc_ffn, rel_attn, rel_ffn]
    lnb = lnb_ref[...]

    # ---------------- doc stream: self-attention + FFN ----------------
    doc = doc_scr[...]                          # (B*S, D), previous-layer output
    qkv = jnp.dot(doc, wqkv_d_ref[...], preferred_element_type=jnp.float32)   # (B*S, 3*HD)
    wfc_d = wfc_d_ref[...]
    for b in range(BATCH):
        r0 = b * SEQ
        q_b = qkv[r0:r0 + SEQ, 0:HD]
        k_b = qkv[r0:r0 + SEQ, HD:2 * HD]
        v_b = qkv[r0:r0 + SEQ, 2 * HD:3 * HD]
        o_b = attend_and_project(q_b, k_b, v_b, wfc_d, mask[b:b + 1, :])
        doc_scr[pl.ds(r0, SEQ), :] = layer_norm(
            o_b + doc[r0:r0 + SEQ, :], lng[0:1, :], lnb[0:1, :])

    doc = doc_scr[...]
    hid = jnp.maximum(
        jnp.dot(doc, w1_d_ref[...], preferred_element_type=jnp.float32) + b1_d_ref[...], 0.0)
    out = jnp.dot(hid, w2_d_ref[...], preferred_element_type=jnp.float32) + b2_d_ref[...]
    doc = layer_norm(out + doc, lng[1:2, :], lnb[1:2, :])
    doc_scr[...] = doc
    doc_out_ref[...] = doc

    # ---------------- relation stream: rel->doc cross-attention + FFN ----------------
    # TODO(synk): EncoderLayer source not provided; implemented as the standard
    # doc self-attention + FFN followed by relation->doc cross-attention + FFN.
    kv = jnp.dot(doc, wkv_r_ref[...], preferred_element_type=jnp.float32)     # (B*S, 2*HD)
    wfc_r = wfc_r_ref[...]
    for b in range(BATCH):
        r0 = b * SEQ
        rel_b = rel_scr[b]                      # (R, D)
        q_b = jnp.dot(rel_b, wq_r_ref[...], preferred_element_type=jnp.float32)
        k_b = kv[r0:r0 + SEQ, 0:HD]
        v_b = kv[r0:r0 + SEQ, HD:2 * HD]
        o_b = attend_and_project(q_b, k_b, v_b, wfc_r, mask[b:b + 1, :])
        rel_b = layer_norm(o_b + rel_b, lng[2:3, :], lnb[2:3, :])
        hid = jnp.maximum(
            jnp.dot(rel_b, w1_r_ref[...], preferred_element_type=jnp.float32) + b1_r_ref[...], 0.0)
        out = jnp.dot(hid, w2_r_ref[...], preferred_element_type=jnp.float32) + b2_r_ref[...]
        rel_b = layer_norm(out + rel_b, lng[3:4, :], lnb[3:4, :])
        rel_scr[b] = rel_b
        rel_out_ref[b] = rel_b


# ----------------------------- wrapper / glue --------------------------------------

def sinusoid_table(n_position, d_hid):
    pos = np.arange(n_position)[:, None].astype(np.float64)
    i = np.arange(d_hid)[None, :]
    angle = pos / np.power(10000.0, 2.0 * (i // 2) / d_hid)
    table = np.zeros((n_position, d_hid), dtype=np.float64)
    table[:, 0::2] = np.sin(angle[:, 0::2])
    table[:, 1::2] = np.cos(angle[:, 1::2])
    return jnp.asarray(table, dtype=jnp.float32)


def encoder_forward(params, src_seq):
    B, S = src_seq.shape

    # Embedding gathers + positional encoding in JAX (tiny gathers; no Pallas win).
    # TODO(synk): PositionalEncoding's `length` arg semantics unknown; using the
    # standard "add first L rows of the sinusoid table" behavior.
    doc0 = jnp.take(params["word_emb"], src_seq, axis=0) + params["pos_table"][None, :S, :]
    rel_ids = jnp.broadcast_to(jnp.arange(N_RELATIONS), (B, N_RELATIONS))
    rel0 = jnp.take(params["rel_emb"], rel_ids, axis=0)                 # (B, R, D)

    # get_pad_mask(src_seq, pad_idx).squeeze(-2) -> key-padding mask over doc tokens
    mask = (src_seq != PAD_IDX).astype(jnp.float32)                     # (B, S)

    doc0 = doc0.reshape(B * S, D_MODEL).astype(jnp.float32)
    rel0 = rel0.astype(jnp.float32)

    def whole(arr):                 # same block at every layer step
        return pl.BlockSpec(arr.shape, lambda l, _n=arr.ndim: (0,) * _n)

    def per_layer(arr):             # stacked on leading layer dim; grid selects the layer
        return pl.BlockSpec((None,) + arr.shape[1:],
                            lambda l, _n=arr.ndim: (l,) + (0,) * (_n - 1))

    const_args = [doc0, rel0, mask, params["enc_ln_g"], params["enc_ln_b"]]
    layer_args = [
        params["w_qkv_doc"], params["w_fc_doc"],
        params["w_ffn1_doc"], params["b_ffn1_doc"], params["w_ffn2_doc"], params["b_ffn2_doc"],
        params["w_q_rel"], params["w_kv_rel"], params["w_fc_rel"],
        params["w_ffn1_rel"], params["b_ffn1_rel"], params["w_ffn2_rel"], params["b_ffn2_rel"],
        params["ln_g"], params["ln_b"],
    ]

    doc_out, rel_out = pl.pallas_call(
        _encoder_kernel,
        out_shape=(jax.ShapeDtypeStruct((B * S, D_MODEL), jnp.float32),
                   jax.ShapeDtypeStruct((B, N_RELATIONS, D_MODEL), jnp.float32)),
        grid=(N_LAYERS,),
        in_specs=[whole(a) for a in const_args] + [per_layer(a) for a in layer_args],
        out_specs=(pl.BlockSpec((B * S, D_MODEL), lambda l: (0, 0)),
                   pl.BlockSpec((B, N_RELATIONS, D_MODEL), lambda l: (0, 0, 0))),
        scratch_shapes=[pltpu.VMEM((B * S, D_MODEL), jnp.float32),
                        pltpu.VMEM((B, N_RELATIONS, D_MODEL), jnp.float32)],
        compiler_params=pltpu.CompilerParams(dimension_semantics=("arbitrary",)),
    )(*const_args, *layer_args)

    return doc_out.reshape(B, S, D_MODEL), rel_out


# ----------------------------- pure-JAX reference (cross-check) --------------------

def encoder_reference(params, src_seq):
    B, S = src_seq.shape
    doc = jnp.take(params["word_emb"], src_seq, axis=0) + params["pos_table"][None, :S, :]
    rel_ids = jnp.broadcast_to(jnp.arange(N_RELATIONS), (B, N_RELATIONS))
    rel = jnp.take(params["rel_emb"], rel_ids, axis=0)

    def ln(x, g, b):
        mu = jnp.mean(x, -1, keepdims=True)
        var = jnp.mean(jnp.square(x - mu), -1, keepdims=True)
        return (x - mu) / jnp.sqrt(var + EPS) * g + b

    doc = ln(doc, params["enc_ln_g"][0], params["enc_ln_b"][0])
    rel = ln(rel, params["enc_ln_g"][0], params["enc_ln_b"][0])
    key_mask = (src_seq != PAD_IDX)[:, None, None, :]      # (B,1,1,S)

    def mha(q_in, kv_in, wq, wk, wv, wfc, g, b):
        Bq, Lq, _ = q_in.shape
        Lk = kv_in.shape[1]
        q = (q_in @ wq).reshape(Bq, Lq, N_HEAD, D_K).transpose(0, 2, 1, 3)
        k = (kv_in @ wk).reshape(Bq, Lk, N_HEAD, D_K).transpose(0, 2, 1, 3)
        v = (kv_in @ wv).reshape(Bq, Lk, N_HEAD, D_V).transpose(0, 2, 1, 3)
        s = jnp.einsum("bhqd,bhkd->bhqk", q, k) / math.sqrt(D_K)
        s = jnp.where(key_mask, s, NEG_INF)
        p = jax.nn.softmax(s, axis=-1)
        o = jnp.einsum("bhqk,bhkd->bhqd", p, v).transpose(0, 2, 1, 3).reshape(Bq, Lq, HDV)
        return ln(o @ wfc + q_in, g, b)

    def ffn(x, w1, b1, w2, b2, g, b):
        h = jax.nn.relu(x @ w1 + b1)
        return ln(h @ w2 + b2 + x, g, b)

    for l in range(N_LAYERS):
        wqkv = params["w_qkv_doc"][l]
        doc = mha(doc, doc, wqkv[:, :HD], wqkv[:, HD:2 * HD], wqkv[:, 2 * HD:],
                  params["w_fc_doc"][l], params["ln_g"][l, 0], params["ln_b"][l, 0])
        doc = ffn(doc, params["w_ffn1_doc"][l], params["b_ffn1_doc"][l, 0],
                  params["w_ffn2_doc"][l], params["b_ffn2_doc"][l, 0],
                  params["ln_g"][l, 1], params["ln_b"][l, 1])
        wkv = params["w_kv_rel"][l]
        rel = mha(rel, doc, params["w_q_rel"][l], wkv[:, :HD], wkv[:, HD:],
                  params["w_fc_rel"][l], params["ln_g"][l, 2], params["ln_b"][l, 2])
        rel = ffn(rel, params["w_ffn1_rel"][l], params["b_ffn1_rel"][l, 0],
                  params["w_ffn2_rel"][l], params["b_ffn2_rel"][l, 0],
                  params["ln_g"][l, 3], params["ln_b"][l, 3])
    return doc, rel


# ----------------------------- deterministic parameter init -----------------------

def init_params(key):
    def nrm(k, shape, scale=0.02):
        return scale * jax.random.normal(k, shape, dtype=jnp.float32)

    n_per_layer = 9
    keys = jax.random.split(key, 2 + N_LAYERS * n_per_layer)
    word_emb = nrm(keys[0], (N_VOCAB, D_MODEL)).at[PAD_IDX].set(0.0)   # padding_idx row = 0
    rel_emb = nrm(keys[1], (N_RELATIONS, D_MODEL))

    def lkey(l, i):
        return keys[2 + l * n_per_layer + i]

    def stack(fn):
        return jnp.stack([fn(l) for l in range(N_LAYERS)], axis=0)

    return dict(
        word_emb=word_emb,
        rel_emb=rel_emb,
        pos_table=sinusoid_table(N_POSITION, D_MODEL),
        enc_ln_g=jnp.ones((1, D_MODEL), jnp.float32),
        enc_ln_b=jnp.zeros((1, D_MODEL), jnp.float32),
        # doc self-attention: fused (q|k|v) projection + output projection
        w_qkv_doc=stack(lambda l: nrm(lkey(l, 0), (D_MODEL, 3 * HD))),
        w_fc_doc=stack(lambda l: nrm(lkey(l, 1), (HDV, D_MODEL))),
        # doc position-wise FFN
        w_ffn1_doc=stack(lambda l: nrm(lkey(l, 2), (D_MODEL, D_INNER))),
        b_ffn1_doc=jnp.zeros((N_LAYERS, 1, D_INNER), jnp.float32),
        w_ffn2_doc=stack(lambda l: nrm(lkey(l, 3), (D_INNER, D_MODEL))),
        b_ffn2_doc=jnp.zeros((N_LAYERS, 1, D_MODEL), jnp.float32),
        # relation -> doc cross-attention: q from rel, fused (k|v) from doc
        w_q_rel=stack(lambda l: nrm(lkey(l, 4), (D_MODEL, HD))),
        w_kv_rel=stack(lambda l: nrm(lkey(l, 5), (D_MODEL, 2 * HD))),
        w_fc_rel=stack(lambda l: nrm(lkey(l, 6), (HDV, D_MODEL))),
        # relation FFN
        w_ffn1_rel=stack(lambda l: nrm(lkey(l, 7), (D_MODEL, D_INNER))),
        b_ffn1_rel=jnp.zeros((N_LAYERS, 1, D_INNER), jnp.float32),
        w_ffn2_rel=stack(lambda l: nrm(lkey(l, 8), (D_INNER, D_MODEL))),
        b_ffn2_rel=jnp.zeros((N_LAYERS, 1, D_MODEL), jnp.float32),
        # LayerNorm gamma/beta rows: [slf_attn, doc_ffn, rel_attn, rel_ffn]
        ln_g=jnp.ones((N_LAYERS, 4, D_MODEL), jnp.float32),
        ln_b=jnp.zeros((N_LAYERS, 4, D_MODEL), jnp.float32),
    )


# ----------------------------- main ------------------------------------------------

if __name__ == "__main__":
    key = jax.random.PRNGKey(0)
    pk, sk = jax.random.split(key)
    params = init_params(pk)

    src_seq = jax.random.randint(sk, (BATCH, SEQ), 1, N_VOCAB, dtype=jnp.int32)
    src_seq = src_seq.at[:, -2:].set(PAD_IDX)   # trailing pads exercise the key mask

    doc_out, rel_out = jax.jit(encoder_forward)(params, src_seq)
    jax.block_until_ready((doc_out, rel_out))

    assert doc_out.shape == (BATCH, SEQ, D_MODEL)
    assert rel_out.shape == (BATCH, N_RELATIONS, D_MODEL)
    assert bool(jnp.all(jnp.isfinite(doc_out))) and bool(jnp.all(jnp.isfinite(rel_out)))

    # numerical cross-check against a pure-JAX mirror of the same math
    doc_ref, rel_ref = encoder_reference(params, src_seq)
    assert float(jnp.max(jnp.abs(doc_out - doc_ref))) < 5e-2
    assert float(jnp.max(jnp.abs(rel_out - rel_ref))) < 5e-2

    print("KERNEL_OK")
</pallas_src>

<mosaic_0001>
module attributes {stable_mosaic.version = 11 : i64} {
  func.func @_encoder_kernel(%arg0: i32, %arg1: memref<16x32xf32, #tpu.memory_space<vmem>>, %arg2: memref<2x4x32xf32, #tpu.memory_space<vmem>>, %arg3: memref<2x8xf32, #tpu.memory_space<vmem>>, %arg4: memref<1x32xf32, #tpu.memory_space<vmem>>, %arg5: memref<1x32xf32, #tpu.memory_space<vmem>>, %arg6: memref<1x32x96xf32, #tpu.memory_space<vmem>>, %arg7: memref<1x32x32xf32, #tpu.memory_space<vmem>>, %arg8: memref<1x32x64xf32, #tpu.memory_space<vmem>>, %arg9: memref<1x1x64xf32, #tpu.memory_space<vmem>>, %arg10: memref<1x64x32xf32, #tpu.memory_space<vmem>>, %arg11: memref<1x1x32xf32, #tpu.memory_space<vmem>>, %arg12: memref<1x32x32xf32, #tpu.memory_space<vmem>>, %arg13: memref<1x32x64xf32, #tpu.memory_space<vmem>>, %arg14: memref<1x32x32xf32, #tpu.memory_space<vmem>>, %arg15: memref<1x32x64xf32, #tpu.memory_space<vmem>>, %arg16: memref<1x1x64xf32, #tpu.memory_space<vmem>>, %arg17: memref<1x64x32xf32, #tpu.memory_space<vmem>>, %arg18: memref<1x1x32xf32, #tpu.memory_space<vmem>>, %arg19: memref<1x4x32xf32, #tpu.memory_space<vmem>>, %arg20: memref<1x4x32xf32, #tpu.memory_space<vmem>>, %arg21: memref<16x32xf32, #tpu.memory_space<vmem>>, %arg22: memref<2x4x32xf32, #tpu.memory_space<vmem>>, %arg23: memref<16x32xf32, #tpu.memory_space<vmem>>, %arg24: memref<2x4x32xf32, #tpu.memory_space<vmem>>) attributes {dimension_semantics = [#tpu.dimension_semantics<arbitrary>], iteration_bounds = array<i64: 2>, scalar_prefetch = 0 : i64, scratch_operands = 2 : i64, tpu.core_type = #tpu.core_type<tc>, window_params = [{pipeline_mode = #tpu.pipeline_mode<synchronous>, transform_indices = @transform_0, window_bounds = array<i64: 16, 32>}, {pipeline_mode = #tpu.pipeline_mode<synchronous>, transform_indices = @transform_1, window_bounds = array<i64: 2, 4, 32>}, {pipeline_mode = #tpu.pipeline_mode<synchronous>, transform_indices = @transform_2, window_bounds = array<i64: 2, 8>}, {pipeline_mode = #tpu.pipeline_mode<synchronous>, transform_indices = @transform_3, window_bounds = array<i64: 1, 32>}, {pipeline_mode = #tpu.pipeline_mode<synchronous>, transform_indices = @transform_4, window_bounds = array<i64: 1, 32>}, {transform_indices = @transform_5, window_bounds = array<i64: 1, 32, 96>}, {transform_indices = @transform_6, window_bounds = array<i64: 1, 32, 32>}, {transform_indices = @transform_7, window_bounds = array<i64: 1, 32, 64>}, {transform_indices = @transform_8, window_bounds = array<i64: 1, 1, 64>}, {transform_indices = @transform_9, window_bounds = array<i64: 1, 64, 32>}, {transform_indices = @transform_10, window_bounds = array<i64: 1, 1, 32>}, {transform_indices = @transform_11, window_bounds = array<i64: 1, 32, 32>}, {transform_indices = @transform_12, window_bounds = array<i64: 1, 32, 64>}, {transform_indices = @transform_13, window_bounds = array<i64: 1, 32, 32>}, {transform_indices = @transform_14, window_bounds = array<i64: 1, 32, 64>}, {transform_indices = @transform_15, window_bounds = array<i64: 1, 1, 64>}, {transform_indices = @transform_16, window_bounds = array<i64: 1, 64, 32>}, {transform_indices = @transform_17, window_bounds = array<i64: 1, 1, 32>}, {transform_indices = @transform_18, window_bounds = array<i64: 1, 4, 32>}, {transform_indices = @transform_19, window_bounds = array<i64: 1, 4, 32>}, {pipeline_mode = #tpu.pipeline_mode<synchronous>, transform_indices = @transform_20, window_bounds = array<i64: 16, 32>}, {pipeline_mode = #tpu.pipeline_mode<synchronous>, transform_indices = @transform_21, window_bounds = array<i64: 2, 4, 32>}]} {
    %c0_i32 = arith.constant 0 : i32
    %0 = arith.cmpi eq, %arg0, %c0_i32 : i32
    %1 = arith.extui %0 : i1 to i32
    %c0_i32_0 = arith.constant 0 : i32
    %2 = arith.cmpi ne, %1, %c0_i32_0 : i32
    scf.if %2 {
      %c0_201 = arith.constant 0 : index
      %c0_202 = arith.constant 0 : index
      %489 = vector.load %arg4[%c0_201, %c0_202] : memref<1x32xf32, #tpu.memory_space<vmem>>, vector<1x32xf32>
      %c0_203 = arith.constant 0 : index
      %c0_204 = arith.constant 0 : index
      %490 = vector.load %arg5[%c0_203, %c0_204] : memref<1x32xf32, #tpu.memory_space<vmem>>, vector<1x32xf32>
      %c0_205 = arith.constant 0 : index
      %c0_206 = arith.constant 0 : index
      %491 = vector.load %arg1[%c0_205, %c0_206] : memref<16x32xf32, #tpu.memory_space<vmem>>, vector<16x32xf32>
      %cst_207 = arith.constant dense<0.000000e+00> : vector<16xf32>
      %492 = vector.multi_reduction <add>, %491, %cst_207 [1] : vector<16x32xf32> to vector<16xf32>
      %493 = vector.shape_cast %492 : vector<16xf32> to vector<16x1xf32>
      %cst_208 = arith.constant 3.200000e+01 : f32
      %494 = vector.broadcast %cst_208 : f32 to vector<16x1xf32>
      %495 = arith.divf %493, %494 : vector<16x1xf32>
      %496 = vector.broadcast %495 : vector<16x1xf32> to vector<16x32xf32>
      %497 = arith.subf %491, %496 : vector<16x32xf32>
      %498 = arith.mulf %497, %497 : vector<16x32xf32>
      %cst_209 = arith.constant dense<0.000000e+00> : vector<16xf32>
      %499 = vector.multi_reduction <add>, %498, %cst_209 [1] : vector<16x32xf32> to vector<16xf32>
      %500 = vector.shape_cast %499 : vector<16xf32> to vector<16x1xf32>
      %cst_210 = arith.constant 3.200000e+01 : f32
      %501 = vector.broadcast %cst_210 : f32 to vector<16x1xf32>
      %502 = arith.divf %500, %501 : vector<16x1xf32>
      %503 = vector.broadcast %495 : vector<16x1xf32> to vector<16x32xf32>
      %504 = arith.subf %491, %503 : vector<16x32xf32>
      %cst_211 = arith.constant 9.99999997E-7 : f32
      %505 = vector.broadcast %cst_211 : f32 to vector<16x1xf32>
      %506 = arith.addf %502, %505 : vector<16x1xf32>
      %507 = math.rsqrt %506 : vector<16x1xf32>
      %508 = vector.broadcast %507 : vector<16x1xf32> to vector<16x32xf32>
      %509 = arith.mulf %504, %508 : vector<16x32xf32>
      %510 = vector.broadcast %489 : vector<1x32xf32> to vector<16x32xf32>
      %511 = arith.mulf %509, %510 : vector<16x32xf32>
      %512 = vector.broadcast %490 : vector<1x32xf32> to vector<16x32xf32>
      %513 = arith.addf %511, %512 : vector<16x32xf32>
      %c0_212 = arith.constant 0 : index
      %c0_213 = arith.constant 0 : index
      %514 = vector.load %arg23[%c0_212, %c0_213] : memref<16x32xf32, #tpu.memory_space<vmem>>, vector<16x32xf32>
      tpu.vector_store %arg23[%c0_212, %c0_213], %513 {strides = array<i32>} : memref<16x32xf32, #tpu.memory_space<vmem>>, vector<16x32xf32>,
      %c0_214 = arith.constant 0 : index
      %c0_215 = arith.constant 0 : index
      %c0_216 = arith.constant 0 : index
      %515 = vector.load %arg2[%c0_214, %c0_215, %c0_216] : memref<2x4x32xf32, #tpu.memory_space<vmem>>, vector<1x4x32xf32>
      %516 = vector.shape_cast %515 : vector<1x4x32xf32> to vector<4x32xf32>
      %cst_217 = arith.constant dense<0.000000e+00> : vector<4xf32>
      %517 = vector.multi_reduction <add>, %516, %cst_217 [1] : vector<4x32xf32> to vector<4xf32>
      %518 = vector.shape_cast %517 : vector<4xf32> to vector<4x1xf32>
      %cst_218 = arith.constant 3.200000e+01 : f32
      %519 = vector.broadcast %cst_218 : f32 to vector<4x1xf32>
      %520 = arith.divf %518, %519 : vector<4x1xf32>
      %521 = vector.broadcast %520 : vector<4x1xf32> to vector<4x32xf32>
      %522 = arith.subf %516, %521 : vector<4x32xf32>
      %523 = arith.mulf %522, %522 : vector<4x32xf32>
      %cst_219 = arith.constant dense<0.000000e+00> : vector<4xf32>
      %524 = vector.multi_reduction <add>, %523, %cst_219 [1] : vector<4x32xf32> to vector<4xf32>
      %525 = vector.shape_cast %524 : vector<4xf32> to vector<4x1xf32>
      %cst_220 = arith.constant 3.200000e+01 : f32
      %526 = vector.broadcast %cst_220 : f32 to vector<4x1xf32>
      %527 = arith.divf %525, %526 : vector<4x1xf32>
      %528 = vector.broadcast %520 : vector<4x1xf32> to vector<4x32xf32>
      %529 = arith.subf %516, %528 : vector<4x32xf32>
      %cst_221 = arith.constant 9.99999997E-7 : f32
      %530 = vector.broadcast %cst_221 : f32 to vector<4x1xf32>
      %531 = arith.addf %527, %530 : vector<4x1xf32>
      %532 = math.rsqrt %531 : vector<4x1xf32>
      %533 = vector.broadcast %532 : vector<4x1xf32> to vector<4x32xf32>
      %534 = arith.mulf %529, %533 : vector<4x32xf32>
      %535 = vector.broadcast %489 : vector<1x32xf32> to vector<4x32xf32>
      %536 = arith.mulf %534, %535 : vector<4x32xf32>
      %537 = vector.broadcast %490 : vector<1x32xf32> to vector<4x32xf32>
      %538 = arith.addf %536, %537 : vector<4x32xf32>
      %c0_222 = arith.constant 0 : index
      %c0_223 = arith.constant 0 : index
      %c0_224 = arith.constant 0 : index
      %539 = vector.load %arg24[%c0_222, %c0_223, %c0_224] : memref<2x4x32xf32, #tpu.memory_space<vmem>>, vector<1x4x32xf32>
      %540 = vector.shape_cast %539 : vector<1x4x32xf32> to vector<4x32xf32>
      %541 = vector.shape_cast %538 : vector<4x32xf32> to vector<1x4x32xf32>
      tpu.vector_store %arg24[%c0_222, %c0_223, %c0_224], %541 {strides = array<i32>} : memref<2x4x32xf32, #tpu.memory_space<vmem>>, vector<1x4x32xf32>,
      %c1_225 = arith.constant 1 : index
      %c0_226 = arith.constant 0 : index
      %c0_227 = arith.constant 0 : index
      %542 = vector.load %arg2[%c1_225, %c0_226, %c0_227] : memref<2x4x32xf32, #tpu.memory_space<vmem>>, vector<1x4x32xf32>
      %543 = vector.shape_cast %542 : vector<1x4x32xf32> to vector<4x32xf32>
      %cst_228 = arith.constant dense<0.000000e+00> : vector<4xf32>
      %544 = vector.multi_reduction <add>, %543, %cst_228 [1] : vector<4x32xf32> to vector<4xf32>
      %545 = vector.shape_cast %544 : vector<4xf32> to vector<4x1xf32>
      %cst_229 = arith.constant 3.200000e+01 : f32
      %546 = vector.broadcast %cst_229 : f32 to vector<4x1xf32>
      %547 = arith.divf %545, %546 : vector<4x1xf32>
      %548 = vector.broadcast %547 : vector<4x1xf32> to vector<4x32xf32>
      %549 = arith.subf %543, %548 : vector<4x32xf32>
      %550 = arith.mulf %549, %549 : vector<4x32xf32>
      %cst_230 = arith.constant dense<0.000000e+00> : vector<4xf32>
      %551 = vector.multi_reduction <add>, %550, %cst_230 [1] : vector<4x32xf32> to vector<4xf32>
      %552 = vector.shape_cast %551 : vector<4xf32> to vector<4x1xf32>
      %cst_231 = arith.constant 3.200000e+01 : f32
      %553 = vector.broadcast %cst_231 : f32 to vector<4x1xf32>
      %554 = arith.divf %552, %553 : vector<4x1xf32>
      %555 = vector.broadcast %547 : vector<4x1xf32> to vector<4x32xf32>
      %556 = arith.subf %543, %555 : vector<4x32xf32>
      %cst_232 = arith.constant 9.99999997E-7 : f32
      %557 = vector.broadcast %cst_232 : f32 to vector<4x1xf32>
      %558 = arith.addf %554, %557 : vector<4x1xf32>
      %559 = math.rsqrt %558 : vector<4x1xf32>
      %560 = vector.broadcast %559 : vector<4x1xf32> to vector<4x32xf32>
      %561 = arith.mulf %556, %560 : vector<4x32xf32>
      %562 = vector.broadcast %489 : vector<1x32xf32> to vector<4x32xf32>
      %563 = arith.mulf %561, %562 : vector<4x32xf32>
      %564 = vector.broadcast %490 : vector<1x32xf32> to vector<4x32xf32>
      %565 = arith.addf %563, %564 : vector<4x32xf32>
      %c1_233 = arith.constant 1 : index
      %c0_234 = arith.constant 0 : index
      %c0_235 = arith.constant 0 : index
      %566 = vector.load %arg24[%c1_233, %c0_234, %c0_235] : memref<2x4x32xf32, #tpu.memory_space<vmem>>, vector<1x4x32xf32>
      %567 = vector.shape_cast %566 : vector<1x4x32xf32> to vector<4x32xf32>
      %568 = vector.shape_cast %565 : vector<4x32xf32> to vector<1x4x32xf32>
      tpu.vector_store %arg24[%c1_233, %c0_234, %c0_235], %568 {strides = array<i32>} : memref<2x4x32xf32, #tpu.memory_space<vmem>>, vector<1x4x32xf32>,
    } else {
    }
    %c0 = arith.constant 0 : index
    %c0_1 = arith.constant 0 : index
    %3 = vector.load %arg3[%c0, %c0_1] : memref<2x8xf32, #tpu.memory_space<vmem>>, vector<2x8xf32>
    %c0_2 = arith.constant 0 : index
    %c0_3 = arith.constant 0 : index
    %c0_4 = arith.constant 0 : index
    %4 = vector.load %arg19[%c0_2, %c0_3, %c0_4] : memref<1x4x32xf32, #tpu.memory_space<vmem>>, vector<1x4x32xf32>
    %5 = vector.shape_cast %4 : vector<1x4x32xf32> to vector<4x32xf32>
    %c0_5 = arith.constant 0 : index
    %c0_6 = arith.constant 0 : index
    %c0_7 = arith.constant 0 : index
    %6 = vector.load %arg20[%c0_5, %c0_6, %c0_7] : memref<1x4x32xf32, #tpu.memory_space<vmem>>, vector<1x4x32xf32>
    %7 = vector.shape_cast %6 : vector<1x4x32xf32> to vector<4x32xf32>
    %c0_8 = arith.constant 0 : index
    %c0_9 = arith.constant 0 : index
    %8 = vector.load %arg23[%c0_8, %c0_9] : memref<16x32xf32, #tpu.memory_space<vmem>>, vector<16x32xf32>
    %c0_10 = arith.constant 0 : index
    %c0_11 = arith.constant 0 : index
    %c0_12 = arith.constant 0 : index
    %9 = vector.load %arg6[%c0_10, %c0_11, %c0_12] : memref<1x32x96xf32, #tpu.memory_space<vmem>>, vector<1x32x96xf32>
    %10 = vector.shape_cast %9 : vector<1x32x96xf32> to vector<32x96xf32>
    %cst = arith.constant dense<0.000000e+00> : vector<16x96xf32>
    %11 = tpu.matmul %8, %10, %cst {dimension_numbers = #tpu.dot_dimension_numbers<[1], [0], [0], [1], [0, 0, 1, 1], [], []>, precision = #tpu.contract_precision<fp32>} : vector<16x32xf32>, vector<32x96xf32>, vector<16x96xf32> -> vector<16x96xf32>
    %c0_13 = arith.constant 0 : index
    %c0_14 = arith.constant 0 : index
    %c0_15 = arith.constant 0 : index
    %12 = vector.load %arg7[%c0_13, %c0_14, %c0_15] : memref<1x32x32xf32, #tpu.memory_space<vmem>>, vector<1x32x32xf32>
    %13 = vector.shape_cast %12 : vector<1x32x32xf32> to vector<32x32xf32>
    %14 = vector.extract_strided_slice %11 {offsets = [0, 0], sizes = [8, 32], strides = [1, 1]} : vector<16x96xf32> to vector<8x32xf32>
    %15 = vector.extract_strided_slice %11 {offsets = [0, 32], sizes = [8, 32], strides = [1, 1]} : vector<16x96xf32> to vector<8x32xf32>
    %16 = vector.extract_strided_slice %11 {offsets = [0, 64], sizes = [8, 32], strides = [1, 1]} : vector<16x96xf32> to vector<8x32xf32>
    %17 = vector.extract_strided_slice %3 {offsets = [0, 0], sizes = [1, 8], strides = [1, 1]} : vector<2x8xf32> to vector<1x8xf32>
    %18 = vector.extract_strided_slice %14 {offsets = [0, 0], sizes = [8, 16], strides = [1, 1]} : vector<8x32xf32> to vector<8x16xf32>
    %19 = vector.extract_strided_slice %15 {offsets = [0, 0], sizes = [8, 16], strides = [1, 1]} : vector<8x32xf32> to vector<8x16xf32>
    %20 = vector.extract_strided_slice %16 {offsets = [0, 0], sizes = [8, 16], strides = [1, 1]} : vector<8x32xf32> to vector<8x16xf32>
    %cst_16 = arith.constant dense<0.000000e+00> : vector<8x8xf32>
    %21 = tpu.matmul %18, %19, %cst_16 {dimension_numbers = #tpu.dot_dimension_numbers<[1], [1], [0], [0], [0, 0, 1, 0], [], []>, precision = #tpu.contract_precision<fp32>} : vector<8x16xf32>, vector<8x16xf32>, vector<8x8xf32> -> vector<8x8xf32>
    %cst_17 = arith.constant 2.500000e-01 : f32
    %22 = vector.broadcast %cst_17 : f32 to vector<8x8xf32>
    %23 = arith.mulf %21, %22 : vector<8x8xf32>
    %cst_18 = arith.constant 0.000000e+00 : f32
    %24 = vector.broadcast %cst_18 : f32 to vector<1x8xf32>
    %25 = arith.cmpf ogt, %17, %24 : vector<1x8xf32>
    %cst_19 = arith.constant -1.000000e+09 : f32
    %26 = vector.shape_cast %25 : vector<1x8xi1> to vector<1x8xi1>
    %27 = vector.broadcast %26 : vector<1x8xi1> to vector<8x8xi1>
    %28 = vector.broadcast %cst_19 : f32 to vector<8x8xf32>
    %29 = arith.select %27, %23, %28 : vector<8x8xi1>, vector<8x8xf32>
    %cst_20 = arith.constant dense<0xFF800000> : vector<8xf32>
    %30 = vector.multi_reduction <maximumf>, %29, %cst_20 [1] : vector<8x8xf32> to vector<8xf32>
    %31 = vector.shape_cast %30 : vector<8xf32> to vector<8x1xf32>
    %32 = vector.broadcast %31 : vector<8x1xf32> to vector<8x8xf32>
    %33 = arith.subf %29, %32 : vector<8x8xf32>
    %34 = math.exp %33 : vector<8x8xf32>
    %cst_21 = arith.constant dense<0.000000e+00> : vector<8xf32>
    %35 = vector.multi_reduction <add>, %34, %cst_21 [1] : vector<8x8xf32> to vector<8xf32>
    %36 = vector.shape_cast %35 : vector<8xf32> to vector<8x1xf32>
    %37 = tpu.reciprocal %36 {approx = true} : vector<8x1xf32> -> vector<8x1xf32>
    %38 = vector.broadcast %37 : vector<8x1xf32> to vector<8x8xf32>
    %39 = arith.mulf %34, %38 : vector<8x8xf32>
    %cst_22 = arith.constant dense<0.000000e+00> : vector<8x16xf32>
    %40 = tpu.matmul %39, %20, %cst_22 {dimension_numbers = #tpu.dot_dimension_numbers<[1], [0], [0], [1], [0, 0, 1, 1], [], []>, precision = #tpu.contract_precision<fp32>} : vector<8x8xf32>, vector<8x16xf32>, vector<8x16xf32> -> vector<8x16xf32>
    %41 = vector.extract_strided_slice %13 {offsets = [0, 0], sizes = [16, 32], strides = [1, 1]} : vector<32x32xf32> to vector<16x32xf32>
    %cst_23 = arith.constant dense<0.000000e+00> : vector<8x32xf32>
    %42 = tpu.matmul %40, %41, %cst_23 {dimension_numbers = #tpu.dot_dimension_numbers<[1], [0], [0], [1], [0, 0, 1, 1], [], []>, precision = #tpu.contract_precision<fp32>} : vector<8x16xf32>, vector<16x32xf32>, vector<8x32xf32> -> vector<8x32xf32>
    %43 = vector.extract_strided_slice %14 {offsets = [0, 16], sizes = [8, 16], strides = [1, 1]} : vector<8x32xf32> to vector<8x16xf32>
    %44 = vector.extract_strided_slice %15 {offsets = [0, 16], sizes = [8, 16], strides = [1, 1]} : vector<8x32xf32> to vector<8x16xf32>
    %45 = vector.extract_strided_slice %16 {offsets = [0, 16], sizes = [8, 16], strides = [1, 1]} : vector<8x32xf32> to vector<8x16xf32>
    %cst_24 = arith.constant dense<0.000000e+00> : vector<8x8xf32>
    %46 = tpu.matmul %43, %44, %cst_24 {dimension_numbers = #tpu.dot_dimension_numbers<[1], [1], [0], [0], [0, 0, 1, 0], [], []>, precision = #tpu.contract_precision<fp32>} : vector<8x16xf32>, vector<8x16xf32>, vector<8x8xf32> -> vector<8x8xf32>
    %cst_25 = arith.constant 2.500000e-01 : f32
    %47 = vector.broadcast %cst_25 : f32 to vector<8x8xf32>
    %48 = arith.mulf %46, %47 : vector<8x8xf32>
    %cst_26 = arith.constant 0.000000e+00 : f32
    %49 = vector.broadcast %cst_26 : f32 to vector<1x8xf32>
    %50 = arith.cmpf ogt, %17, %49 : vector<1x8xf32>
    %cst_27 = arith.constant -1.000000e+09 : f32
    %51 = vector.shape_cast %50 : vector<1x8xi1> to vector<1x8xi1>
    %52 = vector.broadcast %51 : vector<1x8xi1> to vector<8x8xi1>
    %53 = vector.broadcast %cst_27 : f32 to vector<8x8xf32>
    %54 = arith.select %52, %48, %53 : vector<8x8xi1>, vector<8x8xf32>
    %cst_28 = arith.constant dense<0xFF800000> : vector<8xf32>
    %55 = vector.multi_reduction <maximumf>, %54, %cst_28 [1] : vector<8x8xf32> to vector<8xf32>
    %56 = vector.shape_cast %55 : vector<8xf32> to vector<8x1xf32>
    %57 = vector.broadcast %56 : vector<8x1xf32> to vector<8x8xf32>
    %58 = arith.subf %54, %57 : vector<8x8xf32>
    %59 = math.exp %58 : vector<8x8xf32>
    %cst_29 = arith.constant dense<0.000000e+00> : vector<8xf32>
    %60 = vector.multi_reduction <add>, %59, %cst_29 [1] : vector<8x8xf32> to vector<8xf32>
    %61 = vector.shape_cast %60 : vector<8xf32> to vector<8x1xf32>
    %62 = tpu.reciprocal %61 {approx = true} : vector<8x1xf32> -> vector<8x1xf32>
    %63 = vector.broadcast %62 : vector<8x1xf32> to vector<8x8xf32>
    %64 = arith.mulf %59, %63 : vector<8x8xf32>
    %cst_30 = arith.constant dense<0.000000e+00> : vector<8x16xf32>
    %65 = tpu.matmul %64, %45, %cst_30 {dimension_numbers = #tpu.dot_dimension_numbers<[1], [0], [0], [1], [0, 0, 1, 1], [], []>, precision = #tpu.contract_precision<fp32>} : vector<8x8xf32>, vector<8x16xf32>, vector<8x16xf32> -> vector<8x16xf32>
    %66 = vector.extract_strided_slice %13 {offsets = [16, 0], sizes = [16, 32], strides = [1, 1]} : vector<32x32xf32> to vector<16x32xf32>
    %cst_31 = arith.constant dense<0.000000e+00> : vector<8x32xf32>
    %67 = tpu.matmul %65, %66, %cst_31 {dimension_numbers = #tpu.dot_dimension_numbers<[1], [0], [0], [1], [0, 0, 1, 1], [], []>, precision = #tpu.contract_precision<fp32>} : vector<8x16xf32>, vector<16x32xf32>, vector<8x32xf32> -> vector<8x32xf32>
    %68 = arith.addf %42, %67 : vector<8x32xf32>
    %69 = vector.extract_strided_slice %8 {offsets = [0, 0], sizes = [8, 32], strides = [1, 1]} : vector<16x32xf32> to vector<8x32xf32>
    %70 = arith.addf %68, %69 : vector<8x32xf32>
    %71 = vector.extract_strided_slice %5 {offsets = [0, 0], sizes = [1, 32], strides = [1, 1]} : vector<4x32xf32> to vector<1x32xf32>
    %72 = vector.extract_strided_slice %7 {offsets = [0, 0], sizes = [1, 32], strides = [1, 1]} : vector<4x32xf32> to vector<1x32xf32>
    %cst_32 = arith.constant dense<0.000000e+00> : vector<8xf32>
    %73 = vector.multi_reduction <add>, %70, %cst_32 [1] : vector<8x32xf32> to vector<8xf32>
    %74 = vector.shape_cast %73 : vector<8xf32> to vector<8x1xf32>
    %cst_33 = arith.constant 3.200000e+01 : f32
    %75 = vector.broadcast %cst_33 : f32 to vector<8x1xf32>
    %76 = arith.divf %74, %75 : vector<8x1xf32>
    %77 = vector.broadcast %76 : vector<8x1xf32> to vector<8x32xf32>
    %78 = arith.subf %70, %77 : vector<8x32xf32>
    %79 = arith.mulf %78, %78 : vector<8x32xf32>
    %cst_34 = arith.constant dense<0.000000e+00> : vector<8xf32>
    %80 = vector.multi_reduction <add>, %79, %cst_34 [1] : vector<8x32xf32> to vector<8xf32>
    %81 = vector.shape_cast %80 : vector<8xf32> to vector<8x1xf32>
    %cst_35 = arith.constant 3.200000e+01 : f32
    %82 = vector.broadcast %cst_35 : f32 to vector<8x1xf32>
    %83 = arith.divf %81, %82 : vector<8x1xf32>
    %84 = vector.broadcast %76 : vector<8x1xf32> to vector<8x32xf32>
    %85 = arith.subf %70, %84 : vector<8x32xf32>
    %cst_36 = arith.constant 9.99999997E-7 : f32
    %86 = vector.broadcast %cst_36 : f32 to vector<8x1xf32>
    %87 = arith.addf %83, %86 : vector<8x1xf32>
    %88 = math.rsqrt %87 : vector<8x1xf32>
    %89 = vector.broadcast %88 : vector<8x1xf32> to vector<8x32xf32>
    %90 = arith.mulf %85, %89 : vector<8x32xf32>
    %91 = vector.broadcast %71 : vector<1x32xf32> to vector<8x32xf32>
    %92 = arith.mulf %90, %91 : vector<8x32xf32>
    %93 = vector.broadcast %72 : vector<1x32xf32> to vector<8x32xf32>
    %94 = arith.addf %92, %93 : vector<8x32xf32>
    %c0_37 = arith.constant 0 : index
    %c0_38 = arith.constant 0 : index
    %95 = vector.load %arg23[%c0_37, %c0_38] : memref<16x32xf32, #tpu.memory_space<vmem>>, vector<8x32xf32>
    tpu.vector_store %arg23[%c0_37, %c0_38], %94 {strides = array<i32>} : memref<16x32xf32, #tpu.memory_space<vmem>>, vector<8x32xf32>,
    %96 = vector.extract_strided_slice %11 {offsets = [8, 0], sizes = [8, 32], strides = [1, 1]} : vector<16x96xf32> to vector<8x32xf32>
    %97 = vector.extract_strided_slice %11 {offsets = [8, 32], sizes = [8, 32], strides = [1, 1]} : vector<16x96xf32> to vector<8x32xf32>
    %98 = vector.extract_strided_slice %11 {offsets = [8, 64], sizes = [8, 32], strides = [1, 1]} : vector<16x96xf32> to vector<8x32xf32>
    %99 = vector.extract_strided_slice %3 {offsets = [1, 0], sizes = [1, 8], strides = [1, 1]} : vector<2x8xf32> to vector<1x8xf32>
    %100 = vector.extract_strided_slice %96 {offsets = [0, 0], sizes = [8, 16], strides = [1, 1]} : vector<8x32xf32> to vector<8x16xf32>
    %101 = vector.extract_strided_slice %97 {offsets = [0, 0], sizes = [8, 16], strides = [1, 1]} : vector<8x32xf32> to vector<8x16xf32>
    %102 = vector.extract_strided_slice %98 {offsets = [0, 0], sizes = [8, 16], strides = [1, 1]} : vector<8x32xf32> to vector<8x16xf32>
    %cst_39 = arith.constant dense<0.000000e+00> : vector<8x8xf32>
    %103 = tpu.matmul %100, %101, %cst_39 {dimension_numbers = #tpu.dot_dimension_numbers<[1], [1], [0], [0], [0, 0, 1, 0], [], []>, precision = #tpu.contract_precision<fp32>} : vector<8x16xf32>, vector<8x16xf32>, vector<8x8xf32> -> vector<8x8xf32>
    %cst_40 = arith.constant 2.500000e-01 : f32
    %104 = vector.broadcast %cst_40 : f32 to vector<8x8xf32>
    %105 = arith.mulf %103, %104 : vector<8x8xf32>
    %cst_41 = arith.constant 0.000000e+00 : f32
    %106 = vector.broadcast %cst_41 : f32 to vector<1x8xf32>
    %107 = arith.cmpf ogt, %99, %106 : vector<1x8xf32>
    %cst_42 = arith.constant -1.000000e+09 : f32
    %108 = vector.shape_cast %107 : vector<1x8xi1> to vector<1x8xi1>
    %109 = vector.broadcast %108 : vector<1x8xi1> to vector<8x8xi1>
    %110 = vector.broadcast %cst_42 : f32 to vector<8x8xf32>
    %111 = arith.select %109, %105, %110 : vector<8x8xi1>, vector<8x8xf32>
    %cst_43 = arith.constant dense<0xFF800000> : vector<8xf32>
    %112 = vector.multi_reduction <maximumf>, %111, %cst_43 [1] : vector<8x8xf32> to vector<8xf32>
    %113 = vector.shape_cast %112 : vector<8xf32> to vector<8x1xf32>
    %114 = vector.broadcast %113 : vector<8x1xf32> to vector<8x8xf32>
    %115 = arith.subf %111, %114 : vector<8x8xf32>
    %116 = math.exp %115 : vector<8x8xf32>
    %cst_44 = arith.constant dense<0.000000e+00> : vector<8xf32>
    %117 = vector.multi_reduction <add>, %116, %cst_44 [1] : vector<8x8xf32> to vector<8xf32>
    %118 = vector.shape_cast %117 : vector<8xf32> to vector<8x1xf32>
    %119 = tpu.reciprocal %118 {approx = true} : vector<8x1xf32> -> vector<8x1xf32>
    %120 = vector.broadcast %119 : vector<8x1xf32> to vector<8x8xf32>
    %121 = arith.mulf %116, %120 : vector<8x8xf32>
    %cst_45 = arith.constant dense<0.000000e+00> : vector<8x16xf32>
    %122 = tpu.matmul %121, %102, %cst_45 {dimension_numbers = #tpu.dot_dimension_numbers<[1], [0], [0], [1], [0, 0, 1, 1], [], []>, precision = #tpu.contract_precision<fp32>} : vector<8x8xf32>, vector<8x16xf32>, vector<8x16xf32> -> vector<8x16xf32>
    %123 = vector.extract_strided_slice %13 {offsets = [0, 0], sizes = [16, 32], strides = [1, 1]} : vector<32x32xf32> to vector<16x32xf32>
    %cst_46 = arith.constant dense<0.000000e+00> : vector<8x32xf32>
    %124 = tpu.matmul %122, %123, %cst_46 {dimension_numbers = #tpu.dot_dimension_numbers<[1], [0], [0], [1], [0, 0, 1, 1], [], []>, precision = #tpu.contract_precision<fp32>} : vector<8x16xf32>, vector<16x32xf32>, vector<8x32xf32> -> vector<8x32xf32>
    %125 = vector.extract_strided_slice %96 {offsets = [0, 16], sizes = [8, 16], strides = [1, 1]} : vector<8x32xf32> to vector<8x16xf32>
    %126 = vector.extract_strided_slice %97 {offsets = [0, 16], sizes = [8, 16], strides = [1, 1]} : vector<8x32xf32> to vector<8x16xf32>
    %127 = vector.extract_strided_slice %98 {offsets = [0, 16], sizes = [8, 16], strides = [1, 1]} : vector<8x32xf32> to vector<8x16xf32>
    %cst_47 = arith.constant dense<0.000000e+00> : vector<8x8xf32>
    %128 = tpu.matmul %125, %126, %cst_47 {dimension_numbers = #tpu.dot_dimension_numbers<[1], [1], [0], [0], [0, 0, 1, 0], [], []>, precision = #tpu.contract_precision<fp32>} : vector<8x16xf32>, vector<8x16xf32>, vector<8x8xf32> -> vector<8x8xf32>
    %cst_48 = arith.constant 2.500000e-01 : f32
    %129 = vector.broadcast %cst_48 : f32 to vector<8x8xf32>
    %130 = arith.mulf %128, %129 : vector<8x8xf32>
    %cst_49 = arith.constant 0.000000e+00 : f32
    %131 = vector.broadcast %cst_49 : f32 to vector<1x8xf32>
    %132 = arith.cmpf ogt, %99, %131 : vector<1x8xf32>
    %cst_50 = arith.constant -1.000000e+09 : f32
    %133 = vector.shape_cast %132 : vector<1x8xi1> to vector<1x8xi1>
    %134 = vector.broadcast %133 : vector<1x8xi1> to vector<8x8xi1>
    %135 = vector.broadcast %cst_50 : f32 to vector<8x8xf32>
    %136 = arith.select %134, %130, %135 : vector<8x8xi1>, vector<8x8xf32>
    %cst_51 = arith.constant dense<0xFF800000> : vector<8xf32>
    %137 = vector.multi_reduction <maximumf>, %136, %cst_51 [1] : vector<8x8xf32> to vector<8xf32>
    %138 = vector.shape_cast %137 : vector<8xf32> to vector<8x1xf32>
    %139 = vector.broadcast %138 : vector<8x1xf32> to vector<8x8xf32>
    %140 = arith.subf %136, %139 : vector<8x8xf32>
    %141 = math.exp %140 : vector<8x8xf32>
    %cst_52 = arith.constant dense<0.000000e+00> : vector<8xf32>
    %142 = vector.multi_reduction <add>, %141, %cst_52 [1] : vector<8x8xf32> to vector<8xf32>
    %143 = vector.shape_cast %142 : vector<8xf32> to vector<8x1xf32>
    %144 = tpu.reciprocal %143 {approx = true} : vector<8x1xf32> -> vector<8x1xf32>
    %145 = vector.broadcast %144 : vector<8x1xf32> to vector<8x8xf32>
    %146 = arith.mulf %141, %145 : vector<8x8xf32>
    %cst_53 = arith.constant dense<0.000000e+00> : vector<8x16xf32>
    %147 = tpu.matmul %146, %127, %cst_53 {dimension_numbers = #tpu.dot_dimension_numbers<[1], [0], [0], [1], [0, 0, 1, 1], [], []>, precision = #tpu.contract_precision<fp32>} : vector<8x8xf32>, vector<8x16xf32>, vector<8x16xf32> -> vector<8x16xf32>
    %148 = vector.extract_strided_slice %13 {offsets = [16, 0], sizes = [16, 32], strides = [1, 1]} : vector<32x32xf32> to vector<16x32xf32>
    %cst_54 = arith.constant dense<0.000000e+00> : vector<8x32xf32>
    %149 = tpu.matmul %147, %148, %cst_54 {dimension_numbers = #tpu.dot_dimension_numbers<[1], [0], [0], [1], [0, 0, 1, 1], [], []>, precision = #tpu.contract_precision<fp32>} : vector<8x16xf32>, vector<16x32xf32>, vector<8x32xf32> -> vector<8x32xf32>
    %150 = arith.addf %124, %149 : vector<8x32xf32>
    %151 = vector.extract_strided_slice %8 {offsets = [8, 0], sizes = [8, 32], strides = [1, 1]} : vector<16x32xf32> to vector<8x32xf32>
    %152 = arith.addf %150, %151 : vector<8x32xf32>
    %153 = vector.extract_strided_slice %5 {offsets = [0, 0], sizes = [1, 32], strides = [1, 1]} : vector<4x32xf32> to vector<1x32xf32>
    %154 = vector.extract_strided_slice %7 {offsets = [0, 0], sizes = [1, 32], strides = [1, 1]} : vector<4x32xf32> to vector<1x32xf32>
    %cst_55 = arith.constant dense<0.000000e+00> : vector<8xf32>
    %155 = vector.multi_reduction <add>, %152, %cst_55 [1] : vector<8x32xf32> to vector<8xf32>
    %156 = vector.shape_cast %155 : vector<8xf32> to vector<8x1xf32>
    %cst_56 = arith.constant 3.200000e+01 : f32
    %157 = vector.broadcast %cst_56 : f32 to vector<8x1xf32>
    %158 = arith.divf %156, %157 : vector<8x1xf32>
    %159 = vector.broadcast %158 : vector<8x1xf32> to vector<8x32xf32>
    %160 = arith.subf %152, %159 : vector<8x32xf32>
    %161 = arith.mulf %160, %160 : vector<8x32xf32>
    %cst_57 = arith.constant dense<0.000000e+00> : vector<8xf32>
    %162 = vector.multi_reduction <add>, %161, %cst_57 [1] : vector<8x32xf32> to vector<8xf32>
    %163 = vector.shape_cast %162 : vector<8xf32> to vector<8x1xf32>
    %cst_58 = arith.constant 3.200000e+01 : f32
    %164 = vector.broadcast %cst_58 : f32 to vector<8x1xf32>
    %165 = arith.divf %163, %164 : vector<8x1xf32>
    %166 = vector.broadcast %158 : vector<8x1xf32> to vector<8x32xf32>
    %167 = arith.subf %152, %166 : vector<8x32xf32>
    %cst_59 = arith.constant 9.99999997E-7 : f32
    %168 = vector.broadcast %cst_59 : f32 to vector<8x1xf32>
    %169 = arith.addf %165, %168 : vector<8x1xf32>
    %170 = math.rsqrt %169 : vector<8x1xf32>
    %171 = vector.broadcast %170 : vector<8x1xf32> to vector<8x32xf32>
    %172 = arith.mulf %167, %171 : vector<8x32xf32>
    %173 = vector.broadcast %153 : vector<1x32xf32> to vector<8x32xf32>
    %174 = arith.mulf %172, %173 : vector<8x32xf32>
    %175 = vector.broadcast %154 : vector<1x32xf32> to vector<8x32xf32>
    %176 = arith.addf %174, %175 : vector<8x32xf32>
    %c8 = arith.constant 8 : index
    %c0_60 = arith.constant 0 : index
    %177 = vector.load %arg23[%c8, %c0_60] : memref<16x32xf32, #tpu.memory_space<vmem>>, vector<8x32xf32>
    tpu.vector_store %arg23[%c8, %c0_60], %176 {strides = array<i32>} : memref<16x32xf32, #tpu.memory_space<vmem>>, vector<8x32xf32>,
    %c0_61 = arith.constant 0 : index
    %c0_62 = arith.constant 0 : index
    %178 = vector.load %arg23[%c0_61, %c0_62] : memref<16x32xf32, #tpu.memory_space<vmem>>, vector<16x32xf32>
    %c0_63 = arith.constant 0 : index
    %c0_64 = arith.constant 0 : index
    %c0_65 = arith.constant 0 : index
    %179 = vector.load %arg8[%c0_63, %c0_64, %c0_65] : memref<1x32x64xf32, #tpu.memory_space<vmem>>, vector<1x32x64xf32>
    %180 = vector.shape_cast %179 : vector<1x32x64xf32> to vector<32x64xf32>
    %cst_66 = arith.constant dense<0.000000e+00> : vector<16x64xf32>
    %181 = tpu.matmul %178, %180, %cst_66 {dimension_numbers = #tpu.dot_dimension_numbers<[1], [0], [0], [1], [0, 0, 1, 1], [], []>, precision = #tpu.contract_precision<fp32>} : vector<16x32xf32>, vector<32x64xf32>, vector<16x64xf32> -> vector<16x64xf32>
    %c0_67 = arith.constant 0 : index
    %c0_68 = arith.constant 0 : index
    %c0_69 = arith.constant 0 : index
    %182 = vector.load %arg9[%c0_67, %c0_68, %c0_69] : memref<1x1x64xf32, #tpu.memory_space<vmem>>, vector<1x1x64xf32>
    %183 = vector.shape_cast %182 : vector<1x1x64xf32> to vector<1x64xf32>
    %184 = vector.broadcast %183 : vector<1x64xf32> to vector<16x64xf32>
    %185 = arith.addf %181, %184 : vector<16x64xf32>
    %cst_70 = arith.constant 0.000000e+00 : f32
    %186 = vector.broadcast %cst_70 : f32 to vector<16x64xf32>
    %187 = arith.maximumf %185, %186 : vector<16x64xf32>
    %c0_71 = arith.constant 0 : index
    %c0_72 = arith.constant 0 : index
    %c0_73 = arith.constant 0 : index
    %188 = vector.load %arg10[%c0_71, %c0_72, %c0_73] : memref<1x64x32xf32, #tpu.memory_space<vmem>>, vector<1x64x32xf32>
    %189 = vector.shape_cast %188 : vector<1x64x32xf32> to vector<64x32xf32>
    %cst_74 = arith.constant dense<0.000000e+00> : vector<16x32xf32>
    %190 = tpu.matmul %187, %189, %cst_74 {dimension_numbers = #tpu.dot_dimension_numbers<[1], [0], [0], [1], [0, 0, 1, 1], [], []>, precision = #tpu.contract_precision<fp32>} : vector<16x64xf32>, vector<64x32xf32>, vector<16x32xf32> -> vector<16x32xf32>
    %c0_75 = arith.constant 0 : index
    %c0_76 = arith.constant 0 : index
    %c0_77 = arith.constant 0 : index
    %191 = vector.load %arg11[%c0_75, %c0_76, %c0_77] : memref<1x1x32xf32, #tpu.memory_space<vmem>>, vector<1x1x32xf32>
    %192 = vector.shape_cast %191 : vector<1x1x32xf32> to vector<1x32xf32>
    %193 = vector.broadcast %192 : vector<1x32xf32> to vector<16x32xf32>
    %194 = arith.addf %190, %193 : vector<16x32xf32>
    %195 = arith.addf %194, %178 : vector<16x32xf32>
    %196 = vector.extract_strided_slice %5 {offsets = [1, 0], sizes = [1, 32], strides = [1, 1]} : vector<4x32xf32> to vector<1x32xf32>
    %197 = vector.extract_strided_slice %7 {offsets = [1, 0], sizes = [1, 32], strides = [1, 1]} : vector<4x32xf32> to vector<1x32xf32>
    %cst_78 = arith.constant dense<0.000000e+00> : vector<16xf32>
    %198 = vector.multi_reduction <add>, %195, %cst_78 [1] : vector<16x32xf32> to vector<16xf32>
    %199 = vector.shape_cast %198 : vector<16xf32> to vector<16x1xf32>
    %cst_79 = arith.constant 3.200000e+01 : f32
    %200 = vector.broadcast %cst_79 : f32 to vector<16x1xf32>
    %201 = arith.divf %199, %200 : vector<16x1xf32>
    %202 = vector.broadcast %201 : vector<16x1xf32> to vector<16x32xf32>
    %203 = arith.subf %195, %202 : vector<16x32xf32>
    %204 = arith.mulf %203, %203 : vector<16x32xf32>
    %cst_80 = arith.constant dense<0.000000e+00> : vector<16xf32>
    %205 = vector.multi_reduction <add>, %204, %cst_80 [1] : vector<16x32xf32> to vector<16xf32>
    %206 = vector.shape_cast %205 : vector<16xf32> to vector<16x1xf32>
    %cst_81 = arith.constant 3.200000e+01 : f32
    %207 = vector.broadcast %cst_81 : f32 to vector<16x1xf32>
    %208 = arith.divf %206, %207 : vector<16x1xf32>
    %209 = vector.broadcast %201 : vector<16x1xf32> to vector<16x32xf32>
    %210 = arith.subf %195, %209 : vector<16x32xf32>
    %cst_82 = arith.constant 9.99999997E-7 : f32
    %211 = vector.broadcast %cst_82 : f32 to vector<16x1xf32>
    %212 = arith.addf %208, %211 : vector<16x1xf32>
    %213 = math.rsqrt %212 : vector<16x1xf32>
    %214 = vector.broadcast %213 : vector<16x1xf32> to vector<16x32xf32>
    %215 = arith.mulf %210, %214 : vector<16x32xf32>
    %216 = vector.broadcast %196 : vector<1x32xf32> to vector<16x32xf32>
    %217 = arith.mulf %215, %216 : vector<16x32xf32>
    %218 = vector.broadcast %197 : vector<1x32xf32> to vector<16x32xf32>
    %219 = arith.addf %217, %218 : vector<16x32xf32>
    %c0_83 = arith.constant 0 : index
    %c0_84 = arith.constant 0 : index
    %220 = vector.load %arg23[%c0_83, %c0_84] : memref<16x32xf32, #tpu.memory_space<vmem>>, vector<16x32xf32>
    tpu.vector_store %arg23[%c0_83, %c0_84], %219 {strides = array<i32>} : memref<16x32xf32, #tpu.memory_space<vmem>>, vector<16x32xf32>,
    %c0_85 = arith.constant 0 : index
    %c0_86 = arith.constant 0 : index
    %221 = vector.load %arg21[%c0_85, %c0_86] : memref<16x32xf32, #tpu.memory_space<vmem>>, vector<16x32xf32>
    tpu.vector_store %arg21[%c0_85, %c0_86], %219 {strides = array<i32>} : memref<16x32xf32, #tpu.memory_space<vmem>>, vector<16x32xf32>,
    %c0_87 = arith.constant 0 : index
    %c0_88 = arith.constant 0 : index
    %c0_89 = arith.constant 0 : index
    %222 = vector.load %arg13[%c0_87, %c0_88, %c0_89] : memref<1x32x64xf32, #tpu.memory_space<vmem>>, vector<1x32x64xf32>
    %223 = vector.shape_cast %222 : vector<1x32x64xf32> to vector<32x64xf32>
    %cst_90 = arith.constant dense<0.000000e+00> : vector<16x64xf32>
    %224 = tpu.matmul %219, %223, %cst_90 {dimension_numbers = #tpu.dot_dimension_numbers<[1], [0], [0], [1], [0, 0, 1, 1], [], []>, precision = #tpu.contract_precision<fp32>} : vector<16x32xf32>, vector<32x64xf32>, vector<16x64xf32> -> vector<16x64xf32>
    %c0_91 = arith.constant 0 : index
    %c0_92 = arith.constant 0 : index
    %c0_93 = arith.constant 0 : index
    %225 = vector.load %arg14[%c0_91, %c0_92, %c0_93] : memref<1x32x32xf32, #tpu.memory_space<vmem>>, vector<1x32x32xf32>
    %226 = vector.shape_cast %225 : vector<1x32x32xf32> to vector<32x32xf32>
    %c0_94 = arith.constant 0 : index
    %c0_95 = arith.constant 0 : index
    %c0_96 = arith.constant 0 : index
    %227 = vector.load %arg24[%c0_94, %c0_95, %c0_96] : memref<2x4x32xf32, #tpu.memory_space<vmem>>, vector<1x4x32xf32>
    %228 = vector.shape_cast %227 : vector<1x4x32xf32> to vector<4x32xf32>
    %c0_97 = arith.constant 0 : index
    %c0_98 = arith.constant 0 : index
    %c0_99 = arith.constant 0 : index
    %229 = vector.load %arg12[%c0_97, %c0_98, %c0_99] : memref<1x32x32xf32, #tpu.memory_space<vmem>>, vector<1x32x32xf32>
    %230 = vector.shape_cast %229 : vector<1x32x32xf32> to vector<32x32xf32>
    %cst_100 = arith.constant dense<0.000000e+00> : vector<4x32xf32>
    %231 = tpu.matmul %228, %230, %cst_100 {dimension_numbers = #tpu.dot_dimension_numbers<[1], [0], [0], [1], [0, 0, 1, 1], [], []>, precision = #tpu.contract_precision<fp32>} : vector<4x32xf32>, vector<32x32xf32>, vector<4x32xf32> -> vector<4x32xf32>
    %232 = vector.extract_strided_slice %224 {offsets = [0, 0], sizes = [8, 32], strides = [1, 1]} : vector<16x64xf32> to vector<8x32xf32>
    %233 = vector.extract_strided_slice %224 {offsets = [0, 32], sizes = [8, 32], strides = [1, 1]} : vector<16x64xf32> to vector<8x32xf32>
    %234 = vector.extract_strided_slice %3 {offsets = [0, 0], sizes = [1, 8], strides = [1, 1]} : vector<2x8xf32> to vector<1x8xf32>
    %235 = vector.extract_strided_slice %231 {offsets = [0, 0], sizes = [4, 16], strides = [1, 1]} : vector<4x32xf32> to vector<4x16xf32>
    %236 = vector.extract_strided_slice %232 {offsets = [0, 0], sizes = [8, 16], strides = [1, 1]} : vector<8x32xf32> to vector<8x16xf32>
    %237 = vector.extract_strided_slice %233 {offsets = [0, 0], sizes = [8, 16], strides = [1, 1]} : vector<8x32xf32> to vector<8x16xf32>
    %cst_101 = arith.constant dense<0.000000e+00> : vector<4x8xf32>
    %238 = tpu.matmul %235, %236, %cst_101 {dimension_numbers = #tpu.dot_dimension_numbers<[1], [1], [0], [0], [0, 0, 1, 0], [], []>, precision = #tpu.contract_precision<fp32>} : vector<4x16xf32>, vector<8x16xf32>, vector<4x8xf32> -> vector<4x8xf32>
    %cst_102 = arith.constant 2.500000e-01 : f32
    %239 = vector.broadcast %cst_102 : f32 to vector<4x8xf32>
    %240 = arith.mulf %238, %239 : vector<4x8xf32>
    %cst_103 = arith.constant 0.000000e+00 : f32
    %241 = vector.broadcast %cst_103 : f32 to vector<1x8xf32>
    %242 = arith.cmpf ogt, %234, %241 : vector<1x8xf32>
    %cst_104 = arith.constant -1.000000e+09 : f32
    %243 = vector.shape_cast %242 : vector<1x8xi1> to vector<1x8xi1>
    %244 = vector.broadcast %243 : vector<1x8xi1> to vector<4x8xi1>
    %245 = vector.broadcast %cst_104 : f32 to vector<4x8xf32>
    %246 = arith.select %244, %240, %245 : vector<4x8xi1>, vector<4x8xf32>
    %cst_105 = arith.constant dense<0xFF800000> : vector<4xf32>
    %247 = vector.multi_reduction <maximumf>, %246, %cst_105 [1] : vector<4x8xf32> to vector<4xf32>
    %248 = vector.shape_cast %247 : vector<4xf32> to vector<4x1xf32>
    %249 = vector.broadcast %248 : vector<4x1xf32> to vector<4x8xf32>
    %250 = arith.subf %246, %249 : vector<4x8xf32>
    %251 = math.exp %250 : vector<4x8xf32>
    %cst_106 = arith.constant dense<0.000000e+00> : vector<4xf32>
    %252 = vector.multi_reduction <add>, %251, %cst_106 [1] : vector<4x8xf32> to vector<4xf32>
    %253 = vector.shape_cast %252 : vector<4xf32> to vector<4x1xf32>
    %254 = tpu.reciprocal %253 {approx = true} : vector<4x1xf32> -> vector<4x1xf32>
    %255 = vector.broadcast %254 : vector<4x1xf32> to vector<4x8xf32>
    %256 = arith.mulf %251, %255 : vector<4x8xf32>
    %cst_107 = arith.constant dense<0.000000e+00> : vector<4x16xf32>
    %257 = tpu.matmul %256, %237, %cst_107 {dimension_numbers = #tpu.dot_dimension_numbers<[1], [0], [0], [1], [0, 0, 1, 1], [], []>, precision = #tpu.contract_precision<fp32>} : vector<4x8xf32>, vector<8x16xf32>, vector<4x16xf32> -> vector<4x16xf32>
    %258 = vector.extract_strided_slice %226 {offsets = [0, 0], sizes = [16, 32], strides = [1, 1]} : vector<32x32xf32> to vector<16x32xf32>
    %cst_108 = arith.constant dense<0.000000e+00> : vector<4x32xf32>
    %259 = tpu.matmul %257, %258, %cst_108 {dimension_numbers = #tpu.dot_dimension_numbers<[1], [0], [0], [1], [0, 0, 1, 1], [], []>, precision = #tpu.contract_precision<fp32>} : vector<4x16xf32>, vector<16x32xf32>, vector<4x32xf32> -> vector<4x32xf32>
    %260 = vector.extract_strided_slice %231 {offsets = [0, 16], sizes = [4, 16], strides = [1, 1]} : vector<4x32xf32> to vector<4x16xf32>
    %261 = vector.extract_strided_slice %232 {offsets = [0, 16], sizes = [8, 16], strides = [1, 1]} : vector<8x32xf32> to vector<8x16xf32>
    %262 = vector.extract_strided_slice %233 {offsets = [0, 16], sizes = [8, 16], strides = [1, 1]} : vector<8x32xf32> to vector<8x16xf32>
    %cst_109 = arith.constant dense<0.000000e+00> : vector<4x8xf32>
    %263 = tpu.matmul %260, %261, %cst_109 {dimension_numbers = #tpu.dot_dimension_numbers<[1], [1], [0], [0], [0, 0, 1, 0], [], []>, precision = #tpu.contract_precision<fp32>} : vector<4x16xf32>, vector<8x16xf32>, vector<4x8xf32> -> vector<4x8xf32>
    %cst_110 = arith.constant 2.500000e-01 : f32
    %264 = vector.broadcast %cst_110 : f32 to vector<4x8xf32>
    %265 = arith.mulf %263, %264 : vector<4x8xf32>
    %cst_111 = arith.constant 0.000000e+00 : f32
    %266 = vector.broadcast %cst_111 : f32 to vector<1x8xf32>
    %267 = arith.cmpf ogt, %234, %266 : vector<1x8xf32>
    %cst_112 = arith.constant -1.000000e+09 : f32
    %268 = vector.shape_cast %267 : vector<1x8xi1> to vector<1x8xi1>
    %269 = vector.broadcast %268 : vector<1x8xi1> to vector<4x8xi1>
    %270 = vector.broadcast %cst_112 : f32 to vector<4x8xf32>
    %271 = arith.select %269, %265, %270 : vector<4x8xi1>, vector<4x8xf32>
    %cst_113 = arith.constant dense<0xFF800000> : vector<4xf32>
    %272 = vector.multi_reduction <maximumf>, %271, %cst_113 [1] : vector<4x8xf32> to vector<4xf32>
    %273 = vector.shape_cast %272 : vector<4xf32> to vector<4x1xf32>
    %274 = vector.broadcast %273 : vector<4x1xf32> to vector<4x8xf32>
    %275 = arith.subf %271, %274 : vector<4x8xf32>
    %276 = math.exp %275 : vector<4x8xf32>
    %cst_114 = arith.constant dense<0.000000e+00> : vector<4xf32>
    %277 = vector.multi_reduction <add>, %276, %cst_114 [1] : vector<4x8xf32> to vector<4xf32>
    %278 = vector.shape_cast %277 : vector<4xf32> to vector<4x1xf32>
    %279 = tpu.reciprocal %278 {approx = true} : vector<4x1xf32> -> vector<4x1xf32>
    %280 = vector.broadcast %279 : vector<4x1xf32> to vector<4x8xf32>
    %281 = arith.mulf %276, %280 : vector<4x8xf32>
    %cst_115 = arith.constant dense<0.000000e+00> : vector<4x16xf32>
    %282 = tpu.matmul %281, %262, %cst_115 {dimension_numbers = #tpu.dot_dimension_numbers<[1], [0], [0], [1], [0, 0, 1, 1], [], []>, precision = #tpu.contract_precision<fp32>} : vector<4x8xf32>, vector<8x16xf32>, vector<4x16xf32> -> vector<4x16xf32>
    %283 = vector.extract_strided_slice %226 {offsets = [16, 0], sizes = [16, 32], strides = [1, 1]} : vector<32x32xf32> to vector<16x32xf32>
    %cst_116 = arith.constant dense<0.000000e+00> : vector<4x32xf32>
    %284 = tpu.matmul %282, %283, %cst_116 {dimension_numbers = #tpu.dot_dimension_numbers<[1], [0], [0], [1], [0, 0, 1, 1], [], []>, precision = #tpu.contract_precision<fp32>} : vector<4x16xf32>, vector<16x32xf32>, vector<4x32xf32> -> vector<4x32xf32>
    %285 = arith.addf %259, %284 : vector<4x32xf32>
    %286 = arith.addf %285, %228 : vector<4x32xf32>
    %287 = vector.extract_strided_slice %5 {offsets = [2, 0], sizes = [1, 32], strides = [1, 1]} : vector<4x32xf32> to vector<1x32xf32>
    %288 = vector.extract_strided_slice %7 {offsets = [2, 0], sizes = [1, 32], strides = [1, 1]} : vector<4x32xf32> to vector<1x32xf32>
    %cst_117 = arith.constant dense<0.000000e+00> : vector<4xf32>
    %289 = vector.multi_reduction <add>, %286, %cst_117 [1] : vector<4x32xf32> to vector<4xf32>
    %290 = vector.shape_cast %289 : vector<4xf32> to vector<4x1xf32>
    %cst_118 = arith.constant 3.200000e+01 : f32
    %291 = vector.broadcast %cst_118 : f32 to vector<4x1xf32>
    %292 = arith.divf %290, %291 : vector<4x1xf32>
    %293 = vector.broadcast %292 : vector<4x1xf32> to vector<4x32xf32>
    %294 = arith.subf %286, %293 : vector<4x32xf32>
    %295 = arith.mulf %294, %294 : vector<4x32xf32>
    %cst_119 = arith.constant dense<0.000000e+00> : vector<4xf32>
    %296 = vector.multi_reduction <add>, %295, %cst_119 [1] : vector<4x32xf32> to vector<4xf32>
    %297 = vector.shape_cast %296 : vector<4xf32> to vector<4x1xf32>
    %cst_120 = arith.constant 3.200000e+01 : f32
    %298 = vector.broadcast %cst_120 : f32 to vector<4x1xf32>
    %299 = arith.divf %297, %298 : vector<4x1xf32>
    %300 = vector.broadcast %292 : vector<4x1xf32> to vector<4x32xf32>
    %301 = arith.subf %286, %300 : vector<4x32xf32>
    %cst_121 = arith.constant 9.99999997E-7 : f32
    %302 = vector.broadcast %cst_121 : f32 to vector<4x1xf32>
    %303 = arith.addf %299, %302 : vector<4x1xf32>
    %304 = math.rsqrt %303 : vector<4x1xf32>
    %305 = vector.broadcast %304 : vector<4x1xf32> to vector<4x32xf32>
    %306 = arith.mulf %301, %305 : vector<4x32xf32>
    %307 = vector.broadcast %287 : vector<1x32xf32> to vector<4x32xf32>
    %308 = arith.mulf %306, %307 : vector<4x32xf32>
    %309 = vector.broadcast %288 : vector<1x32xf32> to vector<4x32xf32>
    %310 = arith.addf %308, %309 : vector<4x32xf32>
    %c0_122 = arith.constant 0 : index
    %c0_123 = arith.constant 0 : index
    %c0_124 = arith.constant 0 : index
    %311 = vector.load %arg15[%c0_122, %c0_123, %c0_124] : memref<1x32x64xf32, #tpu.memory_space<vmem>>, vector<1x32x64xf32>
    %312 = vector.shape_cast %311 : vector<1x32x64xf32> to vector<32x64xf32>
    %cst_125 = arith.constant dense<0.000000e+00> : vector<4x64xf32>
    %313 = tpu.matmul %310, %312, %cst_125 {dimension_numbers = #tpu.dot_dimension_numbers<[1], [0], [0], [1], [0, 0, 1, 1], [], []>, precision = #tpu.contract_precision<fp32>} : vector<4x32xf32>, vector<32x64xf32>, vector<4x64xf32> -> vector<4x64xf32>
    %c0_126 = arith.constant 0 : index
    %c0_127 = arith.constant 0 : index
    %c0_128 = arith.constant 0 : index
    %314 = vector.load %arg16[%c0_126, %c0_127, %c0_128] : memref<1x1x64xf32, #tpu.memory_space<vmem>>, vector<1x1x64xf32>
    %315 = vector.shape_cast %314 : vector<1x1x64xf32> to vector<1x64xf32>
    %316 = vector.broadcast %315 : vector<1x64xf32> to vector<4x64xf32>
    %317 = arith.addf %313, %316 : vector<4x64xf32>
    %cst_129 = arith.constant 0.000000e+00 : f32
    %318 = vector.broadcast %cst_129 : f32 to vector<4x64xf32>
    %319 = arith.maximumf %317, %318 : vector<4x64xf32>
    %c0_130 = arith.constant 0 : index
    %c0_131 = arith.constant 0 : index
    %c0_132 = arith.constant 0 : index
    %320 = vector.load %arg17[%c0_130, %c0_131, %c0_132] : memref<1x64x32xf32, #tpu.memory_space<vmem>>, vector<1x64x32xf32>
    %321 = vector.shape_cast %320 : vector<1x64x32xf32> to vector<64x32xf32>
    %cst_133 = arith.constant dense<0.000000e+00> : vector<4x32xf32>
    %322 = tpu.matmul %319, %321, %cst_133 {dimension_numbers = #tpu.dot_dimension_numbers<[1], [0], [0], [1], [0, 0, 1, 1], [], []>, precision = #tpu.contract_precision<fp32>} : vector<4x64xf32>, vector<64x32xf32>, vector<4x32xf32> -> vector<4x32xf32>
    %c0_134 = arith.constant 0 : index
    %c0_135 = arith.constant 0 : index
    %c0_136 = arith.constant 0 : index
    %323 = vector.load %arg18[%c0_134, %c0_135, %c0_136] : memref<1x1x32xf32, #tpu.memory_space<vmem>>, vector<1x1x32xf32>
    %324 = vector.shape_cast %323 : vector<1x1x32xf32> to vector<1x32xf32>
    %325 = vector.broadcast %324 : vector<1x32xf32> to vector<4x32xf32>
    %326 = arith.addf %322, %325 : vector<4x32xf32>
    %327 = arith.addf %326, %310 : vector<4x32xf32>
    %328 = vector.extract_strided_slice %5 {offsets = [3, 0], sizes = [1, 32], strides = [1, 1]} : vector<4x32xf32> to vector<1x32xf32>
    %329 = vector.extract_strided_slice %7 {offsets = [3, 0], sizes = [1, 32], strides = [1, 1]} : vector<4x32xf32> to vector<1x32xf32>
    %cst_137 = arith.constant dense<0.000000e+00> : vector<4xf32>
    %330 = vector.multi_reduction <add>, %327, %cst_137 [1] : vector<4x32xf32> to vector<4xf32>
    %331 = vector.shape_cast %330 : vector<4xf32> to vector<4x1xf32>
    %cst_138 = arith.constant 3.200000e+01 : f32
    %332 = vector.broadcast %cst_138 : f32 to vector<4x1xf32>
    %333 = arith.divf %331, %332 : vector<4x1xf32>
    %334 = vector.broadcast %333 : vector<4x1xf32> to vector<4x32xf32>
    %335 = arith.subf %327, %334 : vector<4x32xf32>
    %336 = arith.mulf %335, %335 : vector<4x32xf32>
    %cst_139 = arith.constant dense<0.000000e+00> : vector<4xf32>
    %337 = vector.multi_reduction <add>, %336, %cst_139 [1] : vector<4x32xf32> to vector<4xf32>
    %338 = vector.shape_cast %337 : vector<4xf32> to vector<4x1xf32>
    %cst_140 = arith.constant 3.200000e+01 : f32
    %339 = vector.broadcast %cst_140 : f32 to vector<4x1xf32>
    %340 = arith.divf %338, %339 : vector<4x1xf32>
    %341 = vector.broadcast %333 : vector<4x1xf32> to vector<4x32xf32>
    %342 = arith.subf %327, %341 : vector<4x32xf32>
    %cst_141 = arith.constant 9.99999997E-7 : f32
    %343 = vector.broadcast %cst_141 : f32 to vector<4x1xf32>
    %344 = arith.addf %340, %343 : vector<4x1xf32>
    %345 = math.rsqrt %344 : vector<4x1xf32>
    %346 = vector.broadcast %345 : vector<4x1xf32> to vector<4x32xf32>
    %347 = arith.mulf %342, %346 : vector<4x32xf32>
    %348 = vector.broadcast %328 : vector<1x32xf32> to vector<4x32xf32>
    %349 = arith.mulf %347, %348 : vector<4x32xf32>
    %350 = vector.broadcast %329 : vector<1x32xf32> to vector<4x32xf32>
    %351 = arith.addf %349, %350 : vector<4x32xf32>
    %c0_142 = arith.constant 0 : index
    %c0_143 = arith.constant 0 : index
    %c0_144 = arith.constant 0 : index
    %352 = vector.load %arg24[%c0_142, %c0_143, %c0_144] : memref<2x4x32xf32, #tpu.memory_space<vmem>>, vector<1x4x32xf32>
    %353 = vector.shape_cast %352 : vector<1x4x32xf32> to vector<4x32xf32>
    %354 = vector.shape_cast %351 : vector<4x32xf32> to vector<1x4x32xf32>
    tpu.vector_store %arg24[%c0_142, %c0_143, %c0_144], %354 {strides = array<i32>} : memref<2x4x32xf32, #tpu.memory_space<vmem>>, vector<1x4x32xf32>,
    %c0_145 = arith.constant 0 : index
    %c0_146 = arith.constant 0 : index
    %c0_147 = arith.constant 0 : index
    %355 = vector.load %arg22[%c0_145, %c0_146, %c0_147] : memref<2x4x32xf32, #tpu.memory_space<vmem>>, vector<1x4x32xf32>
    %356 = vector.shape_cast %355 : vector<1x4x32xf32> to vector<4x32xf32>
    %357 = vector.shape_cast %351 : vector<4x32xf32> to vector<1x4x32xf32>
    tpu.vector_store %arg22[%c0_145, %c0_146, %c0_147], %357 {strides = array<i32>} : memref<2x4x32xf32, #tpu.memory_space<vmem>>, vector<1x4x32xf32>,
    %c1 = arith.constant 1 : index
    %c0_148 = arith.constant 0 : index
    %c0_149 = arith.constant 0 : index
    %358 = vector.load %arg24[%c1, %c0_148, %c0_149] : memref<2x4x32xf32, #tpu.memory_space<vmem>>, vector<1x4x32xf32>
    %359 = vector.shape_cast %358 : vector<1x4x32xf32> to vector<4x32xf32>
    %c0_150 = arith.constant 0 : index
    %c0_151 = arith.constant 0 : index
    %c0_152 = arith.constant 0 : index
    %360 = vector.load %arg12[%c0_150, %c0_151, %c0_152] : memref<1x32x32xf32, #tpu.memory_space<vmem>>, vector<1x32x32xf32>
    %361 = vector.shape_cast %360 : vector<1x32x32xf32> to vector<32x32xf32>
    %cst_153 = arith.constant dense<0.000000e+00> : vector<4x32xf32>
    %362 = tpu.matmul %359, %361, %cst_153 {dimension_numbers = #tpu.dot_dimension_numbers<[1], [0], [0], [1], [0, 0, 1, 1], [], []>, precision = #tpu.contract_precision<fp32>} : vector<4x32xf32>, vector<32x32xf32>, vector<4x32xf32> -> vector<4x32xf32>
    %363 = vector.extract_strided_slice %224 {offsets = [8, 0], sizes = [8, 32], strides = [1, 1]} : vector<16x64xf32> to vector<8x32xf32>
    %364 = vector.extract_strided_slice %224 {offsets = [8, 32], sizes = [8, 32], strides = [1, 1]} : vector<16x64xf32> to vector<8x32xf32>
    %365 = vector.extract_strided_slice %3 {offsets = [1, 0], sizes = [1, 8], strides = [1, 1]} : vector<2x8xf32> to vector<1x8xf32>
    %366 = vector.extract_strided_slice %362 {offsets = [0, 0], sizes = [4, 16], strides = [1, 1]} : vector<4x32xf32> to vector<4x16xf32>
    %367 = vector.extract_strided_slice %363 {offsets = [0, 0], sizes = [8, 16], strides = [1, 1]} : vector<8x32xf32> to vector<8x16xf32>
    %368 = vector.extract_strided_slice %364 {offsets = [0, 0], sizes = [8, 16], strides = [1, 1]} : vector<8x32xf32> to vector<8x16xf32>
    %cst_154 = arith.constant dense<0.000000e+00> : vector<4x8xf32>
    %369 = tpu.matmul %366, %367, %cst_154 {dimension_numbers = #tpu.dot_dimension_numbers<[1], [1], [0], [0], [0, 0, 1, 0], [], []>, precision = #tpu.contract_precision<fp32>} : vector<4x16xf32>, vector<8x16xf32>, vector<4x8xf32> -> vector<4x8xf32>
    %cst_155 = arith.constant 2.500000e-01 : f32
    %370 = vector.broadcast %cst_155 : f32 to vector<4x8xf32>
    %371 = arith.mulf %369, %370 : vector<4x8xf32>
    %cst_156 = arith.constant 0.000000e+00 : f32
    %372 = vector.broadcast %cst_156 : f32 to vector<1x8xf32>
    %373 = arith.cmpf ogt, %365, %372 : vector<1x8xf32>
    %cst_157 = arith.constant -1.000000e+09 : f32
    %374 = vector.shape_cast %373 : vector<1x8xi1> to vector<1x8xi1>
    %375 = vector.broadcast %374 : vector<1x8xi1> to vector<4x8xi1>
    %376 = vector.broadcast %cst_157 : f32 to vector<4x8xf32>
    %377 = arith.select %375, %371, %376 : vector<4x8xi1>, vector<4x8xf32>
    %cst_158 = arith.constant dense<0xFF800000> : vector<4xf32>
    %378 = vector.multi_reduction <maximumf>, %377, %cst_158 [1] : vector<4x8xf32> to vector<4xf32>
    %379 = vector.shape_cast %378 : vector<4xf32> to vector<4x1xf32>
    %380 = vector.broadcast %379 : vector<4x1xf32> to vector<4x8xf32>
    %381 = arith.subf %377, %380 : vector<4x8xf32>
    %382 = math.exp %381 : vector<4x8xf32>
    %cst_159 = arith.constant dense<0.000000e+00> : vector<4xf32>
    %383 = vector.multi_reduction <add>, %382, %cst_159 [1] : vector<4x8xf32> to vector<4xf32>
    %384 = vector.shape_cast %383 : vector<4xf32> to vector<4x1xf32>
    %385 = tpu.reciprocal %384 {approx = true} : vector<4x1xf32> -> vector<4x1xf32>
    %386 = vector.broadcast %385 : vector<4x1xf32> to vector<4x8xf32>
    %387 = arith.mulf %382, %386 : vector<4x8xf32>
    %cst_160 = arith.constant dense<0.000000e+00> : vector<4x16xf32>
    %388 = tpu.matmul %387, %368, %cst_160 {dimension_numbers = #tpu.dot_dimension_numbers<[1], [0], [0], [1], [0, 0, 1, 1], [], []>, precision = #tpu.contract_precision<fp32>} : vector<4x8xf32>, vector<8x16xf32>, vector<4x16xf32> -> vector<4x16xf32>
    %389 = vector.extract_strided_slice %226 {offsets = [0, 0], sizes = [16, 32], strides = [1, 1]} : vector<32x32xf32> to vector<16x32xf32>
    %cst_161 = arith.constant dense<0.000000e+00> : vector<4x32xf32>
    %390 = tpu.matmul %388, %389, %cst_161 {dimension_numbers = #tpu.dot_dimension_numbers<[1], [0], [0], [1], [0, 0, 1, 1], [], []>, precision = #tpu.contract_precision<fp32>} : vector<4x16xf32>, vector<16x32xf32>, vector<4x32xf32> -> vector<4x32xf32>
    %391 = vector.extract_strided_slice %362 {offsets = [0, 16], sizes = [4, 16], strides = [1, 1]} : vector<4x32xf32> to vector<4x16xf32>
    %392 = vector.extract_strided_slice %363 {offsets = [0, 16], sizes = [8, 16], strides = [1, 1]} : vector<8x32xf32> to vector<8x16xf32>
    %393 = vector.extract_strided_slice %364 {offsets = [0, 16], sizes = [8, 16], strides = [1, 1]} : vector<8x32xf32> to vector<8x16xf32>
    %cst_162 = arith.constant dense<0.000000e+00> : vector<4x8xf32>
    %394 = tpu.matmul %391, %392, %cst_162 {dimension_numbers = #tpu.dot_dimension_numbers<[1], [1], [0], [0], [0, 0, 1, 0], [], []>, precision = #tpu.contract_precision<fp32>} : vector<4x16xf32>, vector<8x16xf32>, vector<4x8xf32> -> vector<4x8xf32>
    %cst_163 = arith.constant 2.500000e-01 : f32
    %395 = vector.broadcast %cst_163 : f32 to vector<4x8xf32>
    %396 = arith.mulf %394, %395 : vector<4x8xf32>
    %cst_164 = arith.constant 0.000000e+00 : f32
    %397 = vector.broadcast %cst_164 : f32 to vector<1x8xf32>
    %398 = arith.cmpf ogt, %365, %397 : vector<1x8xf32>
    %cst_165 = arith.constant -1.000000e+09 : f32
    %399 = vector.shape_cast %398 : vector<1x8xi1> to vector<1x8xi1>
    %400 = vector.broadcast %399 : vector<1x8xi1> to vector<4x8xi1>
    %401 = vector.broadcast %cst_165 : f32 to vector<4x8xf32>
    %402 = arith.select %400, %396, %401 : vector<4x8xi1>, vector<4x8xf32>
    %cst_166 = arith.constant dense<0xFF800000> : vector<4xf32>
    %403 = vector.multi_reduction <maximumf>, %402, %cst_166 [1] : vector<4x8xf32> to vector<4xf32>
    %404 = vector.shape_cast %403 : vector<4xf32> to vector<4x1xf32>
    %405 = vector.broadcast %404 : vector<4x1xf32> to vector<4x8xf32>
    %406 = arith.subf %402, %405 : vector<4x8xf32>
    %407 = math.exp %406 : vector<4x8xf32>
    %cst_167 = arith.constant dense<0.000000e+00> : vector<4xf32>
    %408 = vector.multi_reduction <add>, %407, %cst_167 [1] : vector<4x8xf32> to vector<4xf32>
    %409 = vector.shape_cast %408 : vector<4xf32> to vector<4x1xf32>
    %410 = tpu.reciprocal %409 {approx = true} : vector<4x1xf32> -> vector<4x1xf32>
    %411 = vector.broadcast %410 : vector<4x1xf32> to vector<4x8xf32>
    %412 = arith.mulf %407, %411 : vector<4x8xf32>
    %cst_168 = arith.constant dense<0.000000e+00> : vector<4x16xf32>
    %413 = tpu.matmul %412, %393, %cst_168 {dimension_numbers = #tpu.dot_dimension_numbers<[1], [0], [0], [1], [0, 0, 1, 1], [], []>, precision = #tpu.contract_precision<fp32>} : vector<4x8xf32>, vector<8x16xf32>, vector<4x16xf32> -> vector<4x16xf32>
    %414 = vector.extract_strided_slice %226 {offsets = [16, 0], sizes = [16, 32], strides = [1, 1]} : vector<32x32xf32> to vector<16x32xf32>
    %cst_169 = arith.constant dense<0.000000e+00> : vector<4x32xf32>
    %415 = tpu.matmul %413, %414, %cst_169 {dimension_numbers = #tpu.dot_dimension_numbers<[1], [0], [0], [1], [0, 0, 1, 1], [], []>, precision = #tpu.contract_precision<fp32>} : vector<4x16xf32>, vector<16x32xf32>, vector<4x32xf32> -> vector<4x32xf32>
    %416 = arith.addf %390, %415 : vector<4x32xf32>
    %417 = arith.addf %416, %359 : vector<4x32xf32>
    %418 = vector.extract_strided_slice %5 {offsets = [2, 0], sizes = [1, 32], strides = [1, 1]} : vector<4x32xf32> to vector<1x32xf32>
    %419 = vector.extract_strided_slice %7 {offsets = [2, 0], sizes = [1, 32], strides = [1, 1]} : vector<4x32xf32> to vector<1x32xf32>
    %cst_170 = arith.constant dense<0.000000e+00> : vector<4xf32>
    %420 = vector.multi_reduction <add>, %417, %cst_170 [1] : vector<4x32xf32> to vector<4xf32>
    %421 = vector.shape_cast %420 : vector<4xf32> to vector<4x1xf32>
    %cst_171 = arith.constant 3.200000e+01 : f32
    %422 = vector.broadcast %cst_171 : f32 to vector<4x1xf32>
    %423 = arith.divf %421, %422 : vector<4x1xf32>
    %424 = vector.broadcast %423 : vector<4x1xf32> to vector<4x32xf32>
    %425 = arith.subf %417, %424 : vector<4x32xf32>
    %426 = arith.mulf %425, %425 : vector<4x32xf32>
    %cst_172 = arith.constant dense<0.000000e+00> : vector<4xf32>
    %427 = vector.multi_reduction <add>, %426, %cst_172 [1] : vector<4x32xf32> to vector<4xf32>
    %428 = vector.shape_cast %427 : vector<4xf32> to vector<4x1xf32>
    %cst_173 = arith.constant 3.200000e+01 : f32
    %429 = vector.broadcast %cst_173 : f32 to vector<4x1xf32>
    %430 = arith.divf %428, %429 : vector<4x1xf32>
    %431 = vector.broadcast %423 : vector<4x1xf32> to vector<4x32xf32>
    %432 = arith.subf %417, %431 : vector<4x32xf32>
    %cst_174 = arith.constant 9.99999997E-7 : f32
    %433 = vector.broadcast %cst_174 : f32 to vector<4x1xf32>
    %434 = arith.addf %430, %433 : vector<4x1xf32>
    %435 = math.rsqrt %434 : vector<4x1xf32>
    %436 = vector.broadcast %435 : vector<4x1xf32> to vector<4x32xf32>
    %437 = arith.mulf %432, %436 : vector<4x32xf32>
    %438 = vector.broadcast %418 : vector<1x32xf32> to vector<4x32xf32>
    %439 = arith.mulf %437, %438 : vector<4x32xf32>
    %440 = vector.broadcast %419 : vector<1x32xf32> to vector<4x32xf32>
    %441 = arith.addf %439, %440 : vector<4x32xf32>
    %c0_175 = arith.constant 0 : index
    %c0_176 = arith.constant 0 : index
    %c0_177 = arith.constant 0 : index
    %442 = vector.load %arg15[%c0_175, %c0_176, %c0_177] : memref<1x32x64xf32, #tpu.memory_space<vmem>>, vector<1x32x64xf32>
    %443 = vector.shape_cast %442 : vector<1x32x64xf32> to vector<32x64xf32>
    %cst_178 = arith.constant dense<0.000000e+00> : vector<4x64xf32>
    %444 = tpu.matmul %441, %443, %cst_178 {dimension_numbers = #tpu.dot_dimension_numbers<[1], [0], [0], [1], [0, 0, 1, 1], [], []>, precision = #tpu.contract_precision<fp32>} : vector<4x32xf32>, vector<32x64xf32>, vector<4x64xf32> -> vector<4x64xf32>
    %c0_179 = arith.constant 0 : index
    %c0_180 = arith.constant 0 : index
    %c0_181 = arith.constant 0 : index
    %445 = vector.load %arg16[%c0_179, %c0_180, %c0_181] : memref<1x1x64xf32, #tpu.memory_space<vmem>>, vector<1x1x64xf32>
    %446 = vector.shape_cast %445 : vector<1x1x64xf32> to vector<1x64xf32>
    %447 = vector.broadcast %446 : vector<1x64xf32> to vector<4x64xf32>
    %448 = arith.addf %444, %447 : vector<4x64xf32>
    %cst_182 = arith.constant 0.000000e+00 : f32
    %449 = vector.broadcast %cst_182 : f32 to vector<4x64xf32>
    %450 = arith.maximumf %448, %449 : vector<4x64xf32>
    %c0_183 = arith.constant 0 : index
    %c0_184 = arith.constant 0 : index
    %c0_185 = arith.constant 0 : index
    %451 = vector.load %arg17[%c0_183, %c0_184, %c0_185] : memref<1x64x32xf32, #tpu.memory_space<vmem>>, vector<1x64x32xf32>
    %452 = vector.shape_cast %451 : vector<1x64x32xf32> to vector<64x32xf32>
    %cst_186 = arith.constant dense<0.000000e+00> : vector<4x32xf32>
    %453 = tpu.matmul %450, %452, %cst_186 {dimension_numbers = #tpu.dot_dimension_numbers<[1], [0], [0], [1], [0, 0, 1, 1], [], []>, precision = #tpu.contract_precision<fp32>} : vector<4x64xf32>, vector<64x32xf32>, vector<4x32xf32> -> vector<4x32xf32>
    %c0_187 = arith.constant 0 : index
    %c0_188 = arith.constant 0 : index
    %c0_189 = arith.constant 0 : index
    %454 = vector.load %arg18[%c0_187, %c0_188, %c0_189] : memref<1x1x32xf32, #tpu.memory_space<vmem>>, vector<1x1x32xf32>
    %455 = vector.shape_cast %454 : vector<1x1x32xf32> to vector<1x32xf32>
    %456 = vector.broadcast %455 : vector<1x32xf32> to vector<4x32xf32>
    %457 = arith.addf %453, %456 : vector<4x32xf32>
    %458 = arith.addf %457, %441 : vector<4x32xf32>
    %459 = vector.extract_strided_slice %5 {offsets = [3, 0], sizes = [1, 32], strides = [1, 1]} : vector<4x32xf32> to vector<1x32xf32>
    %460 = vector.extract_strided_slice %7 {offsets = [3, 0], sizes = [1, 32], strides = [1, 1]} : vector<4x32xf32> to vector<1x32xf32>
    %cst_190 = arith.constant dense<0.000000e+00> : vector<4xf32>
    %461 = vector.multi_reduction <add>, %458, %cst_190 [1] : vector<4x32xf32> to vector<4xf32>
    %462 = vector.shape_cast %461 : vector<4xf32> to vector<4x1xf32>
    %cst_191 = arith.constant 3.200000e+01 : f32
    %463 = vector.broadcast %cst_191 : f32 to vector<4x1xf32>
    %464 = arith.divf %462, %463 : vector<4x1xf32>
    %465 = vector.broadcast %464 : vector<4x1xf32> to vector<4x32xf32>
    %466 = arith.subf %458, %465 : vector<4x32xf32>
    %467 = arith.mulf %466, %466 : vector<4x32xf32>
    %cst_192 = arith.constant dense<0.000000e+00> : vector<4xf32>
    %468 = vector.multi_reduction <add>, %467, %cst_192 [1] : vector<4x32xf32> to vector<4xf32>
    %469 = vector.shape_cast %468 : vector<4xf32> to vector<4x1xf32>
    %cst_193 = arith.constant 3.200000e+01 : f32
    %470 = vector.broadcast %cst_193 : f32 to vector<4x1xf32>
    %471 = arith.divf %469, %470 : vector<4x1xf32>
    %472 = vector.broadcast %464 : vector<4x1xf32> to vector<4x32xf32>
    %473 = arith.subf %458, %472 : vector<4x32xf32>
    %cst_194 = arith.constant 9.99999997E-7 : f32
    %474 = vector.broadcast %cst_194 : f32 to vector<4x1xf32>
    %475 = arith.addf %471, %474 : vector<4x1xf32>
    %476 = math.rsqrt %475 : vector<4x1xf32>
    %477 = vector.broadcast %476 : vector<4x1xf32> to vector<4x32xf32>
    %478 = arith.mulf %473, %477 : vector<4x32xf32>
    %479 = vector.broadcast %459 : vector<1x32xf32> to vector<4x32xf32>
    %480 = arith.mulf %478, %479 : vector<4x32xf32>
    %481 = vector.broadcast %460 : vector<1x32xf32> to vector<4x32xf32>
    %482 = arith.addf %480, %481 : vector<4x32xf32>
    %c1_195 = arith.constant 1 : index
    %c0_196 = arith.constant 0 : index
    %c0_197 = arith.constant 0 : index
    %483 = vector.load %arg24[%c1_195, %c0_196, %c0_197] : memref<2x4x32xf32, #tpu.memory_space<vmem>>, vector<1x4x32xf32>
    %484 = vector.shape_cast %483 : vector<1x4x32xf32> to vector<4x32xf32>
    %485 = vector.shape_cast %482 : vector<4x32xf32> to vector<1x4x32xf32>
    tpu.vector_store %arg24[%c1_195, %c0_196, %c0_197], %485 {strides = array<i32>} : memref<2x4x32xf32, #tpu.memory_space<vmem>>, vector<1x4x32xf32>,
    %c1_198 = arith.constant 1 : index
    %c0_199 = arith.constant 0 : index
    %c0_200 = arith.constant 0 : index
    %486 = vector.load %arg22[%c1_198, %c0_199, %c0_200] : memref<2x4x32xf32, #tpu.memory_space<vmem>>, vector<1x4x32xf32>
    %487 = vector.shape_cast %486 : vector<1x4x32xf32> to vector<4x32xf32>
    %488 = vector.shape_cast %482 : vector<4x32xf32> to vector<1x4x32xf32>
    tpu.vector_store %arg22[%c1_198, %c0_199, %c0_200], %488 {strides = array<i32>} : memref<2x4x32xf32, #tpu.memory_space<vmem>>, vector<1x4x32xf32>,
    return
  }
  func.func @transform_0(%arg0: i32) -> (i32, i32) {
    %c0_i32 = arith.constant 0 : i32
    %c0_i32_0 = arith.constant 0 : i32
    %c0_i32_1 = arith.constant 0 : i32
    return %c0_i32, %c0_i32_0 : i32, i32
  }
  func.func @transform_1(%arg0: i32) -> (i32, i32, i32) {
    %c0_i32 = arith.constant 0 : i32
    %c0_i32_0 = arith.constant 0 : i32
    %c0_i32_1 = arith.constant 0 : i32
    %c0_i32_2 = arith.constant 0 : i32
    return %c0_i32, %c0_i32_0, %c0_i32_1 : i32, i32, i32
  }
  func.func @transform_2(%arg0: i32) -> (i32, i32) {
    %c0_i32 = arith.constant 0 : i32
    %c0_i32_0 = arith.constant 0 : i32
    %c0_i32_1 = arith.constant 0 : i32
    return %c0_i32, %c0_i32_0 : i32, i32
  }
  func.func @transform_3(%arg0: i32) -> (i32, i32) {
    %c0_i32 = arith.constant 0 : i32
    %c0_i32_0 = arith.constant 0 : i32
    %c0_i32_1 = arith.constant 0 : i32
    return %c0_i32, %c0_i32_0 : i32, i32
  }
  func.func @transform_4(%arg0: i32) -> (i32, i32) {
    %c0_i32 = arith.constant 0 : i32
    %c0_i32_0 = arith.constant 0 : i32
    %c0_i32_1 = arith.constant 0 : i32
    return %c0_i32, %c0_i32_0 : i32, i32
  }
  func.func @transform_5(%arg0: i32) -> (i32, i32, i32) {
    %c0_i32 = arith.constant 0 : i32
    %c0_i32_0 = arith.constant 0 : i32
    %c0_i32_1 = arith.constant 0 : i32
    return %arg0, %c0_i32, %c0_i32_0 : i32, i32, i32
  }
  func.func @transform_6(%arg0: i32) -> (i32, i32, i32) {
    %c0_i32 = arith.constant 0 : i32
    %c0_i32_0 = arith.constant 0 : i32
    %c0_i32_1 = arith.constant 0 : i32
    return %arg0, %c0_i32, %c0_i32_0 : i32, i32, i32
  }
  func.func @transform_7(%arg0: i32) -> (i32, i32, i32) {
    %c0_i32 = arith.constant 0 : i32
    %c0_i32_0 = arith.constant 0 : i32
    %c0_i32_1 = arith.constant 0 : i32
    return %arg0, %c0_i32, %c0_i32_0 : i32, i32, i32
  }
  func.func @transform_8(%arg0: i32) -> (i32, i32, i32) {
    %c0_i32 = arith.constant 0 : i32
    %c0_i32_0 = arith.constant 0 : i32
    %c0_i32_1 = arith.constant 0 : i32
    return %arg0, %c0_i32, %c0_i32_0 : i32, i32, i32
  }
  func.func @transform_9(%arg0: i32) -> (i32, i32, i32) {
    %c0_i32 = arith.constant 0 : i32
    %c0_i32_0 = arith.constant 0 : i32
    %c0_i32_1 = arith.constant 0 : i32
    return %arg0, %c0_i32, %c0_i32_0 : i32, i32, i32
  }
  func.func @transform_10(%arg0: i32) -> (i32, i32, i32) {
    %c0_i32 = arith.constant 0 : i32
    %c0_i32_0 = arith.constant 0 : i32
    %c0_i32_1 = arith.constant 0 : i32
    return %arg0, %c0_i32, %c0_i32_0 : i32, i32, i32
  }
  func.func @transform_11(%arg0: i32) -> (i32, i32, i32) {
    %c0_i32 = arith.constant 0 : i32
    %c0_i32_0 = arith.constant 0 : i32
    %c0_i32_1 = arith.constant 0 : i32
    return %arg0, %c0_i32, %c0_i32_0 : i32, i32, i32
  }
  func.func @transform_12(%arg0: i32) -> (i32, i32, i32) {
    %c0_i32 = arith.constant 0 : i32
    %c0_i32_0 = arith.constant 0 : i32
    %c0_i32_1 = arith.constant 0 : i32
    return %arg0, %c0_i32, %c0_i32_0 : i32, i32, i32
  }
  func.func @transform_13(%arg0: i32) -> (i32, i32, i32) {
    %c0_i32 = arith.constant 0 : i32
    %c0_i32_0 = arith.constant 0 : i32
    %c0_i32_1 = arith.constant 0 : i32
    return %arg0, %c0_i32, %c0_i32_0 : i32, i32, i32
  }
  func.func @transform_14(%arg0: i32) -> (i32, i32, i32) {
    %c0_i32 = arith.constant 0 : i32
    %c0_i32_0 = arith.constant 0 : i32
    %c0_i32_1 = arith.constant 0 : i32
    return %arg0, %c0_i32, %c0_i32_0 : i32, i32, i32
  }
  func.func @transform_15(%arg0: i32) -> (i32, i32, i32) {
    %c0_i32 = arith.constant 0 : i32
    %c0_i32_0 = arith.constant 0 : i32
    %c0_i32_1 = arith.constant 0 : i32
    return %arg0, %c0_i32, %c0_i32_0 : i32, i32, i32
  }
  func.func @transform_16(%arg0: i32) -> (i32, i32, i32) {
    %c0_i32 = arith.constant 0 : i32
    %c0_i32_0 = arith.constant 0 : i32
    %c0_i32_1 = arith.constant 0 : i32
    return %arg0, %c0_i32, %c0_i32_0 : i32, i32, i32
  }
  func.func @transform_17(%arg0: i32) -> (i32, i32, i32) {
    %c0_i32 = arith.constant 0 : i32
    %c0_i32_0 = arith.constant 0 : i32
    %c0_i32_1 = arith.constant 0 : i32
    return %arg0, %c0_i32, %c0_i32_0 : i32, i32, i32
  }
  func.func @transform_18(%arg0: i32) -> (i32, i32, i32) {
    %c0_i32 = arith.constant 0 : i32
    %c0_i32_0 = arith.constant 0 : i32
    %c0_i32_1 = arith.constant 0 : i32
    return %arg0, %c0_i32, %c0_i32_0 : i32, i32, i32
  }
  func.func @transform_19(%arg0: i32) -> (i32, i32, i32) {
    %c0_i32 = arith.constant 0 : i32
    %c0_i32_0 = arith.constant 0 : i32
    %c0_i32_1 = arith.constant 0 : i32
    return %arg0, %c0_i32, %c0_i32_0 : i32, i32, i32
  }
  func.func @transform_20(%arg0: i32) -> (i32, i32) {
    %c0_i32 = arith.constant 0 : i32
    %c0_i32_0 = arith.constant 0 : i32
    %c0_i32_1 = arith.constant 0 : i32
    return %c0_i32, %c0_i32_0 : i32, i32
  }
  func.func @transform_21(%arg0: i32) -> (i32, i32, i32) {
    %c0_i32 = arith.constant 0 : i32
    %c0_i32_0 = arith.constant 0 : i32
    %c0_i32_1 = arith.constant 0 : i32
    %c0_i32_2 = arith.constant 0 : i32
    return %c0_i32, %c0_i32_0, %c0_i32_1 : i32, i32, i32
  }
}

</mosaic_0001>

<bundles_post_ra>
// kernel: encoder_forward.1
= control target key start
LH: loop header
LB: loop body
LE: loop exit
PB: predicated region body
PF: predicated region fallthrough
CT: control target
= control target key end

     0   :  { %s9030_s0 = inlined_call_operand.vmem [shape: f32[16,32], index: 0, kind: input, shape index: {}]   ;;  %s9031_s1 = inlined_call_operand.vmem [shape: f32[2,4,32], index: 1, kind: input, shape index: {}]   ;;  %s9032_s2 = inlined_call_operand.vmem [shape: f32[2,8], index: 2, kind: input, shape index: {}]   ;;  %s9033_s3 = inlined_call_operand.vmem [shape: f32[1,32], index: 3, kind: input, shape index: {}]   ;;  %s9034_s4 = inlined_call_operand.vmem [shape: f32[1,32], index: 4, kind: input, shape index: {}]   ;;  %s9035_s5 = inlined_call_operand.vmem [shape: f32[2,32,96], index: 5, kind: input, shape index: {}]   ;;  %s9036_s6 = inlined_call_operand.vmem [shape: f32[2,32,32], index: 6, kind: input, shape index: {}]   ;;  %s9037_s7 = inlined_call_operand.vmem [shape: f32[2,32,64], index: 7, kind: input, shape index: {}]   ;;  %s9038_s8 = inlined_call_operand.vmem [shape: f32[2,1,64], index: 8, kind: input, shape index: {}]   ;;  %s9039_s9 = inlined_call_operand.vmem [shape: f32[2,64,32], index: 9, kind: input, shape index: {}]   ;;  %s9040_s10 = inlined_call_operand.vmem [shape: f32[2,1,32], index: 10, kind: input, shape index: {}]   ;;  %s9041_s11 = inlined_call_operand.vmem [shape: f32[2,32,32], index: 11, kind: input, shape index: {}]   ;;  %s9042_s12 = inlined_call_operand.vmem [shape: f32[2,32,64], index: 12, kind: input, shape index: {}]   ;;  %s9043_s13 = inlined_call_operand.vmem [shape: f32[2,32,32], index: 13, kind: input, shape index: {}]   ;;  %s9044_s14 = inlined_call_operand.vmem [shape: f32[2,32,64], index: 14, kind: input, shape index: {}]   ;;  %s9045_s15 = inlined_call_operand.vmem [shape: f32[2,1,64], index: 15, kind: input, shape index: {}]   ;;  %s9046_s16 = inlined_call_operand.vmem [shape: f32[2,64,32], index: 16, kind: input, shape index: {}]   ;;  %s9047_s17 = inlined_call_operand.vmem [shape: f32[2,1,32], index: 17, kind: input, shape index: {}]   ;;  %s9048_s18 = inlined_call_operand.vmem [shape: f32[2,4,32], index: 18, kind: input, shape index: {}]   ;;  %s9049_s19 = inlined_call_operand.vmem [shape: f32[2,4,32], index: 19, kind: input, shape index: {}]   ;;  %s9050_s20 = inlined_call_operand.hbm [shape: f32[16,32], index: 20, kind: output, shape index: {0}]   ;;  %s9051_s21 = inlined_call_operand.hbm [shape: f32[2,4,32], index: 21, kind: output, shape index: {1}]  }
   0x1   :  { %9057 = sst [smem:[#allocation12_spill]] %s9030_s0 }
   0x2   :  { %9058 = sst [smem:[#allocation13_spill]] %s9031_s1 }
   0x3   :  { %9059 = sst [smem:[#allocation14_spill]] %s9032_s2 }
   0x4   :  { %9060 = sst [smem:[#allocation15_spill]] %s9033_s3 }
   0x5   :  { %9061 = sst [smem:[#allocation16_spill]] %s9034_s4 }
   0x6   :  { %9062 = sst [smem:[#allocation17_spill]] %s9035_s5 }
   0x7   :  { %9063 = sst [smem:[#allocation18_spill]] %s9036_s6 }
   0x8   :  { %9064 = sst [smem:[#allocation19_spill]] %s9037_s7 }
   0x9   :  { %9065 = sst [smem:[#allocation20_spill]] %s9039_s9 }
   0xa   :  { %9066 = sst [smem:[#allocation21_spill]] %s9041_s11 }
   0xb   :  { %9067 = sst [smem:[#allocation22_spill]] %s9042_s12 }
   0xc   :  { %9068 = sst [smem:[#allocation23_spill]] %s9043_s13 }
   0xd   :  { %9069 = sst [smem:[#allocation24_spill]] %s9044_s14 }
   0xe   :  { %9070 = sst [smem:[#allocation25_spill]] %s9045_s15 }
   0xf   :  { %9071 = sst [smem:[#allocation26_spill]] %s9046_s16 }
  0x10   :  { %9072 = sst [smem:[#allocation27_spill]] %s9049_s19 }
  0x11   :  { %9073 = sst [smem:[#allocation28_spill]] %s9050_s20 }
  0x12   :  { %9074 = sst [smem:[#allocation29_spill]] %s9051_s21 }
  0x13   :  { %27 = vsyncpa [#allocation5], 0 }
  0x14   :  { %28 = vsyncpa [#allocation7], 0  ;;  %s7949_s2 = smov 0  }
  0x15 LB: > { %9075 = sst [smem:[#allocation10_spill]] %s7824_s2  ;;  %s7955_s25 = sadd.s32 4294967295, %s7824_s2   ;;  %s7824_s2 = sphi %s7949_s2, %s34_s2  }
  0x16   : > { %9076 = sst [smem:[#allocation11_spill]] %s7955_s25  ;;  %p7604_p0 = scmp.ge.s32.totalorder %s7824_s2, 1 }
  0x17   : > { %p712_p1 = scmp.lt.s32.totalorder %s7824_s2, 3 }
  0x19   : > { %p713_p2 = pnand %p7604_p0, %p712_p1 }
  0x1a   : > { %p827_p3 = scmp.lt.s32.totalorder (!%p713_p2), %s7955_s25, 1  ;;  %s9077_s30 = sld [smem:[#allocation17_spill]] (!%p713_p2) }
  0x1b   : > { %716 = sbr.rel (%p713_p2) target bundleno = 7579 (0x1d9b), region = 100  ;;  %s9078_s6 = sld [smem:[#allocation18_spill]] (!%p713_p2) }
  0x1c   : > { %s9079_s7 = sld [smem:[#allocation19_spill]] (!%p713_p2) }
  0x1d   : > { %s9080_s9 = sld [smem:[#allocation20_spill]] (!%p713_p2) }
  0x1e   : > { %s9081_s11 = sld [smem:[#allocation21_spill]] (!%p713_p2) }
  0x1f   : > { %s9082_s12 = sld [smem:[#allocation22_spill]] (!%p713_p2) }
  0x20   : > { %s7961_s26 = scalar_select %p827_p3, %s7955_s25, 1 }
  0x21   : > { %s9083_s13 = sld [smem:[#allocation23_spill]] }
  0x22   : > { %s7633_s27 = sshll.u32 %s7961_s26, 5  ;;  %s7636_s20 = sshll.u32 %s7961_s26, 6 }
  0x23   : > { %s7971_s5 = scalar_lea.vmem %s9077_s30, %s7633_s27  ;;  %s7976_s1 = scalar_lea.vmem %s9078_s6, %s7633_s27 }
  0x24   : > { %s7981_s21 = scalar_lea.vmem %s9079_s7, %s7633_s27  ;;  %s7987_s3 = scalar_lea.vmem %s9080_s9, %s7636_s20 }
  0x25   : > { %s7996_s22 = scalar_lea.vmem %s9081_s11, %s7633_s27  ;;  %s8001_s2 = scalar_lea.vmem %s9082_s12, %s7633_s27 }
  0x26   : > { %s9084_s14 = sld [smem:[#allocation24_spill]]  ;;  %s8028_s7 = scalar_lea.vmem %s9047_s17, %s7961_s26 }
  0x27   : > { %s8006_s19 = scalar_lea.vmem %s9083_s13, %s7633_s27  ;;  %s9085_s15 = sld [smem:[#allocation25_spill]] }
  0x28   : > { %s9086_s16 = sld [smem:[#allocation26_spill]]  ;;  %s7623_s24 = sshll.u32 %s7961_s26, 2 }
  0x29   : > { %s9087_s0 = sld [smem:[#allocation27_spill]] }
  0x2c   : > { %s8011_s28 = scalar_lea.vmem %s9084_s14, %s7633_s27  ;;  %s8034_s27 = scalar_lea.vmem %s9048_s18, %s7623_s24 }
  0x2d   : > { %s8017_s29 = scalar_lea.vmem %s9085_s15, %s7961_s26  ;;  %s9088_s15 = sld [smem:[#allocation11_spill]] }
  0x2e   : > { %s8022_s6 = scalar_lea.vmem %s9086_s16, %s7636_s20 }
  0x2f   : > { %s8039_s14 = scalar_lea.vmem %s9087_s0, %s7623_s24 }
  0x33   : > { %p7625_p4 = scmp.ne.s32.totalorder %s9088_s15, 0 }
  0x34   : > { %s9089_s30 = sld [smem:[#allocation13_spill]] (!%p7625_p4) }
  0x35   : > { %895 = sbr.rel (%p7625_p4) target bundleno = 337 (0x151), region = 104  ;;  %s9090_s16 = sld [smem:[#allocation12_spill]] (!%p7625_p4) }
  0x36   : > { %s9091_s0 = sld [smem:[#allocation15_spill]] (!%p7625_p4) }
  0x37   : > { %s9092_s12 = sld [smem:[#allocation16_spill]] (!%p7625_p4) }
  0x3a   : > { %v964_v0 = vld [vmem:[%s9089_s30] sm:$0xf]  ;;  %vm965_vm0 = vcmask 257024   ;;  %vm900_vm1 = vcmask 261120   ;;  %v7626_v4 = vld [vmem:[%s9089_s30 + $0x4] sm:$0xf] }
  0x3b   : > { %v898_v1 = vld [vmem:[%s9090_s16] sm:$0xff]  ;;  %v966_v2 = vsel %vm965_vm0, %v964_v0, 0.0  ;;  %v899_v5 = vld [vmem:[%s9090_s16 + $0x8] sm:$0xff]  ;;  %v993_v6 = vsel %vm965_vm0, %v7626_v4, 0.0  ;;  %v7826_v8 = vmov 32.0  }
  0x3c   : > { %v901_v3 = vsel %vm900_vm1, %v898_v1, 0.0  ;;  %967 = vadd.xlane.f32.xlu1 %v966_v2  ;;  %v904_v7 = vsel %vm900_vm1, %v899_v5, 0.0  ;;  %7685 = vrcp.f32 %v7826_v8  ;;  %v7683_v61 = vld [vmem:[%s9091_s0] ss:$0 sm:$0xff] }
  0x3d   : > { %902 = vadd.xlane.f32.xlu0 %v901_v3  ;;  %v7684_v3 = vld [vmem:[%s9092_s12] ss:$0 sm:$0xff] }
  0x42   : > { %v7686_v9 = vpop.eup %7685 }
  0x43   : > { %v908_v10 = vmul.f32 32.0, %v7686_v9  ;;  %vm912_vm2 = vweird.f32 %v7686_v9 }
  0x44   : > { %994 = vadd.xlane.f32.xlu1 %v993_v6 }
  0x45   : > { %905 = vadd.xlane.f32.xlu0 %v904_v7  ;;  %v909_v11 = vsub.f32 1.0, %v908_v10 }
  0x47   : > { %v910_v12 = vmul.f32 %v7686_v9, %v909_v11 }
  0x49   : > { %v911_v13 = vadd.f32 %v7686_v9, %v910_v12 }
  0x4b   : > { %v913_v14 = vsel %vm912_vm2, %v7686_v9, %v911_v13 }
  0xaf   : > { %v968_v15 = vpop.xlane.xlu1 %967 }
  0xb0   : > { %v903_v16 = vpop.xlane.xlu0 %902  ;;  %v969_v17 = vmul.f32 %v968_v15, %v913_v14 }
  0xb1   : > { %v914_v18 = vmul.f32 %v913_v14, %v903_v16 }
  0xb2   : > { %v8058_v19 = vsub.f32 %v964_v0, %v969_v17 }
  0xb3   : > { %v916_v20 = vsub.f32 %v898_v1, %v914_v18 }
  0xb4   : > { %v971_v21 = vmul.f32 %v8058_v19, %v8058_v19 }
  0xb5   : > { %v918_v22 = vmul.f32 %v916_v20, %v916_v20 }
  0xb6   : > { %v972_v23 = vsel %vm965_vm0, %v971_v21, 0.0 }
  0xb7   : > { %v920_v24 = vsel %vm900_vm1, %v918_v22, 0.0  ;;  %v995_v25 = vpop.xlane.xlu1 %994  ;;  %973 = vadd.xlane.f32.xlu0 %v972_v23 }
  0xb8   : > { %921 = vadd.xlane.f32.xlu2 %v920_v24  ;;  %v906_v26 = vpop.xlane.xlu0 %905  ;;  %v996_v27 = vmul.f32 %v995_v25, %v913_v14 }
  0xb9   : > { %v915_v28 = vmul.f32 %v913_v14, %v906_v26 }
  0xba   : > { %v8064_v29 = vsub.f32 %v7626_v4, %v996_v27 }
  0xbb   : > { %v8066_v30 = vsub.f32 %v899_v5, %v915_v28 }
  0xbc   : > { %v998_v31 = vmul.f32 %v8064_v29, %v8064_v29 }
  0xbd   : > { %v919_v32 = vmul.f32 %v8066_v30, %v8066_v30 }
  0xbe   : > { %v999_v33 = vsel %vm965_vm0, %v998_v31, 0.0 }
  0xbf   : > { %v923_v34 = vsel %vm900_vm1, %v919_v32, 0.0  ;;  %1000 = vadd.xlane.f32.xlu1 %v999_v33 }
  0xc0   : > { %924 = vadd.xlane.f32.xlu2 %v923_v34 }
 0x12a   : > { %v974_v36 = vpop.xlane.xlu0 %973 }
 0x12b   : > { %v922_v35 = vpop.xlane.xlu2 %921  ;;  %v975_v38 = vmul.f32 %v974_v36, %v913_v14 }
 0x12c   : > { %v926_v37 = vmul.f32 %v922_v35, %v913_v14 }
 0x12d   : > { %v976_v40 = vadd.f32 1e-06, %v975_v38 }
 0x12e   : > { %v928_v39 = vadd.f32 1e-06, %v926_v37 }
 0x12f   : > { %vm983_vm7 = vweird.f32 %v976_v40 }
 0x130   : > { %7687 = vrsqrt.f32 %v928_v39  ;;  %vm936_vm5 = vweird.f32 %v928_v39 }
 0x131   : > { %7689 = vrsqrt.f32 %v976_v40 }
 0x132   : > { %v1001_v41 = vpop.xlane.xlu1 %1000 }
 0x133   : > { %v925_v42 = vpop.xlane.xlu2 %924  ;;  %v1002_v43 = vmul.f32 %v1001_v41, %v913_v14 }
 0x134   : > { %v927_v44 = vmul.f32 %v925_v42, %v913_v14 }
 0x135   : > { %v1003_v46 = vadd.f32 1e-06, %v1002_v43 }
 0x136   : > { %v7688_v45 = vpop.eup %7687  ;;  %v929_v47 = vadd.f32 1e-06, %v927_v44 }
 0x137   : > { %v7690_v48 = vpop.eup %7689  ;;  %v931_v49 = vmul.f32 %v7688_v45, %v928_v39  ;;  %7691 = vrsqrt.f32 %v1003_v46  ;;  %vm937_vm3 = vweird.f32 %v7688_v45  ;;  %vm1010_vm11 = vweird.f32 %v1003_v46 }
 0x138   : > { %v978_v50 = vmul.f32 %v7690_v48, %v976_v40  ;;  %7693 = vrsqrt.f32 %v929_v47  ;;  %vm984_vm4 = vweird.f32 %v7690_v48  ;;  %vm938_vm6 = vmor %vm936_vm5, %vm937_vm3  ;;  %vm946_vm13 = vweird.f32 %v929_v47 }
 0x139   : > { %v932_v51 = vmul.f32 %v7688_v45, %v931_v49  ;;  %vm985_vm8 = vmor %vm983_vm7, %vm984_vm4 }
 0x13a   : > { %v979_v52 = vmul.f32 %v7690_v48, %v978_v50 }
 0x13b   : > { %v933_v53 = vmul.f32 0.5, %v932_v51 }
 0x13c   : > { %v980_v54 = vmul.f32 0.5, %v979_v52 }
 0x13d   : > { %v934_v55 = vsub.f32 1.5, %v933_v53  ;;  %v7692_v56 = vpop.eup %7691 }
 0x13e   : > { %v981_v57 = vsub.f32 1.5, %v980_v54  ;;  %v7694_v58 = vpop.eup %7693  ;;  %v1005_v60 = vmul.f32 %v7692_v56, %v1003_v46  ;;  %vm1011_vm9 = vweird.f32 %v7692_v56 }
 0x13f   : > { %v935_v59 = vmul.f32 %v7688_v45, %v934_v55  ;;  %v941_v63 = vmul.f32 %v7694_v58, %v929_v47  ;;  %vm947_vm10 = vweird.f32 %v7694_v58  ;;  %vm1012_vm12 = vmor %vm1010_vm11, %vm1011_vm9 }
 0x140   : > { %v982_v62 = vmul.f32 %v7690_v48, %v981_v57  ;;  %v1006_v1 = vmul.f32 %v7692_v56, %v1005_v60  ;;  %vm948_vm14 = vmor %vm946_vm13, %vm947_vm10 }
 0x141   : > { %v939_v0 = vsel %vm938_vm6, %v7688_v45, %v935_v59  ;;  %v942_v5 = vmul.f32 %v7694_v58, %v941_v63 }
 0x142   : > { %v950_v2 = vmul.f32 %v939_v0, %v916_v20  ;;  %v986_v4 = vsel %vm985_vm8, %v7690_v48, %v982_v62  ;;  %v1007_v7 = vmul.f32 0.5, %v1006_v1 }
 0x143   : > { %v987_v6 = vmul.f32 %v986_v4, %v8058_v19  ;;  %v943_v9 = vmul.f32 0.5, %v942_v5 }
 0x144   : > { %v955_v8 = vmul.f32 %v7683_v61, %v950_v2  ;;  %v1008_v11 = vsub.f32 1.5, %v1007_v7 }
 0x145   : > { %v988_v10 = vmul.f32 %v7683_v61, %v987_v6  ;;  %v944_v13 = vsub.f32 1.5, %v943_v9 }
 0x146   : > { %v960_v12 = vadd.f32 %v7684_v3, %v955_v8  ;;  %v1009_v15 = vmul.f32 %v7692_v56, %v1008_v11 }
 0x147   : > { %v989_v14 = vadd.f32 %v7684_v3, %v988_v10  ;;  %v945_v16 = vmul.f32 %v7694_v58, %v944_v13 }
 0x148   : > { %962 = vst.msk [vmem:[#allocation2] sm:$0xff] %vm900_vm1, %v960_v12  ;;  %v1013_v17 = vsel %vm1012_vm12, %v7692_v56, %v1009_v15 }
 0x149   : > { %990 = vst.msk [vmem:[#allocation3] sm:$0xf] %vm965_vm0, %v989_v14  ;;  %v1014_v18 = vmul.f32 %v1013_v17, %v8064_v29  ;;  %v949_v19 = vsel %vm948_vm14, %v7694_v58, %v945_v16 }
 0x14a   : > { %v951_v20 = vmul.f32 %v949_v19, %v8066_v30 }
 0x14b   : > { %v1015_v21 = vmul.f32 %v7683_v61, %v1014_v18 }
 0x14c   : > { %v956_v22 = vmul.f32 %v7683_v61, %v951_v20 }
 0x14d   : > { %v1016_v23 = vadd.f32 %v7684_v3, %v1015_v21 }
 0x14e   : > { %v961_v24 = vadd.f32 %v7684_v3, %v956_v22 }
 0x14f   : > { %1018 = vst.msk [vmem:[#allocation3 + $0x4] sm:$0xf] %vm965_vm0, %v1016_v23 }
 0x150   : > { %963 = vst.msk [vmem:[#allocation2 + $0x8] sm:$0xff] %vm900_vm1, %v961_v24 }
 0x151 PF: > { %v1027_v25 = vld [vmem:[%s7971_s5 + $0x18] sm:$0xff]  ;;  %v1026_v26 = vld [vmem:[%s7971_s5 + $0x10] sm:$0xff]  ;;  %v1025_v27 = vld [vmem:[%s7971_s5 + $0x8] sm:$0xff]  ;;  %vm1028_vm15 = vcmask 261120   ;;  %s7828_s23 = smov 96   ;;  %s7829_s13 = smov 112  }
 0x152   : > { %v1047_v28 = vand.u32 4294901760, %v1027_v25  ;;  %v8090_v29 = vand.u32 4294901760, %v1026_v26  ;;  %v8092_v30 = vand.u32 4294901760, %v1025_v27  ;;  %v1024_v31 = vld [vmem:[%s7971_s5] sm:$0xff]  ;;  %s7827_s5 = smov 80   ;;  %vm1258_vm0 = vcmask 130048   ;;  %s9099_s20 = scalar_lea.vmem %s9040_s10, %s7961_s26 }
 0x153   : > { %v8095_v33 = vld [vmem:[#allocation2] sm:$0xff]  ;;  %v8097_v34 = vand.u32 4294901760, %v1024_v31  ;;  %s9093_s9 = sld [smem:[#allocation14_spill]]  ;;  %vm1415_vm3 = vcmask 64512   ;;  %s7831_s25 = smov 48   ;;  %vm3492_vm12 = vcmask 523264  }
 0x154   : > { %v1030_v36 = vsel %vm1028_vm15, %v8095_v33, 0  ;;  %7642 = vmatpush.msra.mxu2 %v1047_v28  ;;  %v1085_v37 = vsub.f32 %v1027_v25, %v1047_v28  ;;  %v1091_v39 = vsub.f32 %v1026_v26, %v8090_v29  ;;  %v1097_v40 = vsub.f32 %v1025_v27, %v8092_v30  ;;  %1048 = vmatpush.msra.mxu0 %v1047_v28  ;;  %s7832_s4 = smov 64   ;;  %s7838_s15 = smov 4  }
 0x155   : > { %v1103_v41 = vsub.f32 %v1024_v31, %v8097_v34  ;;  %v1055_v42 = vand.u32 4294901760, %v1030_v36 }
 0x156   : > { %7643 = vmatpush.msra.mxu2 %v8090_v29  ;;  %v1086_v43 = vand.u32 4294901760, %v1085_v37  ;;  %v1092_v45 = vand.u32 4294901760, %v1091_v39  ;;  %v1098_v46 = vand.u32 4294901760, %v1097_v40  ;;  %1050 = vmatpush.msra.mxu0 %v8090_v29 }
 0x157   : > { %v1023_v32 = vld [vmem:[#allocation2 + $0x8] sm:$0xff]  ;;  %v1104_v47 = vand.u32 4294901760, %v1103_v41  ;;  %v1056_v48 = vsub.f32 %v1030_v36, %v1055_v42  ;;  %v7830_v36 = vmov 0  }
 0x158   : > { %v1033_v35 = vsel %vm1028_vm15, %v1023_v32, 0  ;;  %7644 = vmatpush.msra.mxu2 %v8092_v30  ;;  %v1087_v49 = vsub.f32 %v1085_v37, %v1086_v43  ;;  %v1093_v51 = vsub.f32 %v1091_v39, %v1092_v45  ;;  %v1099_v52 = vsub.f32 %v1097_v40, %v1098_v46  ;;  %1052 = vmatpush.msra.mxu0 %v8092_v30 }
 0x159   : > { %v8102_v38 = vand.u32 4294901760, %v1033_v35  ;;  %v1057_v53 = vand.u32 4294901760, %v1056_v48  ;;  %v1105_v57 = vsub.f32 %v1103_v41, %v1104_v47 }
 0x15a   : > { %7645 = vmatpush.msra.mxu2 %v8097_v34  ;;  %v1088_v54 = vand.u32 4294901760, %v1087_v49  ;;  %v1094_v56 = vand.u32 4294901760, %v1093_v51  ;;  %1054 = vmatpush.msra.mxu0 %v8097_v34  ;;  %v1100_v60 = vand.u32 4294901760, %v1099_v52 }
 0x15b   : > { %v1064_v44 = vsub.f32 %v1033_v35, %v8102_v38  ;;  %v1058_v58 = vsub.f32 %v1056_v48, %v1057_v53  ;;  %v1106_v62 = vand.u32 4294901760, %v1105_v57 }
 0x15c   : > { %1131 = vmatpush.msrb.mxu2 %v1085_v37  ;;  %1200 = vmatpush.msrb.mxu0 %v1086_v43 }
 0x15d   : > { %v1065_v50 = vand.u32 4294901760, %v1064_v44  ;;  %7646 = vmatpush.msra.mxu3 %v1088_v54  ;;  %1089 = vmatpush.msra.mxu1 %v1088_v54  ;;  %v1059_v61 = vand.u32 4294901760, %v1058_v58 }
 0x15e   : > { %1134 = vmatpush.msrb.mxu2 %v1091_v39  ;;  %1204 = vmatpush.msrb.mxu0 %v1092_v45 }
 0x15f   : > { %v1066_v55 = vsub.f32 %v1064_v44, %v1065_v50  ;;  %7647 = vmatpush.msra.mxu3 %v1094_v56  ;;  %1095 = vmatpush.msra.mxu1 %v1094_v56 }
 0x160   : > { %1137 = vmatpush.msrb.mxu2 %v1097_v40  ;;  %1060 = vmatmul.f32.vlgmr.msra.gmra.mxu0 %v1059_v61 }
 0x161   : > { %v1067_v59 = vand.u32 4294901760, %v1066_v55  ;;  %7648 = vmatpush.msra.mxu3 %v1100_v60  ;;  %1101 = vmatpush.msra.mxu1 %v1100_v60 }
 0x162   : > { %1140 = vmatpush.msrb.mxu2 %v1103_v41  ;;  %1208 = vmatpush.msrb.mxu0 %v1098_v46 }
 0x163   : > { %1068 = vmatmul.f32.vlgmr.msra.gmra.mxu2 %v1067_v59  ;;  %7649 = vmatpush.msra.mxu3 %v1106_v62 }
 0x164   : > { %1113 = vmatmul.f32.vlgmr.msra.gmra.mxu3 %v8102_v38  ;;  %1107 = vmatpush.msra.mxu1 %v1106_v62 }
 0x165   : > { %1165 = vmatpush.msrb.mxu3 %v1047_v28  ;;  %1109 = vmatmul.f32.vlgmr.msra.gmra.mxu1 %v1055_v42 }
 0x166   : > { %1235 = vmatpush.msrb.mxu1 %v1047_v28  ;;  %1212 = vmatpush.msrb.mxu0 %v1104_v47 }
 0x167   : > { %1167 = vmatpush.msrb.mxu3 %v8090_v29 }
 0x168   : > { %1237 = vmatpush.msrb.mxu1 %v8090_v29  ;;  %1214 = vmatmul.f32.vlgmr.msrb.gmra.mxu0 %v1055_v42  ;;  %v1019_v29 = vld [vmem:[%s9093_s9] sm:$0x3] }
 0x169   : > { %1169 = vmatpush.msrb.mxu3 %v8092_v30  ;;  %vm1410_vm1 = vcmp.gt.f32.partialorder %v1019_v29, 0.0 }
 0x16a   : > { %1239 = vmatpush.msrb.mxu1 %v8092_v30  ;;  %v8149_v37 = vsel %vm1410_vm1, 1, %v7830_v36 }
 0x16b   : > { %1143 = vmatmul.f32.vlgmr.msrb.gmra.mxu2 %v1056_v48  ;;  %1171 = vmatpush.msrb.mxu3 %v8097_v34  ;;  %v1412_v41 = vperm.slane %v8149_v37, 0 }
 0x16c   : > { %1175 = vmatmul.f32.vlgmr.msrb.gmra.mxu3 %v1057_v53  ;;  %1241 = vmatpush.msrb.mxu1 %v8097_v34 }
 0x16d   : > { %1243 = vmatmul.f32.vlgmr.msrb.gmra.mxu1 %v1055_v42  ;;  %vm8152_vm2 = vcmp.eq.s32.totalorder %v1412_v41, 1 }
 0x170   : > { %1218 = vmatmul.f32.gmra.mxu0 %v8102_v38 }
 0x173   : > { %1148 = vmatmul.f32.gmra.mxu2 %v1064_v44 }
 0x174   : > { %1181 = vmatmul.f32.gmra.mxu3 %v1065_v50 }
 0x175   : > { %1247 = vmatmul.f32.gmra.mxu1 %v8102_v38 }
 0x1dd   : > { %v1061_v0 = vpop.f32.mrf.mxu0 }
 0x1e2   : > { %v1110_v2 = vpop.f32.mrf.mxu1 }
 0x1e3   : > { %v1111_v3 = vadd.f32 %v1110_v2, %v1061_v0 }
 0x1e5   : > { %v1215_v7 = vpop.f32.mrf.mxu0 }
 0x1e6   : > { %v8123_v63 = vpop.f32.mrf.mxu2 }
 0x1e7   : > { %v8125_v1 = vpop.f32.mrf.mxu3 }
 0x1ea   : > { %v1244_v9 = vpop.f32.mrf.mxu1 }
 0x1ed   : > { %v8145_v30 = vpop.f32.mrf.mxu0 }
 0x1ee   : > { %v1144_v4 = vpop.f32.mrf.mxu2 }
 0x1ef   : > { %v1145_v5 = vadd.f32 %v1144_v4, %v1111_v3  ;;  %v1176_v6 = vpop.f32.mrf.mxu3 }
 0x1f1   : > { %v1177_v8 = vadd.f32 %v1176_v6, %v1145_v5 }
 0x1f2   : > { %v8147_v32 = vpop.f32.mrf.mxu1 }
 0x1f3   : > { %v1216_v10 = vadd.f32 %v1215_v7, %v1177_v8 }
 0x1f5   : > { %v8127_v11 = vadd.f32 %v1244_v9, %v1216_v10 }
 0x1f6   : > { %v8138_v25 = vpop.f32.mrf.mxu2 }
 0x1f7   : > { %1581 = vrot.lane.b32.xlu2 %v8127_v11, %s7827_s5  ;;  %1256 = vrot.lane.b32.xlu0 %v8127_v11, %s7828_s23  ;;  %v1259_v12 = vsel %vm1258_vm0, %v8127_v11, 0  ;;  %v8140_v26 = vpop.f32.mrf.mxu3 }
 0x1f8   : > { %v1280_v13 = vand.u32 4294901760, %v1259_v12 }
 0x1fa   : > { %v1281_v14 = vsub.f32 %v1259_v12, %v1280_v13 }
 0x1fc   : > { %v1282_v15 = vand.u32 4294901760, %v1281_v14 }
 0x1fe   : > { %v1283_v18 = vsub.f32 %v1281_v14, %v1282_v15 }
 0x1ff   : > { %1579 = vrot.lane.b32.xlu2 %v8127_v11, %s7829_s13 }
 0x200   : > { %v1284_v21 = vand.u32 4294901760, %v1283_v18 }
 0x251   : > { %v1582_v55 = vpop.permute.xlu2 %1581 }
 0x252   : > { %v1585_v57 = vsel %vm1258_vm0, %v1582_v55, 0 }
 0x253   : > { %v1602_v60 = vand.u32 4294901760, %v1585_v57 }
 0x255   : > { %v1629_v0 = vsub.f32 %v1585_v57, %v1602_v60 }
 0x257   : > { %v1630_v5 = vand.u32 4294901760, %v1629_v0 }
 0x259   : > { %v1580_v2 = vpop.permute.xlu2 %1579  ;;  %v1631_v8 = vsub.f32 %v1629_v0, %v1630_v5 }
 0x25a   : > { %v1583_v3 = vsel %vm1258_vm0, %v1580_v2, 0 }
 0x25b   : > { %v1604_v6 = vand.u32 4294901760, %v1583_v3 }
 0x269   : > { %v1257_v16 = vpop.permute.xlu0 %1256 }
 0x26a   : > { %v1261_v17 = vsel %vm1258_vm0, %v1257_v16, 0 }
 0x26b   : > { %v1278_v19 = vand.u32 4294901760, %v1261_v17 }
 0x26d   : > { %v1305_v20 = vsub.f32 %v1261_v17, %v1278_v19  ;;  %1279 = vmatpush.xpose.msra.mxu2 %v1278_v19  ;;  %1403 = vmatpush.xpose.msra.mxu1 %v1278_v19 }
 0x26f   : > { %v1306_v22 = vand.u32 4294901760, %v1305_v20 }
 0x270   : > { %1285 = vmatmul.f32.vlgmr.msra.gmra.mxu2 %v1284_v21  ;;  %1405 = vmatmul.f32.vlgmr.msra.gmra.mxu1 %v1280_v13 }
 0x271   : > { %1332 = vmatpush.xpose.msrb.mxu2 %v1305_v20  ;;  %v1307_v23 = vsub.f32 %v1305_v20, %v1306_v22  ;;  %1381 = vmatpush.xpose.msra.mxu0 %v1306_v22 }
 0x273   : > { %v1308_v24 = vand.u32 4294901760, %v1307_v23 }
 0x274   : > { %1383 = vmatmul.f32.vlgmr.msra.gmra.mxu0 %v1280_v13 }
 0x275   : > { %1309 = vmatpush.xpose.msra.mxu3 %v1308_v24 }
 0x278   : > { %1311 = vmatmul.f32.vlgmr.msra.gmra.mxu3 %v1280_v13  ;;  %1335 = vmatmul.f32.vlgmr.msrb.gmra.mxu2 %v1281_v14  ;;  %v1632_v14 = vand.u32 4294901760, %v1631_v8 }
 0x279   : > { %1355 = vmatpush.xpose.msrb.mxu3 %v1278_v19 }
 0x280   : > { %1359 = vmatmul.f32.vlgmr.msrb.gmra.mxu3 %v1282_v15 }
 0x2ed   : > { %v1406_v43 = vpop.f32.mrf.mxu1 }
 0x2f1   : > { %v1384_v40 = vpop.f32.mrf.mxu0 }
 0x2f3   : > { %v1286_v27 = vpop.f32.mrf.mxu2 }
 0x2fb   : > { %v1312_v28 = vpop.f32.mrf.mxu3  ;;  %v1336_v34 = vpop.f32.mrf.mxu2 }
 0x2fc   : > { %v1313_v31 = vadd.f32 %v1312_v28, %v1286_v27 }
 0x2fe   : > { %v1337_v35 = vadd.f32 %v1336_v34, %v1313_v31 }
 0x303   : > { %v1360_v38 = vpop.f32.mrf.mxu3 }
 0x304   : > { %v1361_v39 = vadd.f32 %v1360_v38, %v1337_v35 }
 0x306   : > { %v1385_v42 = vadd.f32 %v1384_v40, %v1361_v39 }
 0x308   : > { %v1407_v44 = vadd.f32 %v1406_v43, %v1385_v42 }
 0x30a   : > { %v1409_v46 = vmul.f32 0.25, %v1407_v44 }
 0x30c   : > { %v1414_v47 = vsel %vm8152_vm2, %v1409_v46, -1e+09 }
 0x30d   : > { %v1416_v48 = vsel %vm1415_vm3, %v1414_v47, -inf }
 0x30e   : > { %1417 = vmax.xlane.f32.xlu0 %v1416_v48 }
 0x322   : > { %1746 = vrot.lane.b32.xlu0 %v8127_v11, %s7831_s25 }
 0x381   : > { %v1418_v49 = vpop.xlane.xlu0 %1417 }
 0x382   : > { %v1419_v50 = vsub.f32 %v1414_v47, %v1418_v49 }
 0x384   : > { %v1420_v51 = vmul.f32 1.442695, %v1419_v50 }
 0x386   : > { %7701 = vpow2.f32 %v1420_v51 }
 0x38c   : > { %v7702_v52 = vpop.eup %7701 }
 0x38d   : > { %v1422_v53 = vsel %vm1415_vm3, %v7702_v52, 0.0 }
 0x38e   : > { %1423 = vadd.xlane.f32.xlu1 %v1422_v53 }
 0x394   : > { %v1747_v9 = vpop.permute.xlu0 %1746 }
 0x395   : > { %v1767_v15 = vand.u32 4294901760, %v1747_v9 }
 0x397   : > { %v1794_v19 = vsub.f32 %v1747_v9, %v1767_v15 }
 0x399   : > { %v1795_v23 = vand.u32 4294901760, %v1794_v19 }
 0x39b   : > { %v1796_v27 = vsub.f32 %v1794_v19, %v1795_v23 }
 0x39d   : > { %v1797_v28 = vand.u32 4294901760, %v1796_v27 }
 0x3a7   : > { %1427 = vrot.lane.b32.xlu1 %v8127_v11, %s7832_s4  ;;  %v1605_v11 = vsub.f32 %v1583_v3, %v1604_v6 }
 0x3a9   : > { %v1606_v17 = vand.u32 4294901760, %v1605_v11 }
 0x3ab   : > { %v1607_v21 = vsub.f32 %v1605_v11, %v1606_v17 }
 0x3ad   : > { %v1608_v24 = vand.u32 4294901760, %v1607_v21 }
 0x401   : > { %v1424_v54 = vpop.xlane.xlu1 %1423 }
 0x402   : > { %7703 = vrcp.f32 %v1424_v54  ;;  %v1115_v54 = vadd.f32 %v8125_v1, %v8123_v63 }
 0x404   : > { %v1150_v55 = vadd.f32 %v8138_v25, %v1115_v54 }
 0x408   : > { %v7704_v56 = vpop.eup %7703 }
 0x409   : > { %v1426_v58 = vmul.f32 %v7704_v56, %v7702_v52  ;;  %v1183_v56 = vadd.f32 %v8140_v26, %v1150_v55 }
 0x40b   : > { %v1431_v59 = vsel %vm1415_vm3, %v1426_v58, 0  ;;  %v1220_v57 = vadd.f32 %v8145_v30, %v1183_v56 }
 0x40c   : > { %v1450_v61 = vand.u32 4294901760, %v1431_v59 }
 0x40d   : > { %v8188_v58 = vadd.f32 %v8147_v32, %v1220_v57 }
 0x40e   : > { %v1451_v62 = vsub.f32 %v1431_v59, %v1450_v61 }
 0x410   : > { %v1452_v4 = vand.u32 4294901760, %v1451_v62 }
 0x412   : > { %v1453_v7 = vsub.f32 %v1451_v62, %v1452_v4 }
 0x414   : > { %v1454_v13 = vand.u32 4294901760, %v1453_v7  ;;  %v1253_v7 = vld [vmem:[%s7976_s1 + $0x10] sm:$0xff] }
 0x415   : > { %v8205_v9 = vand.u32 4294901760, %v1253_v7 }
 0x419   : > { %v1428_v10 = vpop.permute.xlu1 %1427 }
 0x41a   : > { %v1448_v12 = vand.u32 4294901760, %v1428_v10 }
 0x41c   : > { %v1475_v16 = vsub.f32 %v1428_v10, %v1448_v12  ;;  %1449 = vmatpush.msra.mxu2 %v1448_v12  ;;  %1525 = vmatpush.msrb.mxu1 %v1448_v12 }
 0x41d   : > { %1455 = vmatmul.f32.vlgmr.msra.gmra.mxu2 %v1454_v13  ;;  %1529 = vmatmul.f32.vlgmr.msrb.gmra.mxu1 %v1452_v4 }
 0x41e   : > { %v1476_v18 = vand.u32 4294901760, %v1475_v16  ;;  %1633 = vmatpush.xpose.msra.mxu1 %v1632_v14  ;;  %1502 = vmatpush.msrb.mxu0 %v1475_v16 }
 0x41f   : > { %1505 = vmatmul.f32.vlgmr.msrb.gmra.mxu0 %v1451_v62 }
 0x420   : > { %v1477_v20 = vsub.f32 %v1475_v16, %v1476_v18  ;;  %1603 = vmatpush.xpose.msra.mxu0 %v1602_v60  ;;  %1551 = vmatpush.msrb.mxu2 %v1476_v18  ;;  %v1252_v16 = vld [vmem:[%s7976_s1 + $0x8] sm:$0xff] }
 0x422   : > { %1727 = vmatpush.xpose.msrb.mxu1 %v1602_v60  ;;  %1656 = vmatpush.xpose.msra.mxu2 %v1629_v0  ;;  %v1478_v22 = vand.u32 4294901760, %v1477_v20 }
 0x424   : > { %1705 = vmatpush.xpose.msrb.mxu0 %v1630_v5  ;;  %1479 = vmatpush.msra.mxu3 %v1478_v22  ;;  %v1254_v5 = vld [vmem:[%s7976_s1 + $0x18] sm:$0xff] }
 0x425   : > { %1481 = vmatmul.f32.vlgmr.msra.gmra.mxu3 %v1450_v61  ;;  %1553 = vmatmul.f32.vlgmr.msrb.gmra.mxu2 %v1450_v61 }
 0x426   : > { %1573 = vmatpush.msrb.mxu3 %v1448_v12  ;;  %1635 = vmatmul.f32.vlgmr.msra.gmra.mxu1 %v1604_v6 }
 0x427   : > { %1768 = vmatpush.msrb.mxu2 %v1767_v15  ;;  %1844 = vmatpush.msra.mxu1 %v1767_v15 }
 0x428   : > { %1679 = vmatpush.xpose.msra.mxu3 %v1602_v60  ;;  %1609 = vmatmul.f32.vlgmr.msra.gmra.mxu0 %v1608_v24 }
 0x429   : > { %1821 = vmatpush.msra.mxu0 %v1794_v19  ;;  %v1251_v19 = vld [vmem:[%s7976_s1] sm:$0xff] }
 0x42a   : > { %v8238_v20 = vand.u32 4294901760, %v1251_v19 }
 0x42c   : > { %v8252_v24 = vsub.f32 %v1251_v19, %v8238_v20 }
 0x42d   : > { %1575 = vmatmul.f32.vlgmr.msrb.gmra.mxu3 %v1450_v61  ;;  %1659 = vmatmul.f32.vlgmr.msra.gmra.mxu2 %v1605_v11  ;;  %v8213_v11 = vsub.f32 %v1253_v7, %v8205_v9 }
 0x42e   : > { %1729 = vmatmul.f32.vlgmr.msrb.gmra.mxu1 %v1604_v6  ;;  %1798 = vmatpush.msrb.mxu3 %v1797_v28  ;;  %v8258_v28 = vand.u32 4294901760, %v8252_v24 }
 0x42f   : > { %1870 = vmatpush.msra.mxu2 %v1795_v23  ;;  %v8221_v13 = vand.u32 4294901760, %v8213_v11 }
 0x430   : > { %1707 = vmatmul.f32.vlgmr.msrb.gmra.mxu0 %v1604_v6  ;;  %v8199_v6 = vand.u32 4294901760, %v1254_v5 }
 0x432   : > { %v8203_v8 = vsub.f32 %v1254_v5, %v8199_v6  ;;  %1916 = vmatpush.msrb.mxu0 %v8199_v6 }
 0x434   : > { %v8210_v10 = vand.u32 4294901760, %v8203_v8  ;;  %1918 = vmatpush.msrb.mxu0 %v8205_v9 }
 0x435   : > { %1683 = vmatmul.f32.vlgmr.msra.gmra.mxu3 %v1606_v17  ;;  %v8231_v17 = vand.u32 4294901760, %v1252_v16 }
 0x436   : > { %1892 = vmatpush.msra.mxu3 %v1767_v15  ;;  %v1945_v12 = vsub.f32 %v8203_v8, %v8210_v10  ;;  %v1951_v15 = vsub.f32 %v8213_v11, %v8221_v13 }
 0x437   : > { %v8241_v21 = vsub.f32 %v1252_v16, %v8231_v17 }
 0x438   : > { %v8225_v14 = vand.u32 4294901760, %v1945_v12  ;;  %v8234_v18 = vand.u32 4294901760, %v1951_v15  ;;  %v2260_v15 = vsel %vm1258_vm0, %v8188_v58, 0 }
 0x439   : > { %v8249_v23 = vand.u32 4294901760, %v8241_v21  ;;  %v2281_v16 = vand.u32 4294901760, %v2260_v15 }
 0x43a   : > { %1947 = vmatpush.msrb.mxu1 %v8225_v14 }
 0x43b   : > { %v2107_v27 = vsub.f32 %v8241_v21, %v8249_v23 }
 0x43c   : > { %1953 = vmatpush.msrb.mxu1 %v8234_v18 }
 0x49a   : > { %v8171_v34 = vpop.f32.mrf.mxu1 }
 0x49c   : > { %v8169_v31 = vpop.f32.mrf.mxu0 }
 0x4a0   : > { %v8167_v29 = vpop.f32.mrf.mxu2 }
 0x4a3   : > { %v1636_v40 = vpop.f32.mrf.mxu1 }
 0x4a5   : > { %v1610_v38 = vpop.f32.mrf.mxu0 }
 0x4a6   : > { %v1637_v42 = vadd.f32 %v1636_v40, %v1610_v38  ;;  %v2113_v38 = vsub.f32 %v8252_v24, %v8258_v28 }
 0x4a8   : > { %v8173_v35 = vpop.f32.mrf.mxu3  ;;  %v8175_v36 = vpop.f32.mrf.mxu2  ;;  %v8266_v40 = vand.u32 4294901760, %v2113_v38 }
 0x4a9   : > { %v1483_v22 = vadd.f32 %v8173_v35, %v8167_v29  ;;  %v8261_v35 = vand.u32 4294901760, %v2107_v27 }
 0x4ab   : > { %v1730_v49 = vpop.f32.mrf.mxu1  ;;  %v1507_v29 = vadd.f32 %v8169_v31, %v1483_v22  ;;  %v2282_v22 = vsub.f32 %v2260_v15, %v2281_v16 }
 0x4ad   : > { %v1708_v47 = vpop.f32.mrf.mxu0 }
 0x4b0   : > { %v8177_v39 = vpop.f32.mrf.mxu3  ;;  %v1660_v41 = vpop.f32.mrf.mxu2 }
 0x4b1   : > { %v1661_v43 = vadd.f32 %v1660_v41, %v1637_v42  ;;  %v1531_v41 = vadd.f32 %v8171_v34, %v1507_v29  ;;  %v2283_v29 = vand.u32 4294901760, %v2282_v22 }
 0x4b3   : > { %v1555_v42 = vadd.f32 %v8175_v36, %v1531_v41  ;;  %v2284_v38 = vsub.f32 %v2282_v22, %v2283_v29 }
 0x4b5   : > { %v2285_v41 = vand.u32 4294901760, %v2284_v38 }
 0x4b8   : > { %v1684_v44 = vpop.f32.mrf.mxu3 }
 0x4b9   : > { %v1685_v46 = vadd.f32 %v1684_v44, %v1661_v43 }
 0x4bb   : > { %v1709_v48 = vadd.f32 %v1708_v47, %v1685_v46  ;;  %v1577_v46 = vadd.f32 %v8177_v39, %v1555_v42 }
 0x4bd   : > { %v1731_v50 = vadd.f32 %v1730_v49, %v1709_v48 }
 0x4bf   : > { %v1733_v51 = vmul.f32 0.25, %v1731_v50 }
 0x4c1   : > { %v1734_v52 = vsel %vm8152_vm2, %v1733_v51, -1e+09  ;;  %v2061_v51 = vsel %vm1258_vm0, %v1577_v46, 0 }
 0x4c2   : > { %v1735_v53 = vsel %vm1415_vm3, %v1734_v52, -inf  ;;  %v2081_v34 = vand.u32 4294901760, %v2061_v51 }
 0x4c3   : > { %1736 = vmax.xlane.f32.xlu2 %v1735_v53 }
 0x4db   : > { %2258 = vrot.lane.b32.xlu2 %v8188_v58, %s7828_s23 }
 0x4e3   : > { %2425 = vrot.lane.b32.xlu2 %v8188_v58, %s7832_s4 }
 0x4eb   : > { %2577 = vrot.lane.b32.xlu2 %v8188_v58, %s7829_s13 }
 0x536   : > { %v1737_v59 = vpop.xlane.xlu2 %1736 }
 0x537   : > { %v1738_v63 = vsub.f32 %v1734_v52, %v1737_v59 }
 0x539   : > { %v1739_v1 = vmul.f32 1.442695, %v1738_v63  ;;  %v2082_v63 = vsub.f32 %v2061_v51, %v2081_v34 }
 0x53b   : > { %7705 = vpow2.f32 %v1739_v1 }
 0x53e   : > { %v2259_v31 = vpop.permute.xlu2 %2258 }
 0x53f   : > { %v2262_v50 = vsel %vm1258_vm0, %v2259_v31, 0 }
 0x540   : > { %v2279_v53 = vand.u32 4294901760, %v2262_v50 }
 0x541   : > { %v7706_v25 = vpop.eup %7705 }
 0x542   : > { %v1741_v26 = vsel %vm1415_vm3, %v7706_v25, 0.0  ;;  %v2306_v36 = vsub.f32 %v2262_v50, %v2279_v53 }
 0x543   : > { %1742 = vadd.xlane.f32.xlu1 %v1741_v26  ;;  %v2083_v26 = vand.u32 4294901760, %v2082_v63 }
 0x5b6   : > { %v1743_v30 = vpop.xlane.xlu1 %1742 }
 0x5b7   : > { %7707 = vrcp.f32 %v1743_v30  ;;  %v2426_v30 = vpop.permute.xlu2 %2425 }
 0x5bd   : > { %v7708_v32 = vpop.eup %7707 }
 0x5be   : > { %v1745_v60 = vmul.f32 %v7708_v32, %v7706_v25  ;;  %v2307_v25 = vand.u32 4294901760, %v2306_v36 }
 0x5c0   : > { %v1750_v61 = vsel %vm1415_vm3, %v1745_v60, 0 }
 0x5c1   : > { %v1769_v62 = vand.u32 4294901760, %v1750_v61 }
 0x5c3   : > { %1800 = vmatmul.f32.vlgmr.msrb.gmra.mxu3 %v1769_v62  ;;  %v1770_v0 = vsub.f32 %v1750_v61, %v1769_v62  ;;  %v2308_v61 = vsub.f32 %v2306_v36, %v2307_v25 }
 0x5c4   : > { %2000 = vmatpush.msrb.mxu3 %v8199_v6 }
 0x5c5   : > { %1824 = vmatmul.f32.vlgmr.msra.gmra.mxu0 %v1770_v0  ;;  %v1771_v2 = vand.u32 4294901760, %v1770_v0 }
 0x5c6   : > { %2002 = vmatpush.msrb.mxu3 %v8205_v9  ;;  %2027 = vmatpush.msra.mxu0 %v8210_v10 }
 0x5c7   : > { %1848 = vmatmul.f32.vlgmr.msra.gmra.mxu1 %v1771_v2  ;;  %v1772_v3 = vsub.f32 %v1770_v0, %v1771_v2  ;;  %v2084_v2 = vsub.f32 %v2082_v63, %v2083_v26 }
 0x5c8   : > { %2031 = vmatpush.msra.mxu0 %v8221_v13  ;;  %2052 = vmatpush.msra.mxu1 %v8199_v6 }
 0x5c9   : > { %v1773_v4 = vand.u32 4294901760, %v1772_v3  ;;  %v2085_v7 = vand.u32 4294901760, %v2084_v2 }
 0x5ca   : > { %2054 = vmatpush.msra.mxu1 %v8205_v9 }
 0x5cb   : > { %1774 = vmatmul.f32.vlgmr.msrb.gmra.mxu2 %v1773_v4  ;;  %1894 = vmatmul.f32.vlgmr.msra.gmra.mxu3 %v1769_v62  ;;  %v2309_v4 = vand.u32 4294901760, %v2308_v61 }
 0x5cc   : > { %1975 = vmatpush.msrb.mxu2 %v8203_v8  ;;  %2109 = vmatpush.msra.mxu3 %v8261_v35 }
 0x5ce   : > { %1978 = vmatpush.msrb.mxu2 %v8213_v11  ;;  %2115 = vmatpush.msra.mxu3 %v8266_v40 }
 0x5d3   : > { %1872 = vmatmul.f32.vlgmr.msra.gmra.mxu2 %v1769_v62  ;;  %v2446_v62 = vand.u32 4294901760, %v2426_v30 }
 0x5d4   : > { %2078 = vmatpush.msra.mxu2 %v8231_v17 }
 0x5d5   : > { %v2473_v5 = vsub.f32 %v2426_v30, %v2446_v62 }
 0x5d6   : > { %2080 = vmatpush.msra.mxu2 %v8238_v20 }
 0x5d7   : > { %v2474_v12 = vand.u32 4294901760, %v2473_v5 }
 0x5d9   : > { %v2475_v19 = vsub.f32 %v2473_v5, %v2474_v12 }
 0x5db   : > { %v2476_v27 = vand.u32 4294901760, %v2475_v19 }
 0x642   : > { %v1825_v48 = vpop.f32.mrf.mxu0 }
 0x644   : > { %v1849_v52 = vpop.f32.mrf.mxu1 }
 0x646   : > { %v1801_v43 = vpop.f32.mrf.mxu3 }
 0x64e   : > { %v1775_v44 = vpop.f32.mrf.mxu2  ;;  %v1895_v57 = vpop.f32.mrf.mxu3 }
 0x64f   : > { %v1802_v47 = vadd.f32 %v1801_v43, %v1775_v44 }
 0x651   : > { %v1826_v49 = vadd.f32 %v1825_v48, %v1802_v47 }
 0x653   : > { %v1850_v54 = vadd.f32 %v1849_v52, %v1826_v49 }
 0x656   : > { %v1873_v55 = vpop.f32.mrf.mxu2 }
 0x657   : > { %v1874_v56 = vadd.f32 %v1873_v55, %v1850_v54 }
 0x659   : > { %v1896_v59 = vadd.f32 %v1895_v57, %v1874_v56 }
 0x65b   : > { %v1899_v39 = vsel %vm1258_vm0, %v1896_v59, 0 }
 0x65c   : > { %v1919_v1 = vand.u32 4294901760, %v1899_v39 }
 0x65e   : > { %v1920_v32 = vsub.f32 %v1899_v39, %v1919_v1  ;;  %1955 = vmatmul.f32.vlgmr.msrb.gmra.mxu1 %v1919_v1  ;;  %v2411_v39 = vperm.slane %v8149_v37, 1 }
 0x65f   : > { %2162 = vmatpush.msrb.mxu1 %v8231_v17 }
 0x660   : > { %1981 = vmatmul.f32.vlgmr.msrb.gmra.mxu2 %v1920_v32  ;;  %v1921_v60 = vand.u32 4294901760, %v1920_v32  ;;  %vm8286_vm4 = vcmp.eq.s32.totalorder %v2411_v39, 1 }
 0x661   : > { %2164 = vmatpush.msrb.mxu1 %v8238_v20  ;;  %2189 = vmatpush.msrb.mxu2 %v8249_v23 }
 0x662   : > { %2006 = vmatmul.f32.vlgmr.msrb.gmra.mxu3 %v1921_v60  ;;  %v1922_v0 = vsub.f32 %v1920_v32, %v1921_v60 }
 0x663   : > { %2193 = vmatpush.msrb.mxu2 %v8258_v28  ;;  %2214 = vmatpush.msrb.mxu3 %v8231_v17 }
 0x664   : > { %v1923_v3 = vand.u32 4294901760, %v1922_v0 }
 0x665   : > { %2216 = vmatpush.msrb.mxu3 %v8238_v20 }
 0x666   : > { %1924 = vmatmul.f32.vlgmr.msrb.gmra.mxu0 %v1923_v3  ;;  %2056 = vmatmul.f32.vlgmr.msra.gmra.mxu1 %v1919_v1 }
 0x667   : > { %2310 = vmatpush.xpose.msra.mxu1 %v2309_v4  ;;  %2137 = vmatpush.msrb.mxu0 %v8241_v21 }
 0x668   : > { %2086 = vmatmul.f32.vlgmr.msra.gmra.mxu2 %v2085_v7 }
 0x669   : > { %2333 = vmatpush.xpose.msra.mxu2 %v2306_v36  ;;  %2140 = vmatpush.msrb.mxu0 %v8252_v24 }
 0x66a   : > { %2117 = vmatmul.f32.vlgmr.msra.gmra.mxu3 %v2081_v34 }
 0x66b   : > { %2356 = vmatpush.xpose.msra.mxu3 %v2279_v53 }
 0x66e   : > { %2033 = vmatmul.f32.vlgmr.msra.gmra.mxu0 %v1919_v1  ;;  %2168 = vmatmul.f32.vlgmr.msrb.gmra.mxu1 %v2083_v26 }
 0x66f   : > { %2280 = vmatpush.xpose.msra.mxu0 %v2279_v53  ;;  %2404 = vmatpush.xpose.msrb.mxu1 %v2279_v53 }
 0x670   : > { %2195 = vmatmul.f32.vlgmr.msrb.gmra.mxu2 %v2081_v34 }
 0x671   : > { %2447 = vmatpush.msrb.mxu2 %v2446_v62 }
 0x672   : > { %2218 = vmatmul.f32.vlgmr.msrb.gmra.mxu3 %v2081_v34 }
 0x673   : > { %2477 = vmatpush.msrb.mxu3 %v2476_v27 }
 0x676   : > { %2143 = vmatmul.f32.vlgmr.msrb.gmra.mxu0 %v2082_v63  ;;  %2312 = vmatmul.f32.vlgmr.msra.gmra.mxu1 %v2281_v16 }
 0x677   : > { %2382 = vmatpush.xpose.msrb.mxu0 %v2307_v25  ;;  %2523 = vmatpush.msra.mxu1 %v2446_v62 }
 0x678   : > { %2336 = vmatmul.f32.vlgmr.msra.gmra.mxu2 %v2282_v22 }
 0x679   : > { %2549 = vmatpush.msra.mxu2 %v2474_v12 }
 0x67a   : > { %2360 = vmatmul.f32.vlgmr.msra.gmra.mxu3 %v2283_v29 }
 0x67b   : > { %2571 = vmatpush.msra.mxu3 %v2446_v62 }
 0x67e   : > { %2286 = vmatmul.f32.vlgmr.msra.gmra.mxu0 %v2285_v41  ;;  %2406 = vmatmul.f32.vlgmr.msrb.gmra.mxu1 %v2281_v16 }
 0x67f   : > { %2500 = vmatpush.msra.mxu0 %v2473_v5 }
 0x686   : > { %2384 = vmatmul.f32.vlgmr.msrb.gmra.mxu0 %v2281_v16 }
 0x6db   : > { %v1956_v42 = vpop.f32.mrf.mxu1 }
 0x6e3   : > { %v1925_v43 = vpop.f32.mrf.mxu0  ;;  %v1982_v44 = vpop.f32.mrf.mxu2 }
 0x6e4   : > { %v2057_v31 = vpop.f32.mrf.mxu1  ;;  %v1957_v62 = vadd.f32 %v1956_v42, %v1925_v43 }
 0x6e5   : > { %v2007_v46 = vpop.f32.mrf.mxu3 }
 0x6e6   : > { %v1983_v0 = vadd.f32 %v1982_v44, %v1957_v62 }
 0x6e8   : > { %v2008_v37 = vadd.f32 %v2007_v46, %v1983_v0 }
 0x6eb   : > { %v2034_v47 = vpop.f32.mrf.mxu0  ;;  %v2087_v48 = vpop.f32.mrf.mxu2 }
 0x6ec   : > { %v2169_v50 = vpop.f32.mrf.mxu1  ;;  %v2035_v2 = vadd.f32 %v2034_v47, %v2008_v37 }
 0x6ed   : > { %v2118_v49 = vpop.f32.mrf.mxu3 }
 0x6ee   : > { %v2058_v3 = vadd.f32 %v2057_v31, %v2035_v2 }
 0x6f0   : > { %v2088_v4 = vadd.f32 %v2087_v48, %v2058_v3 }
 0x6f2   : > { %v2119_v5 = vadd.f32 %v2118_v49, %v2088_v4 }
 0x6f3   : > { %v2144_v51 = vpop.f32.mrf.mxu0  ;;  %v2196_v52 = vpop.f32.mrf.mxu2 }
 0x6f4   : > { %v2313_v54 = vpop.f32.mrf.mxu1  ;;  %v2145_v7 = vadd.f32 %v2144_v51, %v2119_v5 }
 0x6f5   : > { %v2219_v53 = vpop.f32.mrf.mxu3 }
 0x6f6   : > { %v2170_v12 = vadd.f32 %v2169_v50, %v2145_v7 }
 0x6f8   : > { %v2197_v15 = vadd.f32 %v2196_v52, %v2170_v12 }
 0x6fa   : > { %v2220_v16 = vadd.f32 %v2219_v53, %v2197_v15 }
 0x6fb   : > { %v2287_v34 = vpop.f32.mrf.mxu0  ;;  %v2337_v56 = vpop.f32.mrf.mxu2 }
 0x6fc   : > { %v2314_v55 = vadd.f32 %v2313_v54, %v2287_v34  ;;  %v2407_v25 = vpop.f32.mrf.mxu1  ;;  %v8296_v19 = vadd.f32 %v2220_v16, %v8095_v33  ;;  %v2578_v33 = vpop.permute.xlu2 %2577 }
 0x6fd   : > { %v2361_v36 = vpop.f32.mrf.mxu3  ;;  %v2581_v47 = vsel %vm1258_vm0, %v2578_v33, 0 }
 0x6fe   : > { %v2338_v57 = vadd.f32 %v2337_v56, %v2314_v55  ;;  %v2223_v22 = vsel %vm1028_vm15, %v8296_v19, 0.0  ;;  %v2602_v51 = vand.u32 4294901760, %v2581_v47 }
 0x700   : > { %v2362_v59 = vadd.f32 %v2361_v36, %v2338_v57  ;;  %v2603_v34 = vsub.f32 %v2581_v47, %v2602_v51 }
 0x702   : > { %v2604_v57 = vand.u32 4294901760, %v2603_v34 }
 0x703   : > { %v2385_v63 = vpop.f32.mrf.mxu0 }
 0x704   : > { %v2386_v1 = vadd.f32 %v2385_v63, %v2362_v59  ;;  %v2605_v63 = vsub.f32 %v2603_v34, %v2604_v57 }
 0x706   : > { %v2408_v26 = vadd.f32 %v2407_v25, %v2386_v1 }
 0x708   : > { %v2410_v32 = vmul.f32 0.25, %v2408_v26 }
 0x70a   : > { %v2413_v60 = vsel %vm8286_vm4, %v2410_v32, -1e+09  ;;  %v2606_v32 = vand.u32 4294901760, %v2605_v63 }
 0x70b   : > { %v2414_v61 = vsel %vm1415_vm3, %v2413_v60, -inf }
 0x70c   : > { %2415 = vmax.xlane.f32.xlu0 %v2414_v61 }
 0x720   : > { %2744 = vrot.lane.b32.xlu0 %v8188_v58, %s7831_s25 }
 0x74a   : > { %2224 = vadd.xlane.f32.xlu0 %v2223_v22 }
 0x77f   : > { %v2416_v27 = vpop.xlane.xlu0 %2415 }
 0x780   : > { %v2417_v29 = vsub.f32 %v2413_v60, %v2416_v27 }
 0x782   : > { %v2418_v38 = vmul.f32 1.442695, %v2417_v29 }
 0x784   : > { %7709 = vpow2.f32 %v2418_v38 }
 0x78a   : > { %v7710_v41 = vpop.eup %7709 }
 0x78b   : > { %v2420_v42 = vsel %vm1415_vm3, %v7710_v41, 0.0 }
 0x78c   : > { %2421 = vadd.xlane.f32.xlu1 %v2420_v42 }
 0x792   : > { %v2745_v46 = vpop.permute.xlu0 %2744 }
 0x793   : > { %v2765_v49 = vand.u32 4294901760, %v2745_v46 }
 0x795   : > { %v2792_v53 = vsub.f32 %v2745_v46, %v2765_v49 }
 0x797   : > { %v2793_v55 = vand.u32 4294901760, %v2792_v53 }
 0x799   : > { %v2794_v36 = vsub.f32 %v2792_v53, %v2793_v55 }
 0x79b   : > { %v2795_v25 = vand.u32 4294901760, %v2794_v36 }
 0x7a5   : > { %2579 = vrot.lane.b32.xlu1 %v8188_v58, %s7827_s5 }
 0x7ff   : > { %v2422_v43 = vpop.xlane.xlu1 %2421 }
 0x800   : > { %7711 = vrcp.f32 %v2422_v43 }
 0x806   : > { %v7712_v44 = vpop.eup %7711 }
 0x807   : > { %v2424_v31 = vmul.f32 %v7712_v44, %v7710_v41 }
 0x809   : > { %v2429_v48 = vsel %vm1415_vm3, %v2424_v31, 0 }
 0x80a   : > { %v2448_v50 = vand.u32 4294901760, %v2429_v48 }
 0x80c   : > { %2479 = vmatmul.f32.vlgmr.msrb.gmra.mxu3 %v2448_v50  ;;  %v2449_v52 = vsub.f32 %v2429_v48, %v2448_v50 }
 0x80e   : > { %2503 = vmatmul.f32.vlgmr.msra.gmra.mxu0 %v2449_v52  ;;  %v2450_v54 = vand.u32 4294901760, %v2449_v52 }
 0x810   : > { %2527 = vmatmul.f32.vlgmr.msra.gmra.mxu1 %v2450_v54  ;;  %v2451_v58 = vsub.f32 %v2449_v52, %v2450_v54 }
 0x812   : > { %v2452_v56 = vand.u32 4294901760, %v2451_v58 }
 0x814   : > { %2453 = vmatmul.f32.vlgmr.msrb.gmra.mxu2 %v2452_v56  ;;  %2573 = vmatmul.f32.vlgmr.msra.gmra.mxu3 %v2448_v50 }
 0x817   : > { %v2580_v59 = vpop.permute.xlu1 %2579 }
 0x818   : > { %v2583_v39 = vsel %vm1258_vm0, %v2580_v59, 0 }
 0x819   : > { %v2600_v1 = vand.u32 4294901760, %v2583_v39 }
 0x81b   : > { %v2627_v26 = vsub.f32 %v2583_v39, %v2600_v1  ;;  %2601 = vmatpush.xpose.msrb.mxu0 %v2600_v1  ;;  %2677 = vmatpush.xpose.msrb.mxu3 %v2600_v1 }
 0x81c   : > { %2551 = vmatmul.f32.vlgmr.msra.gmra.mxu2 %v2448_v50 }
 0x81d   : > { %v2628_v60 = vand.u32 4294901760, %v2627_v26  ;;  %2654 = vmatpush.xpose.msrb.mxu2 %v2627_v26 }
 0x81e   : > { %2607 = vmatmul.f32.vlgmr.msrb.gmra.mxu0 %v2606_v32  ;;  %2681 = vmatmul.f32.vlgmr.msrb.gmra.mxu3 %v2604_v57 }
 0x81f   : > { %2796 = vmatpush.msra.mxu3 %v2795_v25  ;;  %v2629_v61 = vsub.f32 %v2627_v26, %v2628_v60  ;;  %2703 = vmatpush.xpose.msra.mxu0 %v2628_v60 }
 0x821   : > { %2766 = vmatpush.msra.mxu2 %v2765_v49  ;;  %2890 = vmatpush.msrb.mxu3 %v2765_v49  ;;  %v2630_v62 = vand.u32 4294901760, %v2629_v61 }
 0x823   : > { %2819 = vmatpush.msrb.mxu0 %v2792_v53  ;;  %2631 = vmatpush.xpose.msrb.mxu1 %v2630_v62 }
 0x824   : > { %2657 = vmatmul.f32.vlgmr.msrb.gmra.mxu2 %v2603_v34 }
 0x825   : > { %2868 = vmatpush.msrb.mxu2 %v2793_v55 }
 0x826   : > { %2633 = vmatmul.f32.vlgmr.msrb.gmra.mxu1 %v2602_v51  ;;  %2705 = vmatmul.f32.vlgmr.msra.gmra.mxu0 %v2602_v51 }
 0x827   : > { %2725 = vmatpush.xpose.msra.mxu1 %v2600_v1  ;;  %2914 = vmatpush.msra.mxu0 %v8199_v6 }
 0x829   : > { %2916 = vmatpush.msra.mxu0 %v8205_v9 }
 0x82b   : > { %2842 = vmatpush.msrb.mxu1 %v2765_v49 }
 0x82e   : > { %2727 = vmatmul.f32.vlgmr.msra.gmra.mxu1 %v2602_v51 }
 0x82f   : > { %2945 = vmatpush.msra.mxu1 %v8225_v14 }
 0x831   : > { %2951 = vmatpush.msra.mxu1 %v8234_v18 }
 0x88b   : > { %v2504_v2 = vpop.f32.mrf.mxu0 }
 0x88d   : > { %v2528_v3 = vpop.f32.mrf.mxu1 }
 0x88f   : > { %v2480_v0 = vpop.f32.mrf.mxu3 }
 0x897   : > { %v2454_v37 = vpop.f32.mrf.mxu2  ;;  %v2574_v5 = vpop.f32.mrf.mxu3 }
 0x89b   : > { %v2608_v7 = vpop.f32.mrf.mxu0 }
 0x89f   : > { %v2552_v4 = vpop.f32.mrf.mxu2 }
 0x8a1   : > { %v2682_v27 = vpop.f32.mrf.mxu3 }
 0x8a3   : > { %v2634_v12 = vpop.f32.mrf.mxu1  ;;  %v2706_v38 = vpop.f32.mrf.mxu0 }
 0x8a4   : > { %v2635_v15 = vadd.f32 %v2634_v12, %v2608_v7 }
 0x8a7   : > { %v2658_v16 = vpop.f32.mrf.mxu2 }
 0x8a8   : > { %v2659_v22 = vadd.f32 %v2658_v16, %v2635_v15 }
 0x8aa   : > { %v2683_v29 = vadd.f32 %v2682_v27, %v2659_v22 }
 0x8ab   : > { %v2728_v42 = vpop.f32.mrf.mxu1 }
 0x8ac   : > { %v2707_v41 = vadd.f32 %v2706_v38, %v2683_v29 }
 0x8ae   : > { %v2729_v43 = vadd.f32 %v2728_v42, %v2707_v41 }
 0x8b0   : > { %v2731_v14 = vmul.f32 0.25, %v2729_v43 }
 0x8b2   : > { %v2732_v18 = vsel %vm8286_vm4, %v2731_v14, -1e+09 }
 0x8b3   : > { %v2733_v44 = vsel %vm1415_vm3, %v2732_v18, -inf }
 0x8b4   : > { %2734 = vmax.xlane.f32.xlu2 %v2733_v44 }
 0x927   : > { %v2735_v33 = vpop.xlane.xlu2 %2734 }
 0x928   : > { %v2736_v46 = vsub.f32 %v2732_v18, %v2735_v33 }
 0x92a   : > { %v2737_v31 = vmul.f32 1.442695, %v2736_v46 }
 0x92c   : > { %7713 = vpow2.f32 %v2737_v31 }
 0x932   : > { %v7714_v47 = vpop.eup %7713 }
 0x933   : > { %v2739_v48 = vsel %vm1415_vm3, %v7714_v47, 0.0 }
 0x934   : > { %2740 = vadd.xlane.f32.xlu1 %v2739_v48 }
 0x9a7   : > { %v2741_v49 = vpop.xlane.xlu1 %2740 }
 0x9a8   : > { %7715 = vrcp.f32 %v2741_v49 }
 0x9ae   : > { %v7716_v50 = vpop.eup %7715 }
 0x9af   : > { %v2743_v51 = vmul.f32 %v7716_v50, %v7714_v47 }
 0x9b1   : > { %v2748_v52 = vsel %vm1415_vm3, %v2743_v51, 0  ;;  %v2225_v51 = vpop.xlane.xlu0 %2224 }
 0x9b2   : > { %v2767_v53 = vand.u32 4294901760, %v2748_v52 }
 0x9b4   : > { %2798 = vmatmul.f32.vlgmr.msra.gmra.mxu3 %v2767_v53  ;;  %v2768_v54 = vsub.f32 %v2748_v52, %v2767_v53 }
 0x9b5   : > { %2998 = vmatpush.msra.mxu3 %v8199_v6 }
 0x9b6   : > { %2822 = vmatmul.f32.vlgmr.msrb.gmra.mxu0 %v2768_v54  ;;  %v2769_v34 = vand.u32 4294901760, %v2768_v54 }
 0x9b7   : > { %3000 = vmatpush.msra.mxu3 %v8205_v9  ;;  %3025 = vmatpush.msrb.mxu0 %v8210_v10 }
 0x9b8   : > { %2846 = vmatmul.f32.vlgmr.msrb.gmra.mxu1 %v2769_v34  ;;  %v2770_v58 = vsub.f32 %v2768_v54, %v2769_v34 }
 0x9b9   : > { %3050 = vmatpush.msrb.mxu1 %v8199_v6  ;;  %3029 = vmatpush.msrb.mxu0 %v8221_v13  ;;  %v2481_v6 = vadd.f32 %v2480_v0, %v2454_v37 }
 0x9ba   : > { %v2771_v55 = vand.u32 4294901760, %v2770_v58 }
 0x9bb   : > { %3052 = vmatpush.msrb.mxu1 %v8205_v9  ;;  %v2505_v10 = vadd.f32 %v2504_v2, %v2481_v6 }
 0x9bc   : > { %2772 = vmatmul.f32.vlgmr.msra.gmra.mxu2 %v2771_v55  ;;  %2892 = vmatmul.f32.vlgmr.msrb.gmra.mxu3 %v2767_v53  ;;  %v7751_v55 = vld [vmem:[#allocation2 + $0x8] sm:$0xff] }
 0x9bd   : > { %2973 = vmatpush.msra.mxu2 %v8203_v8  ;;  %3107 = vmatpush.msrb.mxu3 %v8261_v35  ;;  %v2529_v13 = vadd.f32 %v2528_v3, %v2505_v10 }
 0x9bf   : > { %2976 = vmatpush.msra.mxu2 %v8213_v11  ;;  %3113 = vmatpush.msrb.mxu3 %v8266_v40  ;;  %v2553_v56 = vadd.f32 %v2552_v4, %v2529_v13 }
 0x9c1   : > { %v2575_v36 = vadd.f32 %v2574_v5, %v2553_v56 }
 0x9c3   : > { %v3059_v35 = vsel %vm1258_vm0, %v2575_v36, 0  ;;  %v3251_v36 = vld [vmem:[%s7981_s21 + $0x18] sm:$0xff] }
 0x9c4   : > { %2870 = vmatmul.f32.vlgmr.msrb.gmra.mxu2 %v2767_v53  ;;  %v3079_v40 = vand.u32 4294901760, %v3059_v35 }
 0x9c5   : > { %3076 = vmatpush.msrb.mxu2 %v8231_v17 }
 0x9c6   : > { %v3080_v60 = vsub.f32 %v3059_v35, %v3079_v40 }
 0x9c7   : > { %3078 = vmatpush.msrb.mxu2 %v8238_v20 }
 0x9c8   : > { %v3081_v37 = vand.u32 4294901760, %v3080_v60 }
 0x9ca   : > { %v3082_v4 = vsub.f32 %v3080_v60, %v3081_v37 }
 0x9cc   : > { %v3083_v7 = vand.u32 4294901760, %v3082_v4 }
 0xa33   : > { %v2823_v8 = vpop.f32.mrf.mxu0 }
 0xa35   : > { %v2847_v11 = vpop.f32.mrf.mxu1 }
 0xa37   : > { %v2799_v9 = vpop.f32.mrf.mxu3 }
 0xa3f   : > { %v2773_v57 = vpop.f32.mrf.mxu2  ;;  %v2893_v26 = vpop.f32.mrf.mxu3 }
 0xa40   : > { %v2800_v59 = vadd.f32 %v2799_v9, %v2773_v57 }
 0xa42   : > { %v2824_v63 = vadd.f32 %v2823_v8, %v2800_v59  ;;  %v3274_v8 = vand.u32 4294901760, %v3251_v36 }
 0xa44   : > { %v2848_v39 = vadd.f32 %v2847_v11, %v2824_v63  ;;  %v3250_v63 = vld [vmem:[%s7981_s21 + $0x10] sm:$0xff] }
 0xa45   : > { %v3276_v11 = vand.u32 4294901760, %v3250_v63 }
 0xa47   : > { %v2871_v1 = vpop.f32.mrf.mxu2 }
 0xa48   : > { %v2872_v25 = vadd.f32 %v2871_v1, %v2848_v39  ;;  %v3249_v39 = vld [vmem:[%s7981_s21 + $0x8] sm:$0xff] }
 0xa4a   : > { %v2894_v32 = vadd.f32 %v2893_v26, %v2872_v25  ;;  %v3318_v25 = vsub.f32 %v3250_v63, %v3276_v11  ;;  %v3278_v26 = vand.u32 4294901760, %v3249_v39 }
 0xa4c   : > { %v2897_v61 = vsel %vm1258_vm0, %v2894_v32, 0  ;;  %v3248_v32 = vld [vmem:[%s7981_s21] sm:$0xff] }
 0xa4d   : > { %v2917_v62 = vand.u32 4294901760, %v2897_v61 }
 0xa4f   : > { %v2918_v0 = vsub.f32 %v2897_v61, %v2917_v62  ;;  %2953 = vmatmul.f32.vlgmr.msra.gmra.mxu1 %v2917_v62 }
 0xa50   : > { %3160 = vmatpush.msra.mxu1 %v8231_v17 }
 0xa51   : > { %2979 = vmatmul.f32.vlgmr.msra.gmra.mxu2 %v2918_v0  ;;  %v2919_v2 = vand.u32 4294901760, %v2918_v0 }
 0xa52   : > { %3162 = vmatpush.msra.mxu1 %v8238_v20  ;;  %3187 = vmatpush.msra.mxu2 %v8249_v23  ;;  %v7833_v23 = vmov 32.0  }
 0xa53   : > { %3004 = vmatmul.f32.vlgmr.msra.gmra.mxu3 %v2919_v2  ;;  %v2920_v3 = vsub.f32 %v2918_v0, %v2919_v2  ;;  %7717 = vrcp.f32 %v7833_v23  ;;  %v3319_v0 = vand.u32 4294901760, %v3318_v25 }
 0xa54   : > { %3191 = vmatpush.msra.mxu2 %v8258_v28  ;;  %3212 = vmatpush.msra.mxu3 %v8231_v17 }
 0xa55   : > { %v2921_v5 = vand.u32 4294901760, %v2920_v3 }
 0xa56   : > { %3214 = vmatpush.msra.mxu3 %v8238_v20 }
 0xa57   : > { %2922 = vmatmul.f32.vlgmr.msra.gmra.mxu0 %v2921_v5  ;;  %3054 = vmatmul.f32.vlgmr.msrb.gmra.mxu1 %v2917_v62 }
 0xa58   : > { %3135 = vmatpush.msra.mxu0 %v8241_v21 }
 0xa59   : > { %3084 = vmatmul.f32.vlgmr.msrb.gmra.mxu2 %v3083_v7  ;;  %v7718_v20 = vpop.eup %7717  ;;  %v3320_v7 = vsub.f32 %v3318_v25, %v3319_v0 }
 0xa5a   : > { %3138 = vmatpush.msra.mxu0 %v8252_v24  ;;  %v2227_v27 = vmul.f32 32.0, %v7718_v20  ;;  %vm2231_vm5 = vweird.f32 %v7718_v20 }
 0xa5b   : > { %3115 = vmatmul.f32.vlgmr.msrb.gmra.mxu3 %v3079_v40 }
 0xa5c   : > { %v2228_v29 = vsub.f32 1.0, %v2227_v27  ;;  %3392 = vmatpush.msrb.mxu3 %v3274_v8 }
 0xa5e   : > { %v2229_v14 = vmul.f32 %v7718_v20, %v2228_v29  ;;  %3394 = vmatpush.msrb.mxu3 %v3276_v11 }
 0xa5f   : > { %3031 = vmatmul.f32.vlgmr.msrb.gmra.mxu0 %v2917_v62  ;;  %3166 = vmatmul.f32.vlgmr.msra.gmra.mxu1 %v3081_v37  ;;  %v3324_v37 = vsub.f32 %v3249_v39, %v3278_v26 }
 0xa60   : > { %v2230_v46 = vadd.f32 %v7718_v20, %v2229_v14  ;;  %3275 = vmatpush.msrb.mxu0 %v3274_v8  ;;  %3396 = vmatpush.msrb.mxu3 %v3278_v26 }
 0xa61   : > { %3193 = vmatmul.f32.vlgmr.msra.gmra.mxu2 %v3079_v40  ;;  %v3325_v23 = vand.u32 4294901760, %v3324_v37 }
 0xa62   : > { %v8337_v50 = vsel %vm2231_vm5, %v7718_v20, %v2230_v46  ;;  %3277 = vmatpush.msrb.mxu0 %v3276_v11 }
 0xa63   : > { %3216 = vmatmul.f32.vlgmr.msra.gmra.mxu3 %v3079_v40  ;;  %v2233_v34 = vmul.f32 %v8337_v50, %v2225_v51  ;;  %v3326_v20 = vsub.f32 %v3324_v37, %v3325_v23 }
 0xa64   : > { %3279 = vmatpush.msrb.mxu0 %v3278_v26 }
 0xa65   : > { %v8341_v10 = vsub.f32 %v8296_v19, %v2233_v34  ;;  %v3312_v19 = vsub.f32 %v3251_v36, %v3274_v8 }
 0xa67   : > { %3141 = vmatmul.f32.vlgmr.msra.gmra.mxu0 %v3080_v60  ;;  %v2235_v56 = vmul.f32 %v8341_v10, %v8341_v10  ;;  %v3313_v1 = vand.u32 4294901760, %v3312_v19  ;;  %3358 = vmatpush.msrb.mxu2 %v3312_v19  ;;  %v3280_v60 = vand.u32 4294901760, %v3248_v32 }
 0xa69   : > { %v2236_v9 = vsel %vm1028_vm15, %v2235_v56, 0.0  ;;  %v3314_v62 = vsub.f32 %v3312_v19, %v3313_v1  ;;  %3361 = vmatpush.msrb.mxu2 %v3318_v25  ;;  %v3330_v3 = vsub.f32 %v3248_v32, %v3280_v60  ;;  %3398 = vmatpush.msrb.mxu3 %v3280_v60 }
 0xa6a   : > { %3281 = vmatpush.msrb.mxu0 %v3280_v60 }
 0xa6b   : > { %v3315_v5 = vand.u32 4294901760, %v3314_v62  ;;  %3364 = vmatpush.msrb.mxu2 %v3324_v37 }
 0xa6c   : > { %3427 = vmatpush.msra.mxu0 %v3313_v1 }
 0xa6d   : > { %3316 = vmatpush.msrb.mxu1 %v3315_v5  ;;  %3367 = vmatpush.msrb.mxu2 %v3330_v3 }
 0xa6e   : > { %3431 = vmatpush.msra.mxu0 %v3319_v0  ;;  %v3485_v0 = vld [vmem:[%s7987_s3 + $0x28] sm:$0xff] }
 0xa70   : > { %3435 = vmatpush.msra.mxu0 %v3325_v23 }
 0xacc   : > { %v2954_v17 = vpop.f32.mrf.mxu1 }
 0xad4   : > { %v2923_v28 = vpop.f32.mrf.mxu0  ;;  %v2980_v12 = vpop.f32.mrf.mxu2 }
 0xad5   : > { %v2955_v15 = vadd.f32 %v2954_v17, %v2923_v28  ;;  %v3055_v38 = vpop.f32.mrf.mxu1  ;;  %v3331_v17 = vand.u32 4294901760, %v3330_v3 }
 0xad6   : > { %v3005_v16 = vpop.f32.mrf.mxu3 }
 0xad7   : > { %v2981_v22 = vadd.f32 %v2980_v12, %v2955_v15  ;;  %v3321_v12 = vand.u32 4294901760, %v3320_v7  ;;  %v3332_v15 = vsub.f32 %v3330_v3, %v3331_v17  ;;  %3439 = vmatpush.msra.mxu0 %v3331_v17  ;;  %v8396_v3 = vand.u32 4294901760, %v3485_v0 }
 0xad9   : > { %v3006_v21 = vadd.f32 %v3005_v16, %v2981_v22  ;;  %3322 = vmatpush.msrb.mxu1 %v3321_v12  ;;  %v3327_v16 = vand.u32 4294901760, %v3326_v20  ;;  %v3333_v22 = vand.u32 4294901760, %v3332_v15  ;;  %v8406_v23 = vsub.f32 %v3485_v0, %v8396_v3 }
 0xadb   : > { %3328 = vmatpush.msrb.mxu1 %v3327_v16  ;;  %v3562_v15 = vand.u32 4294901760, %v8406_v23 }
 0xadc   : > { %v3032_v24 = vpop.f32.mrf.mxu0  ;;  %v3085_v42 = vpop.f32.mrf.mxu2 }
 0xadd   : > { %v3033_v41 = vadd.f32 %v3032_v24, %v3006_v21  ;;  %v3167_v48 = vpop.f32.mrf.mxu1  ;;  %3334 = vmatpush.msrb.mxu1 %v3333_v22  ;;  %v8359_v24 = vld [vmem:[%s8034_s27] sm:$0xf] }
 0xade   : > { %v3116_v18 = vpop.f32.mrf.mxu3  ;;  %v2252_v14 = vperm.slane %v8359_v24, 0 }
 0xadf   : > { %v3056_v43 = vadd.f32 %v3055_v38, %v3033_v41  ;;  %3462 = vmatpush.msra.mxu1 %v3274_v8 }
 0xae1   : > { %v3086_v44 = vadd.f32 %v3085_v42, %v3056_v43  ;;  %3464 = vmatpush.msra.mxu1 %v3276_v11  ;;  %v8362_v42 = vld [vmem:[%s8039_s14] sm:$0xf] }
 0xae3   : > { %v3117_v33 = vadd.f32 %v3116_v18, %v3086_v44  ;;  %3466 = vmatpush.msra.mxu1 %v3278_v26  ;;  %v2254_v44 = vperm.slane %v8362_v42, 0  ;;  %v3487_v26 = vld [vmem:[%s7987_s3 + $0x38] sm:$0xff] }
 0xae4   : > { %v3142_v31 = vpop.f32.mrf.mxu0  ;;  %v3194_v52 = vpop.f32.mrf.mxu2  ;;  %v8380_v32 = vand.u32 4294901760, %v3487_v26 }
 0xae5   : > { %v3143_v47 = vadd.f32 %v3142_v31, %v3117_v33  ;;  %3468 = vmatpush.msra.mxu1 %v3280_v60  ;;  %v3486_v60 = vld [vmem:[%s7987_s3 + $0x30] sm:$0xff] }
 0xae6   : > { %v3217_v54 = vpop.f32.mrf.mxu3  ;;  %v8386_v62 = vand.u32 4294901760, %v3486_v60  ;;  %3508 = vmatpush.msra.mxu2 %v8380_v32 }
 0xae7   : > { %v3168_v49 = vadd.f32 %v3167_v48, %v3143_v47 }
 0xae8   : > { %3510 = vmatpush.msra.mxu2 %v8386_v62 }
 0xae9   : > { %v3195_v53 = vadd.f32 %v3194_v52, %v3168_v49 }
 0xaea   : > { %3512 = vmatpush.msra.mxu2 %v8396_v3 }
 0xaeb   : > { %v3218_v58 = vadd.f32 %v3217_v54, %v3195_v53 }
 0xaed   : > { %v3220_v6 = vadd.f32 %v7751_v55, %v3218_v58 }
 0xaef   : > { %v3221_v13 = vsel %vm1028_vm15, %v3220_v6, 0.0 }
 0xaf0   : > { %3222 = vadd.xlane.f32.xlu2 %v3221_v13 }
 0xaf8   : > { %2237 = vadd.xlane.f32.xlu2 %v2236_v9 }
 0xb63   : > { %v3223_v57 = vpop.xlane.xlu2 %3222 }
 0xb64   : > { %v3224_v59 = vmul.f32 %v3223_v57, %v8337_v50 }
 0xb66   : > { %v8350_v35 = vsub.f32 %v3220_v6, %v3224_v59 }
 0xb68   : > { %v3226_v40 = vmul.f32 %v8350_v35, %v8350_v35 }
 0xb6a   : > { %v3227_v61 = vsel %vm1028_vm15, %v3226_v40, 0.0 }
 0xb6b   : > { %3228 = vadd.xlane.f32.xlu1 %v3227_v61  ;;  %v2238_v2 = vpop.xlane.xlu2 %2237  ;;  %v8384_v61 = vsub.f32 %v3487_v26, %v8380_v32 }
 0xb6c   : > { %v2239_v4 = vmul.f32 %v2238_v2, %v8337_v50  ;;  %v8393_v2 = vsub.f32 %v3486_v60, %v8386_v62 }
 0xb6d   : > { %v3550_v37 = vand.u32 4294901760, %v8384_v61 }
 0xb6e   : > { %v2240_v28 = vadd.f32 1e-06, %v2239_v4  ;;  %v3484_v4 = vld [vmem:[%s7987_s3 + $0x20] sm:$0xff]  ;;  %v3556_v7 = vand.u32 4294901760, %v8393_v2 }
 0xb6f   : > { %v3551_v5 = vsub.f32 %v8384_v61, %v3550_v37  ;;  %v8409_v17 = vand.u32 4294901760, %v3484_v4 }
 0xb70   : > { %7719 = vrsqrt.f32 %v2240_v28  ;;  %vm2247_vm7 = vweird.f32 %v2240_v28  ;;  %v3557_v20 = vsub.f32 %v8393_v2, %v3556_v7 }
 0xb71   : > { %v3552_v12 = vand.u32 4294901760, %v3551_v5  ;;  %v3567_v16 = vsub.f32 %v3484_v4, %v8409_v17  ;;  %3514 = vmatpush.msra.mxu2 %v8409_v17 }
 0xb73   : > { %3553 = vmatpush.msra.mxu3 %v3552_v12 }
 0xb76   : > { %v7720_v27 = vpop.eup %7719 }
 0xb77   : > { %v2242_v21 = vmul.f32 %v7720_v27, %v2240_v28  ;;  %vm2248_vm6 = vweird.f32 %v7720_v27  ;;  %v3483_v28 = vld [vmem:[%s7987_s3 + $0x18] sm:$0xff] }
 0xb78   : > { %vm2249_vm8 = vmor %vm2247_vm7, %vm2248_vm6  ;;  %v8419_v22 = vand.u32 4294901760, %v3483_v28 }
 0xb79   : > { %v2243_v29 = vmul.f32 %v7720_v27, %v2242_v21  ;;  %v3558_v21 = vand.u32 4294901760, %v3557_v20 }
 0xb7a   : > { %3516 = vmatpush.msra.mxu2 %v8419_v22 }
 0xb7b   : > { %v2244_v38 = vmul.f32 0.5, %v2243_v29  ;;  %v3563_v29 = vsub.f32 %v8406_v23, %v3562_v15  ;;  %3559 = vmatpush.msra.mxu3 %v3558_v21 }
 0xb7d   : > { %v2245_v41 = vsub.f32 1.5, %v2244_v38  ;;  %v3568_v38 = vand.u32 4294901760, %v3567_v16 }
 0xb7f   : > { %v2246_v43 = vmul.f32 %v7720_v27, %v2245_v41 }
 0xb81   : > { %v2250_v18 = vsel %vm2249_vm8, %v7720_v27, %v2246_v43  ;;  %v3482_v27 = vld [vmem:[%s7987_s3 + $0x10] sm:$0xff]  ;;  %v3573_v43 = vsub.f32 %v3483_v28, %v8419_v22  ;;  %vm4400_vm8 = vcmask 60416  }
 0xb82   : > { %v2251_v33 = vmul.f32 %v2250_v18, %v8341_v10  ;;  %v3517_v41 = vand.u32 4294901760, %v3482_v27  ;;  %v3564_v18 = vand.u32 4294901760, %v3563_v29 }
 0xb84   : > { %v2253_v46 = vmul.f32 %v2252_v14, %v2251_v33  ;;  %v3579_v33 = vsub.f32 %v3482_v27, %v3517_v41  ;;  %3565 = vmatpush.msra.mxu3 %v3564_v18  ;;  %3518 = vmatpush.msra.mxu2 %v3517_v41 }
 0xb86   : > { %v2255_v31 = vadd.f32 %v2254_v44, %v2253_v46 }
 0xb88   : > { %2256 = vst.msk [vmem:[#allocation2] sm:$0xff] %vm1028_vm15, %v2255_v31  ;;  %v3574_v31 = vand.u32 4294901760, %v3573_v43 }
 0xb8f   : > { %v8368_v47 = vld [vmem:[#allocation2] sm:$0xff] }
 0xb90   : > { %v3257_v48 = vsel %vm1028_vm15, %v8368_v47, 0 }
 0xb91   : > { %v3282_v49 = vand.u32 4294901760, %v3257_v48 }
 0xb93   : > { %3336 = vmatmul.f32.vlgmr.msrb.gmra.mxu1 %v3282_v49  ;;  %v3283_v51 = vsub.f32 %v3257_v48, %v3282_v49  ;;  %v3480_v48 = vld [vmem:[%s7987_s3] sm:$0xff] }
 0xb94   : > { %3657 = vmatpush.msrb.mxu1 %v8380_v32 }
 0xb95   : > { %3370 = vmatmul.f32.vlgmr.msrb.gmra.mxu2 %v3283_v51  ;;  %v3284_v52 = vand.u32 4294901760, %v3283_v51 }
 0xb96   : > { %3659 = vmatpush.msrb.mxu1 %v8386_v62 }
 0xb97   : > { %3402 = vmatmul.f32.vlgmr.msrb.gmra.mxu3 %v3284_v52  ;;  %v3285_v53 = vsub.f32 %v3283_v51, %v3284_v52  ;;  %v3580_v51 = vand.u32 4294901760, %v3579_v33 }
 0xb98   : > { %3661 = vmatpush.msrb.mxu1 %v8396_v3 }
 0xb99   : > { %v3286_v54 = vand.u32 4294901760, %v3285_v53  ;;  %v3521_v53 = vand.u32 4294901760, %v3480_v48 }
 0xb9a   : > { %3663 = vmatpush.msrb.mxu1 %v8409_v17 }
 0xb9b   : > { %3287 = vmatmul.f32.vlgmr.msrb.gmra.mxu0 %v3286_v54  ;;  %v3575_v54 = vsub.f32 %v3573_v43, %v3574_v31 }
 0xb9c   : > { %3615 = vmatpush.msrb.mxu0 %v8384_v61  ;;  %3665 = vmatpush.msrb.mxu1 %v8419_v22 }
 0xb9e   : > { %3618 = vmatpush.msrb.mxu0 %v8393_v2  ;;  %3667 = vmatpush.msrb.mxu1 %v3517_v41 }
 0xba0   : > { %3621 = vmatpush.msrb.mxu0 %v8406_v23 }
 0xba2   : > { %3624 = vmatpush.msrb.mxu0 %v3567_v16 }
 0xba4   : > { %3627 = vmatpush.msrb.mxu0 %v3573_v43 }
 0xba6   : > { %3630 = vmatpush.msrb.mxu0 %v3579_v33 }
 0xbde   : > { %v3229_v34 = vpop.xlane.xlu1 %3228 }
 0xbdf   : > { %v3230_v58 = vmul.f32 %v3229_v34, %v8337_v50  ;;  %v3581_v34 = vsub.f32 %v3579_v33, %v3580_v51 }
 0xbe1   : > { %v3231_v55 = vadd.f32 1e-06, %v3230_v58 }
 0xbe3   : > { %7721 = vrsqrt.f32 %v3231_v55  ;;  %vm3238_vm10 = vweird.f32 %v3231_v55 }
 0xbe9   : > { %v7722_v6 = vpop.eup %7721 }
 0xbea   : > { %v3233_v10 = vmul.f32 %v7722_v6, %v3231_v55  ;;  %vm3239_vm9 = vweird.f32 %v7722_v6  ;;  %v3591_v55 = vsub.f32 %v3480_v48, %v3521_v53 }
 0xbeb   : > { %vm3240_vm11 = vmor %vm3238_vm10, %vm3239_vm9 }
 0xbec   : > { %v3234_v13 = vmul.f32 %v7722_v6, %v3233_v10  ;;  %v3582_v10 = vand.u32 4294901760, %v3581_v34 }
 0xbee   : > { %v3235_v56 = vmul.f32 0.5, %v3234_v13 }
 0xbf0   : > { %v3236_v9 = vsub.f32 1.5, %v3235_v56  ;;  %v3592_v56 = vand.u32 4294901760, %v3591_v55 }
 0xbf2   : > { %v3237_v57 = vmul.f32 %v7722_v6, %v3236_v9 }
 0xbf4   : > { %v3241_v36 = vsel %vm3240_vm11, %v7722_v6, %v3237_v57  ;;  %v3576_v6 = vand.u32 4294901760, %v3575_v54  ;;  %v3593_v57 = vsub.f32 %v3591_v55, %v3592_v56 }
 0xbf5   : > { %v3242_v59 = vmul.f32 %v3241_v36, %v8350_v35 }
 0xbf6   : > { %v3594_v36 = vand.u32 4294901760, %v3593_v57 }
 0xbf7   : > { %v3243_v8 = vmul.f32 %v3242_v59, %v2252_v14  ;;  %v3481_v14 = vld [vmem:[%s7987_s3 + $0x8] sm:$0xff]  ;;  %s9098_s3 = scalar_lea.vmem %s9038_s8, %s7961_s26  ;;  %s7834_s26 = smov [#allocation4]  }
 0xbf8   : > { %v3519_v46 = vand.u32 4294901760, %v3481_v14 }
 0xbf9   : > { %v3244_v63 = vadd.f32 %v3243_v8, %v2254_v44  ;;  %v3569_v44 = vsub.f32 %v3567_v16, %v3568_v38  ;;  %v7695_v8 = vld [vmem:[%s9098_s3] ss:$0 sm:$0xff] }
 0xbfa   : > { %v3585_v52 = vsub.f32 %v3481_v14, %v3519_v46  ;;  %3669 = vmatpush.msrb.mxu1 %v3519_v46  ;;  %3520 = vmatpush.msra.mxu2 %v3519_v46 }
 0xbfb   : > { %3245 = vst.msk [vmem:[#allocation2 + $0x8] sm:$0xff] %vm1028_vm15, %v3244_v63 }
 0xbfc   : > { %v3586_v58 = vand.u32 4294901760, %v3585_v52  ;;  %3633 = vmatpush.msrb.mxu0 %v3585_v52  ;;  %3671 = vmatpush.msrb.mxu1 %v3521_v53 }
 0xbfd   : > { %3522 = vmatpush.msra.mxu2 %v3521_v53 }
 0xbfe   : > { %v3587_v13 = vsub.f32 %v3585_v52, %v3586_v58  ;;  %3636 = vmatpush.msrb.mxu0 %v3591_v55 }
 0xbff   : > { %3696 = vmatpush.msrb.mxu2 %v3550_v37 }
 0xc00   : > { %v3588_v9 = vand.u32 4294901760, %v3587_v13 }
 0xc01   : > { %3700 = vmatpush.msrb.mxu2 %v3556_v7 }
 0xc02   : > { %v8375_v19 = vld [vmem:[#allocation2 + $0x8] sm:$0xff] }
 0xc03   : > { %v3260_v11 = vsel %vm1028_vm15, %v8375_v19, 0  ;;  %3704 = vmatpush.msrb.mxu2 %v3562_v15 }
 0xc04   : > { %v3290_v39 = vand.u32 4294901760, %v3260_v11 }
 0xc05   : > { %3708 = vmatpush.msrb.mxu2 %v3568_v38 }
 0xc06   : > { %3340 = vmatmul.f32.gmra.mxu1 %v3290_v39  ;;  %v3291_v40 = vsub.f32 %v3260_v11, %v3290_v39 }
 0xc07   : > { %3712 = vmatpush.msrb.mxu2 %v3574_v31  ;;  %v7696_v31 = vld [vmem:[%s9099_s20] ss:$0 sm:$0xff] }
 0xc08   : > { %3375 = vmatmul.f32.gmra.mxu2 %v3291_v40  ;;  %v3292_v1 = vand.u32 4294901760, %v3291_v40 }
 0xc09   : > { %3716 = vmatpush.msrb.mxu2 %v3580_v51 }
 0xc0a   : > { %3408 = vmatmul.f32.gmra.mxu3 %v3292_v1  ;;  %v3293_v25 = vsub.f32 %v3291_v40, %v3292_v1 }
 0xc0b   : > { %3720 = vmatpush.msrb.mxu2 %v3586_v58 }
 0xc0c   : > { %v3294_v35 = vand.u32 4294901760, %v3293_v25 }
 0xc0d   : > { %3724 = vmatpush.msrb.mxu2 %v3592_v56 }
 0xc0e   : > { %3295 = vmatmul.f32.gmra.mxu0 %v3294_v35  ;;  %3470 = vmatmul.f32.vlgmr.msra.gmra.mxu1 %v3282_v49 }
 0xc10   : > { %v3337_v59 = vpop.f32.mrf.mxu1 }
 0xc16   : > { %3441 = vmatmul.f32.vlgmr.msra.gmra.mxu0 %v3282_v49  ;;  %3474 = vmatmul.f32.gmra.mxu1 %v3290_v39  ;;  %v3570_v49 = vand.u32 4294901760, %v3569_v44 }
 0xc18   : > { %3571 = vmatpush.msra.mxu3 %v3570_v49  ;;  %v3288_v63 = vpop.f32.mrf.mxu0  ;;  %v3371_v25 = vpop.f32.mrf.mxu2 }
 0xc19   : > { %v3289_v11 = vadd.f32 %v7695_v8, %v3288_v63 }
 0xc1a   : > { %3577 = vmatpush.msra.mxu3 %v3576_v6 }
 0xc1b   : > { %v3338_v40 = vadd.f32 %v3337_v59, %v3289_v11 }
 0xc1c   : > { %3583 = vmatpush.msra.mxu3 %v3582_v10 }
 0xc1d   : > { %v3372_v35 = vadd.f32 %v3371_v25, %v3338_v40 }
 0xc1e   : > { %3445 = vmatmul.f32.gmra.mxu0 %v3290_v39  ;;  %3589 = vmatpush.msra.mxu3 %v3588_v9 }
 0xc20   : > { %3595 = vmatpush.msra.mxu3 %v3594_v36 }
 0xc22   : > { %3743 = vmatpush.msrb.mxu3 %v8380_v32  ;;  %v3403_v32 = vpop.f32.mrf.mxu3 }
 0xc23   : > { %v3404_v60 = vadd.f32 %v3403_v32, %v3372_v35 }
 0xc24   : > { %3745 = vmatpush.msrb.mxu3 %v8386_v62 }
 0xc26   : > { %3747 = vmatpush.msrb.mxu3 %v8396_v3 }
 0xc28   : > { %3749 = vmatpush.msrb.mxu3 %v8409_v17 }
 0xc2a   : > { %3751 = vmatpush.msrb.mxu3 %v8419_v22 }
 0xc2c   : > { %3753 = vmatpush.msrb.mxu3 %v3517_v41 }
 0xc2e   : > { %3755 = vmatpush.msrb.mxu3 %v3519_v46 }
 0xc30   : > { %3757 = vmatpush.msrb.mxu3 %v3521_v53 }
 0xc83   : > { %v3341_v39 = vpop.f32.mrf.mxu1 }
 0xc8b   : > { %v3296_v1 = vpop.f32.mrf.mxu0  ;;  %v3471_v62 = vpop.f32.mrf.mxu1 }
 0xc8c   : > { %v3297_v26 = vadd.f32 %v7695_v8, %v3296_v1  ;;  %v3376_v2 = vpop.f32.mrf.mxu2 }
 0xc8d   : > { %v3409_v7 = vpop.f32.mrf.mxu3 }
 0xc8e   : > { %v3342_v61 = vadd.f32 %v3341_v39, %v3297_v26 }
 0xc90   : > { %v3377_v3 = vadd.f32 %v3376_v2, %v3342_v61 }
 0xc92   : > { %v3410_v23 = vadd.f32 %v3409_v7, %v3377_v3 }
 0xc93   : > { %v3442_v0 = vpop.f32.mrf.mxu0  ;;  %v3475_v16 = vpop.f32.mrf.mxu1 }
 0xc94   : > { %v3443_v37 = vadd.f32 %v3442_v0, %v3404_v60 }
 0xc96   : > { %v3472_v4 = vadd.f32 %v3471_v62, %v3443_v37 }
 0xc98   : > { %v3478_v5 = vmax.f32 %v3472_v4, 0.0 }
 0xc9a   : > { %v3494_v17 = vsel %vm3492_vm12, %v3478_v5, 0  ;;  %v3826_v5 = vld [vmem:[%s8001_s2 + $0x18] sm:$0xff] }
 0xc9b   : > { %v3523_v28 = vand.u32 4294901760, %v3494_v17  ;;  %v3446_v12 = vpop.f32.mrf.mxu0  ;;  %v3845_v7 = vand.u32 4294901760, %v3826_v5 }
 0xc9c   : > { %v3447_v20 = vadd.f32 %v3446_v12, %v3410_v23  ;;  %v3825_v23 = vld [vmem:[%s8001_s2 + $0x10] sm:$0xff]  ;;  %v3824_v12 = vld [vmem:[%s8001_s2 + $0x8] sm:$0xff] }
 0xc9d   : > { %v3524_v15 = vsub.f32 %v3494_v17, %v3523_v28  ;;  %3597 = vmatmul.f32.vlgmr.msra.gmra.mxu3 %v3523_v28  ;;  %v3883_v17 = vsub.f32 %v3826_v5, %v3845_v7  ;;  %3846 = vmatpush.msra.mxu0 %v3845_v7 }
 0xc9e   : > { %v3476_v22 = vadd.f32 %v3475_v16, %v3447_v20  ;;  %3963 = vmatpush.msra.mxu3 %v3845_v7  ;;  %v3849_v16 = vand.u32 4294901760, %v3824_v12 }
 0xc9f   : > { %v3525_v27 = vand.u32 4294901760, %v3524_v15  ;;  %3639 = vmatmul.f32.vlgmr.msrb.gmra.mxu0 %v3524_v15  ;;  %v3884_v20 = vand.u32 4294901760, %v3883_v17 }
 0xca0   : > { %v3479_v21 = vmax.f32 %v3476_v22, 0.0  ;;  %v3823_v22 = vld [vmem:[%s8001_s2] sm:$0xff] }
 0xca1   : > { %v3526_v29 = vsub.f32 %v3524_v15, %v3525_v27  ;;  %3675 = vmatmul.f32.vlgmr.msrb.gmra.mxu1 %v3525_v27  ;;  %v3885_v27 = vsub.f32 %v3883_v17, %v3884_v20 }
 0xca2   : > { %v3497_v38 = vsel %vm3492_vm12, %v3479_v21, 0 }
 0xca3   : > { %v3531_v41 = vand.u32 4294901760, %v3497_v38  ;;  %v3527_v43 = vand.u32 4294901760, %v3526_v29  ;;  %v3895_v29 = vsub.f32 %v3824_v12, %v3849_v16 }
 0xca5   : > { %3528 = vmatmul.f32.vlgmr.msra.gmra.mxu2 %v3527_v43  ;;  %3601 = vmatmul.f32.gmra.mxu3 %v3531_v41  ;;  %v3532_v14 = vsub.f32 %v3497_v38, %v3531_v41  ;;  %v3851_v38 = vand.u32 4294901760, %v3823_v22 }
 0xca6   : > { %3929 = vmatpush.msra.mxu2 %v3883_v17 }
 0xca7   : > { %3644 = vmatmul.f32.gmra.mxu0 %v3532_v14  ;;  %v3533_v18 = vand.u32 4294901760, %v3532_v14 }
 0xca9   : > { %3681 = vmatmul.f32.gmra.mxu1 %v3533_v18  ;;  %v3534_v44 = vsub.f32 %v3532_v14, %v3533_v18  ;;  %v3896_v14 = vand.u32 4294901760, %v3895_v29  ;;  %v3901_v18 = vsub.f32 %v3823_v22, %v3851_v38 }
 0xcab   : > { %v3535_v33 = vand.u32 4294901760, %v3534_v44 }
 0xcad   : > { %3536 = vmatmul.f32.gmra.mxu2 %v3535_v33  ;;  %3759 = vmatmul.f32.vlgmr.msrb.gmra.mxu3 %v3523_v28  ;;  %v3897_v33 = vsub.f32 %v3895_v29, %v3896_v14 }
 0xcb5   : > { %3726 = vmatmul.f32.vlgmr.msrb.gmra.mxu2 %v3523_v28  ;;  %3763 = vmatmul.f32.gmra.mxu3 %v3531_v41  ;;  %v3847_v28 = vand.u32 4294901760, %v3825_v23 }
 0xcb7   : > { %v3889_v15 = vsub.f32 %v3825_v23, %v3847_v28  ;;  %3965 = vmatpush.msra.mxu3 %v3847_v28  ;;  %3848 = vmatpush.msra.mxu0 %v3847_v28 }
 0xcb9   : > { %v3890_v21 = vand.u32 4294901760, %v3889_v15  ;;  %3932 = vmatpush.msra.mxu2 %v3889_v15  ;;  %3967 = vmatpush.msra.mxu3 %v3849_v16 }
 0xcba   : > { %3850 = vmatpush.msra.mxu0 %v3849_v16 }
 0xcbb   : > { %v3891_v43 = vsub.f32 %v3889_v15, %v3890_v21  ;;  %3935 = vmatpush.msra.mxu2 %v3895_v29  ;;  %3969 = vmatpush.msra.mxu3 %v3851_v38 }
 0xcbc   : > { %3852 = vmatpush.msra.mxu0 %v3851_v38 }
 0xcbd   : > { %3730 = vmatmul.f32.gmra.mxu2 %v3531_v41  ;;  %v3886_v41 = vand.u32 4294901760, %v3885_v27  ;;  %v3892_v44 = vand.u32 4294901760, %v3891_v43 }
 0xcbe   : > { %3938 = vmatpush.msra.mxu2 %v3901_v18  ;;  %3998 = vmatpush.msrb.mxu0 %v3884_v20 }
 0xcbf   : > { %3887 = vmatpush.msra.mxu1 %v3886_v41 }
 0xcc0   : > { %4002 = vmatpush.msrb.mxu0 %v3890_v21  ;;  %v8517_v21 = vld [vmem:[#allocation3] sm:$0xf] }
 0xcc1   : > { %3893 = vmatpush.msra.mxu1 %v3892_v44  ;;  %v4059_v43 = vsel %vm1028_vm15, %v8517_v21, 0 }
 0xcc2   : > { %4006 = vmatpush.msrb.mxu0 %v3896_v14 }
 0xd1c   : > { %v3640_v53 = vpop.f32.mrf.mxu0 }
 0xd1e   : > { %v3676_v55 = vpop.f32.mrf.mxu1 }
 0xd20   : > { %v3598_v46 = vpop.f32.mrf.mxu3 }
 0xd24   : > { %v3645_v57 = vpop.f32.mrf.mxu0 }
 0xd26   : > { %v3682_v63 = vpop.f32.mrf.mxu1 }
 0xd28   : > { %v3529_v48 = vpop.f32.mrf.mxu2  ;;  %v3602_v51 = vpop.f32.mrf.mxu3 }
 0xd29   : > { %v3530_v49 = vadd.f32 %v7696_v31, %v3529_v48 }
 0xd2b   : > { %v3599_v52 = vadd.f32 %v3598_v46, %v3530_v49  ;;  %v3902_v46 = vand.u32 4294901760, %v3901_v18 }
 0xd2d   : > { %v3641_v58 = vadd.f32 %v3640_v53, %v3599_v52  ;;  %v3903_v48 = vsub.f32 %v3901_v18, %v3902_v46  ;;  %4010 = vmatpush.msrb.mxu0 %v3902_v46  ;;  %v4081_v18 = vand.u32 4294901760, %v4059_v43 }
 0xd2f   : > { %v3677_v10 = vadd.f32 %v3676_v55, %v3641_v58  ;;  %v3904_v49 = vand.u32 4294901760, %v3903_v48  ;;  %v4056_v58 = vld [vmem:[%s7996_s22 + $0x10] sm:$0xff]  ;;  %v4082_v48 = vsub.f32 %v4059_v43, %v4081_v18 }
 0xd30   : > { %v3537_v54 = vpop.f32.mrf.mxu2  ;;  %v3760_v13 = vpop.f32.mrf.mxu3 }
 0xd31   : > { %v3538_v34 = vadd.f32 %v7696_v31, %v3537_v54  ;;  %v3898_v31 = vand.u32 4294901760, %v3897_v33  ;;  %v4057_v54 = vld [vmem:[%s7996_s22 + $0x18] sm:$0xff] }
 0xd33   : > { %v3603_v6 = vadd.f32 %v3602_v51, %v3538_v34  ;;  %3899 = vmatpush.msra.mxu1 %v3898_v31  ;;  %v8470_v34 = vand.u32 4294901760, %v4057_v54 }
 0xd35   : > { %v3646_v59 = vadd.f32 %v3645_v57, %v3603_v6  ;;  %3905 = vmatpush.msra.mxu1 %v3904_v49  ;;  %4074 = vmatpush.msrb.mxu2 %v8470_v34  ;;  %v8475_v55 = vsub.f32 %v4057_v54, %v8470_v34  ;;  %v8477_v6 = vand.u32 4294901760, %v4056_v58  ;;  %v4083_v54 = vand.u32 4294901760, %v4082_v48 }
 0xd37   : > { %v3683_v11 = vadd.f32 %v3682_v63, %v3646_v59  ;;  %4033 = vmatpush.msrb.mxu1 %v3845_v7  ;;  %4076 = vmatpush.msrb.mxu2 %v8477_v6  ;;  %v4054_v59 = vld [vmem:[%s7996_s22] sm:$0xff] }
 0xd38   : > { %v3727_v56 = vpop.f32.mrf.mxu2  ;;  %v3764_v25 = vpop.f32.mrf.mxu3 }
 0xd39   : > { %v3728_v9 = vadd.f32 %v3727_v56, %v3677_v10  ;;  %4035 = vmatpush.msrb.mxu1 %v3847_v28  ;;  %v3813_v28 = vperm.slane %v8359_v24, 1 }
 0xd3b   : > { %v3761_v36 = vadd.f32 %v3760_v13, %v3728_v9  ;;  %4037 = vmatpush.msrb.mxu1 %v3849_v16  ;;  %v4055_v13 = vld [vmem:[%s7996_s22 + $0x8] sm:$0xff]  ;;  %v4104_v9 = vand.u32 4294901760, %v8475_v55  ;;  %v3816_v16 = vperm.slane %v8362_v42, 1 }
 0xd3c   : > { %v8483_v57 = vand.u32 4294901760, %v4055_v13 }
 0xd3d   : > { %v3767_v8 = vadd.f32 %v3761_v36, %v8368_v47  ;;  %4039 = vmatpush.msrb.mxu1 %v3851_v38  ;;  %v8486_v36 = vsub.f32 %v4056_v58, %v8477_v6 }
 0xd3e   : > { %4078 = vmatpush.msrb.mxu2 %v8483_v57 }
 0xd3f   : > { %v3769_v39 = vsel %vm1028_vm15, %v3767_v8, 0.0 }
 0xd40   : > { %v3731_v40 = vpop.f32.mrf.mxu2  ;;  %3770 = vadd.xlane.f32.xlu2 %v3769_v39  ;;  %v4110_v39 = vand.u32 4294901760, %v8486_v36 }
 0xd41   : > { %v3732_v1 = vadd.f32 %v3731_v40, %v3683_v11  ;;  %v4105_v11 = vsub.f32 %v8475_v55, %v4104_v9  ;;  %v8494_v40 = vand.u32 4294901760, %v4054_v59 }
 0xd43   : > { %v3765_v35 = vadd.f32 %v3764_v25, %v3732_v1  ;;  %v8497_v25 = vsub.f32 %v4055_v13, %v8483_v57  ;;  %4080 = vmatpush.msrb.mxu2 %v8494_v40 }
 0xd45   : > { %v3768_v26 = vadd.f32 %v3765_v35, %v8375_v19  ;;  %v4106_v35 = vand.u32 4294901760, %v4105_v11 }
 0xd47   : > { %v3772_v32 = vsel %vm1028_vm15, %v3768_v26, 0.0  ;;  %4107 = vmatpush.msrb.mxu3 %v4106_v35 }
 0xd48   : > { %3773 = vadd.xlane.f32.xlu1 %v3772_v32 }
 0xdb3   : > { %v3771_v60 = vpop.xlane.xlu2 %3770 }
 0xdb4   : > { %v3775_v61 = vmul.f32 %v3771_v60, %v8337_v50  ;;  %v4116_v60 = vand.u32 4294901760, %v8497_v25 }
 0xdb6   : > { %v8453_v47 = vsub.f32 %v3767_v8, %v3775_v61  ;;  %v8505_v61 = vsub.f32 %v4054_v59, %v8494_v40 }
 0xdb8   : > { %v3779_v62 = vmul.f32 %v8453_v47, %v8453_v47 }
 0xdba   : > { %v3781_v0 = vsel %vm1028_vm15, %v3779_v62, 0.0 }
 0xdbb   : > { %v3774_v37 = vpop.xlane.xlu1 %3773  ;;  %3782 = vadd.xlane.f32.xlu2 %v3781_v0 }
 0xdbc   : > { %v3776_v2 = vmul.f32 %v3774_v37, %v8337_v50  ;;  %v4117_v37 = vsub.f32 %v8497_v25, %v4116_v60 }
 0xdbe   : > { %v8459_v19 = vsub.f32 %v3768_v26, %v3776_v2  ;;  %v4111_v26 = vsub.f32 %v8486_v36, %v4110_v39  ;;  %v4122_v2 = vand.u32 4294901760, %v8505_v61 }
 0xdc0   : > { %v3780_v3 = vmul.f32 %v8459_v19, %v8459_v19  ;;  %v4112_v62 = vand.u32 4294901760, %v4111_v26  ;;  %v4123_v5 = vsub.f32 %v8505_v61, %v4122_v2 }
 0xdc2   : > { %v3784_v4 = vsel %vm1028_vm15, %v3780_v3, 0.0  ;;  %4113 = vmatpush.msrb.mxu3 %v4112_v62  ;;  %v4124_v12 = vand.u32 4294901760, %v4123_v5 }
 0xdc3   : > { %3785 = vadd.xlane.f32.xlu1 %v3784_v4  ;;  %v4118_v4 = vand.u32 4294901760, %v4117_v37 }
 0xdc5   : > { %4119 = vmatpush.msrb.mxu3 %v4118_v4 }
 0xdc7   : > { %4125 = vmatpush.msrb.mxu3 %v4124_v12 }
 0xe2e   : > { %v3783_v51 = vpop.xlane.xlu2 %3782 }
 0xe2f   : > { %v3787_v52 = vmul.f32 %v3783_v51, %v8337_v50 }
 0xe31   : > { %v3789_v53 = vadd.f32 1e-06, %v3787_v52 }
 0xe33   : > { %7723 = vrsqrt.f32 %v3789_v53  ;;  %vm3797_vm14 = vweird.f32 %v3789_v53 }
 0xe36   : > { %v3786_v10 = vpop.xlane.xlu1 %3785 }
 0xe37   : > { %v3788_v56 = vmul.f32 %v3786_v10, %v8337_v50  ;;  %v4084_v10 = vsub.f32 %v4082_v48, %v4083_v54 }
 0xe39   : > { %v7724_v8 = vpop.eup %7723  ;;  %v3790_v63 = vadd.f32 1e-06, %v3788_v56  ;;  %v4085_v56 = vand.u32 4294901760, %v4084_v10 }
 0xe3a   : > { %v3792_v1 = vmul.f32 %v7724_v8, %v3789_v53  ;;  %vm3798_vm13 = vweird.f32 %v7724_v8 }
 0xe3b   : > { %7725 = vrsqrt.f32 %v3790_v63  ;;  %vm3799_vm1 = vmor %vm3797_vm14, %vm3798_vm13  ;;  %vm3807_vm6 = vweird.f32 %v3790_v63 }
 0xe3c   : > { %v3793_v32 = vmul.f32 %v7724_v8, %v3792_v1 }
 0xe3e   : > { %v3794_v0 = vmul.f32 0.5, %v3793_v32 }
 0xe40   : > { %v3795_v3 = vsub.f32 1.5, %v3794_v0 }
 0xe41   : > { %v7726_v7 = vpop.eup %7725 }
 0xe42   : > { %v3796_v23 = vmul.f32 %v7724_v8, %v3795_v3  ;;  %v3802_v17 = vmul.f32 %v7726_v7, %v3790_v63  ;;  %vm3808_vm5 = vweird.f32 %v7726_v7 }
 0xe43   : > { %vm3809_vm7 = vmor %vm3807_vm6, %vm3808_vm5 }
 0xe44   : > { %v3800_v20 = vsel %vm3799_vm1, %v7724_v8, %v3796_v23  ;;  %v3803_v15 = vmul.f32 %v7726_v7, %v3802_v17 }
 0xe45   : > { %v3811_v22 = vmul.f32 %v3800_v20, %v8453_v47 }
 0xe46   : > { %v3804_v27 = vmul.f32 0.5, %v3803_v15 }
 0xe47   : > { %v3814_v29 = vmul.f32 %v3813_v28, %v3811_v22 }
 0xe48   : > { %v3805_v38 = vsub.f32 1.5, %v3804_v27 }
 0xe49   : > { %v3817_v41 = vadd.f32 %v3816_v16, %v3814_v29 }
 0xe4a   : > { %v3806_v24 = vmul.f32 %v7726_v7, %v3805_v38 }
 0xe4b   : > { %3819 = vst.msk [vmem:[#allocation2] sm:$0xff] %vm1028_vm15, %v3817_v41  ;;  %v3828_v42 = vsel %vm1028_vm15, %v3817_v41, 0 }
 0xe4c   : > { %3821 = vst.msk [vmem:[#allocation4] sm:$0xff] %vm1028_vm15, %v3817_v41  ;;  %v3810_v47 = vsel %vm3809_vm7, %v7726_v7, %v3806_v24  ;;  %v3853_v14 = vand.u32 4294901760, %v3828_v42 }
 0xe4d   : > { %v3812_v44 = vmul.f32 %v3810_v47, %v8459_v19 }
 0xe4e   : > { %3907 = vmatmul.f32.vlgmr.msra.gmra.mxu1 %v3853_v14  ;;  %v3854_v33 = vsub.f32 %v3828_v42, %v3853_v14 }
 0xe4f   : > { %v3815_v46 = vmul.f32 %v3813_v28, %v3812_v44  ;;  %4234 = vmatpush.msra.mxu1 %v8470_v34 }
 0xe50   : > { %3941 = vmatmul.f32.vlgmr.msra.gmra.mxu2 %v3854_v33  ;;  %v3855_v31 = vand.u32 4294901760, %v3854_v33 }
 0xe51   : > { %v3818_v49 = vadd.f32 %v3816_v16, %v3815_v46  ;;  %4145 = vmatpush.msra.mxu2 %v8475_v55  ;;  %4236 = vmatpush.msra.mxu1 %v8477_v6 }
 0xe52   : > { %3973 = vmatmul.f32.vlgmr.msra.gmra.mxu3 %v3855_v31  ;;  %v3856_v51 = vsub.f32 %v3854_v33, %v3855_v31 }
 0xe53   : > { %3820 = vst.msk [vmem:[#allocation2 + $0x8] sm:$0xff] %vm1028_vm15, %v3818_v49  ;;  %v3831_v52 = vsel %vm1028_vm15, %v3818_v49, 0  ;;  %4148 = vmatpush.msra.mxu2 %v8486_v36  ;;  %4174 = vmatpush.msra.mxu3 %v8470_v34 }
 0xe54   : > { %v3857_v19 = vand.u32 4294901760, %v3856_v51  ;;  %v3861_v53 = vand.u32 4294901760, %v3831_v52  ;;  %3822 = vst.msk [vmem:[#allocation4 + $0x8] sm:$0xff] %vm1028_vm15, %v3818_v49  ;;  %4238 = vmatpush.msra.mxu1 %v8483_v57 }
 0xe55   : > { %4151 = vmatpush.msra.mxu2 %v8497_v25  ;;  %4176 = vmatpush.msra.mxu3 %v8477_v6 }
 0xe56   : > { %3858 = vmatmul.f32.vlgmr.msra.gmra.mxu0 %v3857_v19  ;;  %3911 = vmatmul.f32.gmra.mxu1 %v3861_v53  ;;  %v3862_v58 = vsub.f32 %v3831_v52, %v3861_v53 }
 0xe57   : > { %4154 = vmatpush.msra.mxu2 %v8505_v61  ;;  %4178 = vmatpush.msra.mxu3 %v8483_v57 }
 0xe58   : > { %3946 = vmatmul.f32.gmra.mxu2 %v3862_v58  ;;  %v3863_v34 = vand.u32 4294901760, %v3862_v58  ;;  %4203 = vmatpush.msra.mxu0 %v4104_v9 }
 0xe59   : > { %4180 = vmatpush.msra.mxu3 %v8494_v40  ;;  %4240 = vmatpush.msra.mxu1 %v8494_v40 }
 0xe5a   : > { %3979 = vmatmul.f32.gmra.mxu3 %v3863_v34  ;;  %v3864_v13 = vsub.f32 %v3862_v58, %v3863_v34  ;;  %4207 = vmatpush.msra.mxu0 %v4110_v39 }
 0xe5c   : > { %v3865_v6 = vand.u32 4294901760, %v3864_v13  ;;  %4211 = vmatpush.msra.mxu0 %v4116_v60 }
 0xe5e   : > { %3866 = vmatmul.f32.gmra.mxu0 %v3865_v6  ;;  %4041 = vmatmul.f32.vlgmr.msrb.gmra.mxu1 %v3853_v14 }
 0xe5f   : > { %4215 = vmatpush.msra.mxu0 %v4122_v2 }
 0xe60   : > { %4086 = vmatmul.f32.vlgmr.msrb.gmra.mxu2 %v4085_v56 }
 0xe62   : > { %4127 = vmatmul.f32.vlgmr.msrb.gmra.mxu3 %v4081_v18 }
 0xe66   : > { %4012 = vmatmul.f32.vlgmr.msrb.gmra.mxu0 %v3853_v14  ;;  %4045 = vmatmul.f32.gmra.mxu1 %v3861_v53 }
 0xe68   : > { %4157 = vmatmul.f32.vlgmr.msra.gmra.mxu2 %v4082_v48 }
 0xe6a   : > { %4184 = vmatmul.f32.vlgmr.msra.gmra.mxu3 %v4083_v54 }
 0xe6e   : > { %4016 = vmatmul.f32.gmra.mxu0 %v3861_v53  ;;  %4242 = vmatmul.f32.vlgmr.msra.gmra.mxu1 %v4081_v18 }
 0xe76   : > { %4217 = vmatmul.f32.vlgmr.msra.gmra.mxu0 %v4081_v18 }
 0xecb   : > { %v3908_v55 = vpop.f32.mrf.mxu1 }
 0xed3   : > { %v3859_v9 = vpop.f32.mrf.mxu0  ;;  %v3942_v57 = vpop.f32.mrf.mxu2 }
 0xed4   : > { %v8548_v59 = vpop.f32.mrf.mxu1  ;;  %v3909_v8 = vadd.f32 %v3908_v55, %v3859_v9 }
 0xed5   : > { %v3974_v36 = vpop.f32.mrf.mxu3 }
 0xed6   : > { %v3943_v40 = vadd.f32 %v3942_v57, %v3909_v8 }
 0xed8   : > { %v3975_v25 = vadd.f32 %v3974_v36, %v3943_v40 }
 0xedb   : > { %v8550_v63 = vpop.f32.mrf.mxu0  ;;  %v8552_v11 = vpop.f32.mrf.mxu2 }
 0xedc   : > { %v4042_v1 = vpop.f32.mrf.mxu1 }
 0xedd   : > { %v8554_v39 = vpop.f32.mrf.mxu3 }
 0xee3   : > { %v4013_v35 = vpop.f32.mrf.mxu0  ;;  %v4087_v32 = vpop.f32.mrf.mxu2 }
 0xee4   : > { %v4014_v26 = vadd.f32 %v4013_v35, %v3975_v25  ;;  %v8562_v37 = vpop.f32.mrf.mxu1 }
 0xee5   : > { %v4128_v60 = vpop.f32.mrf.mxu3 }
 0xee6   : > { %v8556_v61 = vadd.f32 %v4042_v1, %v4014_v26  ;;  %v4129_v4 = vadd.f32 %v4128_v60, %v4087_v32 }
 0xee8   : > { %4412 = vrot.lane.b32.xlu1 %v8556_v61, %s7828_s23  ;;  %v4250_v62 = vsel %vm1258_vm0, %v8556_v61, 0 }
 0xee9   : > { %v4267_v0 = vand.u32 4294901760, %v4250_v62 }
 0xeeb   : > { %v8564_v2 = vpop.f32.mrf.mxu0  ;;  %4268 = vmatpush.xpose.msrb.mxu2 %v4267_v0  ;;  %4344 = vmatpush.xpose.msrb.mxu1 %v4267_v0  ;;  %v4294_v3 = vsub.f32 %v4250_v62, %v4267_v0  ;;  %v4158_v5 = vpop.f32.mrf.mxu2 }
 0xeec   : > { %v4159_v23 = vadd.f32 %v4158_v5, %v4129_v4  ;;  %v4243_v16 = vpop.f32.mrf.mxu1 }
 0xeed   : > { %4321 = vmatpush.xpose.msrb.mxu0 %v4294_v3  ;;  %v4295_v7 = vand.u32 4294901760, %v4294_v3  ;;  %v4185_v17 = vpop.f32.mrf.mxu3 }
 0xeee   : > { %v4186_v20 = vadd.f32 %v4185_v17, %v4159_v23 }
 0xeef   : > { %4370 = vmatpush.xpose.msra.mxu2 %v4295_v7  ;;  %v4296_v28 = vsub.f32 %v4294_v3, %v4295_v7 }
 0xef1   : > { %v4297_v12 = vand.u32 4294901760, %v4296_v28 }
 0xef3   : > { %v4218_v15 = vpop.f32.mrf.mxu0  ;;  %4298 = vmatpush.xpose.msrb.mxu3 %v4297_v12 }
 0xef4   : > { %v4219_v22 = vadd.f32 %v4218_v15, %v4186_v20 }
 0xef6   : > { %v4244_v27 = vadd.f32 %v4243_v16, %v4219_v22 }
 0xef7   : > { %4392 = vmatpush.xpose.msra.mxu3 %v4267_v0 }
 0xef8   : > { %v4247_v29 = vsel %vm1258_vm0, %v4244_v27, 0 }
 0xef9   : > { %v4269_v38 = vand.u32 4294901760, %v4247_v29 }
 0xefb   : > { %v4270_v41 = vsub.f32 %v4247_v29, %v4269_v38  ;;  %4300 = vmatmul.f32.vlgmr.msrb.gmra.mxu3 %v4269_v38 }
 0xefd   : > { %v4271_v43 = vand.u32 4294901760, %v4270_v41  ;;  %4324 = vmatmul.f32.vlgmr.msrb.gmra.mxu0 %v4270_v41 }
 0xeff   : > { %v4272_v24 = vsub.f32 %v4270_v41, %v4271_v43  ;;  %4348 = vmatmul.f32.vlgmr.msrb.gmra.mxu1 %v4271_v43 }
 0xf01   : > { %v4273_v42 = vand.u32 4294901760, %v4272_v24 }
 0xf03   : > { %4274 = vmatmul.f32.vlgmr.msrb.gmra.mxu2 %v4273_v42  ;;  %4394 = vmatmul.f32.vlgmr.msra.gmra.mxu3 %v4269_v38 }
 0xf0b   : > { %4372 = vmatmul.f32.vlgmr.msra.gmra.mxu2 %v4269_v38 }
 0xf5a   : > { %v4413_v47 = vpop.permute.xlu1 %4412 }
 0xf5b   : > { %v4433_v14 = vand.u32 4294901760, %v4413_v47 }
 0xf5d   : > { %v4460_v18 = vsub.f32 %v4413_v47, %v4433_v14  ;;  %4434 = vmatpush.msra.mxu0 %v4433_v14  ;;  %4510 = vmatpush.msrb.mxu3 %v4433_v14 }
 0xf5f   : > { %v4461_v44 = vand.u32 4294901760, %v4460_v18  ;;  %4487 = vmatpush.msrb.mxu2 %v4460_v18 }
 0xf61   : > { %v4462_v33 = vsub.f32 %v4460_v18, %v4461_v44  ;;  %4536 = vmatpush.msrb.mxu0 %v4461_v44 }
 0xf63   : > { %v4463_v46 = vand.u32 4294901760, %v4462_v33 }
 0xf65   : > { %4464 = vmatpush.msra.mxu1 %v4463_v46 }
 0xf67   : > { %4558 = vmatpush.msrb.mxu1 %v4433_v14 }
 0xf7a   : > { %v4325_v51 = vpop.f32.mrf.mxu0 }
 0xf7c   : > { %v4349_v19 = vpop.f32.mrf.mxu1 }
 0xf7e   : > { %v4301_v31 = vpop.f32.mrf.mxu3 }
 0xf86   : > { %v4275_v48 = vpop.f32.mrf.mxu2  ;;  %v4395_v34 = vpop.f32.mrf.mxu3 }
 0xf87   : > { %v4302_v49 = vadd.f32 %v4301_v31, %v4275_v48 }
 0xf89   : > { %v4326_v52 = vadd.f32 %v4325_v51, %v4302_v49 }
 0xf8b   : > { %v4350_v53 = vadd.f32 %v4349_v19, %v4326_v52 }
 0xf8e   : > { %v4373_v54 = vpop.f32.mrf.mxu2 }
 0xf8f   : > { %v4374_v58 = vadd.f32 %v4373_v54, %v4350_v53 }
 0xf91   : > { %v4396_v10 = vadd.f32 %v4395_v34, %v4374_v58 }
 0xf93   : > { %v4398_v13 = vmul.f32 0.25, %v4396_v10 }
 0xf95   : > { %v4399_v6 = vsel %vm8152_vm2, %v4398_v13, -1e+09 }
 0xf96   : > { %v4401_v56 = vsel %vm4400_vm8, %v4399_v6, -inf }
 0xf97   : > { %4402 = vmax.xlane.f32.xlu2 %v4401_v56 }
 0xfaf   : > { %4566 = vrot.lane.b32.xlu2 %v8556_v61, %s7829_s13 }
 0xfb7   : > { %4731 = vrot.lane.b32.xlu2 %v8556_v61, %s7827_s5 }
0x100a   : > { %v4403_v55 = vpop.xlane.xlu2 %4402 }
0x100b   : > { %v4404_v9 = vsub.f32 %v4399_v6, %v4403_v55 }
0x100d   : > { %v4405_v57 = vmul.f32 1.442695, %v4404_v9 }
0x100f   : > { %7727 = vpow2.f32 %v4405_v57 }
0x1012   : > { %v4567_v36 = vpop.permute.xlu2 %4566 }
0x1013   : > { %v4570_v8 = vsel %vm1258_vm0, %v4567_v36, 0 }
0x1014   : > { %v4587_v40 = vand.u32 4294901760, %v4570_v8 }
0x1015   : > { %v7728_v1 = vpop.eup %7727 }
0x1016   : > { %v4614_v25 = vsub.f32 %v4570_v8, %v4587_v40  ;;  %4588 = vmatpush.xpose.msra.mxu2 %v4587_v40  ;;  %v4407_v35 = vsel %vm4400_vm8, %v7728_v1, 0.0 }
0x1017   : > { %4408 = vadd.xlane.f32.xlu0 %v4407_v35 }
0x1018   : > { %v4615_v26 = vand.u32 4294901760, %v4614_v25 }
0x101a   : > { %v4616_v32 = vsub.f32 %v4614_v25, %v4615_v26  ;;  %v4732_v62 = vpop.permute.xlu2 %4731 }
0x101b   : > { %v4752_v0 = vand.u32 4294901760, %v4732_v62 }
0x101c   : > { %v4617_v60 = vand.u32 4294901760, %v4616_v32 }
0x101d   : > { %v4779_v4 = vsub.f32 %v4732_v62, %v4752_v0 }
0x101e   : > { %4618 = vmatpush.xpose.msra.mxu3 %v4617_v60 }
0x101f   : > { %v4780_v17 = vand.u32 4294901760, %v4779_v4 }
0x1021   : > { %v4781_v20 = vsub.f32 %v4779_v4, %v4780_v17 }
0x102b   : > { %4564 = vrot.lane.b32.xlu0 %v4244_v27, %s7829_s13  ;;  %v4782_v27 = vand.u32 4294901760, %v4781_v20 }
0x108a   : > { %v4409_v61 = vpop.xlane.xlu0 %4408 }
0x108b   : > { %7729 = vrcp.f32 %v4409_v61 }
0x1091   : > { %v7730_v3 = vpop.eup %7729 }
0x1092   : > { %v4411_v5 = vmul.f32 %v7730_v3, %v7728_v1 }
0x1094   : > { %v4416_v7 = vsel %vm1415_vm3, %v4411_v5, 0 }
0x1095   : > { %v4435_v23 = vand.u32 4294901760, %v4416_v7 }
0x1097   : > { %v4436_v28 = vsub.f32 %v4416_v7, %v4435_v23  ;;  %4466 = vmatmul.f32.vlgmr.msra.gmra.mxu1 %v4435_v23  ;;  %v4052_v7 = vld [vmem:[%s8006_s19 + $0x18] sm:$0xff] }
0x1098   : > { %4664 = vmatpush.xpose.msra.mxu1 %v4587_v40 }
0x1099   : > { %4490 = vmatmul.f32.vlgmr.msrb.gmra.mxu2 %v4436_v28  ;;  %v4437_v12 = vand.u32 4294901760, %v4436_v28 }
0x109a   : > { %4690 = vmatpush.xpose.msrb.mxu2 %v4615_v26 }
0x109b   : > { %4514 = vmatmul.f32.vlgmr.msrb.gmra.mxu3 %v4437_v12  ;;  %v4438_v15 = vsub.f32 %v4436_v28, %v4437_v12 }
0x109c   : > { %4712 = vmatpush.xpose.msrb.mxu3 %v4587_v40 }
0x109d   : > { %v4565_v16 = vpop.permute.xlu0 %4564  ;;  %v4439_v22 = vand.u32 4294901760, %v4438_v15 }
0x109e   : > { %v4568_v29 = vsel %vm1258_vm0, %v4565_v16, 0 }
0x109f   : > { %v4589_v38 = vand.u32 4294901760, %v4568_v29  ;;  %4440 = vmatmul.f32.vlgmr.msra.gmra.mxu0 %v4439_v22  ;;  %4560 = vmatmul.f32.vlgmr.msrb.gmra.mxu1 %v4435_v23 }
0x10a0   : > { %4641 = vmatpush.xpose.msra.mxu0 %v4614_v25  ;;  %4783 = vmatpush.msrb.mxu1 %v4782_v27 }
0x10a1   : > { %v4590_v41 = vsub.f32 %v4568_v29, %v4589_v38 }
0x10a3   : > { %v4591_v43 = vand.u32 4294901760, %v4590_v41  ;;  %4620 = vmatmul.f32.vlgmr.msra.gmra.mxu3 %v4589_v38 }
0x10a4   : > { %4829 = vmatpush.msra.mxu3 %v4752_v0 }
0x10a5   : > { %v4592_v24 = vsub.f32 %v4590_v41, %v4591_v43 }
0x10a7   : > { %v4593_v42 = vand.u32 4294901760, %v4592_v24  ;;  %4538 = vmatmul.f32.vlgmr.msrb.gmra.mxu0 %v4435_v23  ;;  %4668 = vmatmul.f32.vlgmr.msra.gmra.mxu1 %v4591_v43  ;;  %v8587_v23 = vand.u32 4294901760, %v4052_v7  ;;  %v4049_v24 = vld [vmem:[%s8006_s19] sm:$0xff] }
0x10a8   : > { %4753 = vmatpush.msrb.mxu0 %v4752_v0  ;;  %4877 = vmatpush.msra.mxu1 %v4752_v0 }
0x10a9   : > { %4594 = vmatmul.f32.vlgmr.msra.gmra.mxu2 %v4593_v42  ;;  %v8591_v28 = vsub.f32 %v4052_v7, %v8587_v23  ;;  %v8628_v42 = vand.u32 4294901760, %v4049_v24 }
0x10aa   : > { %4806 = vmatpush.msra.mxu2 %v4779_v4 }
0x10ab   : > { %4714 = vmatmul.f32.vlgmr.msrb.gmra.mxu3 %v4589_v38  ;;  %v8598_v20 = vand.u32 4294901760, %v8591_v28 }
0x10ad   : > { %v4930_v16 = vsub.f32 %v8591_v28, %v8598_v20 }
0x10af   : > { %4644 = vmatmul.f32.vlgmr.msra.gmra.mxu0 %v4590_v41  ;;  %v8613_v27 = vand.u32 4294901760, %v4930_v16  ;;  %v4050_v41 = vld [vmem:[%s8006_s19 + $0x8] sm:$0xff] }
0x10b0   : > { %4855 = vmatpush.msra.mxu0 %v4780_v17  ;;  %v4051_v17 = vld [vmem:[%s8006_s19 + $0x10] sm:$0xff]  ;;  %v8623_v43 = vand.u32 4294901760, %v4050_v41 }
0x10b1   : > { %4692 = vmatmul.f32.vlgmr.msrb.gmra.mxu2 %v4589_v38  ;;  %v8593_v12 = vand.u32 4294901760, %v4051_v17  ;;  %4932 = vmatpush.msrb.mxu3 %v8613_v27 }
0x10b2   : > { %4901 = vmatpush.msrb.mxu2 %v8587_v23 }
0x10b3   : > { %v8601_v15 = vsub.f32 %v4051_v17, %v8593_v12 }
0x10b4   : > { %4903 = vmatpush.msrb.mxu2 %v8593_v12 }
0x10b5   : > { %v8609_v22 = vand.u32 4294901760, %v8601_v15 }
0x10b7   : > { %v4936_v29 = vsub.f32 %v8601_v15, %v8609_v22 }
0x10b9   : > { %v8619_v38 = vand.u32 4294901760, %v4936_v29 }
0x10bb   : > { %4938 = vmatpush.msrb.mxu3 %v8619_v38 }
0x1114   : > { %v4467_v47 = vpop.f32.mrf.mxu1 }
0x111c   : > { %v4441_v14 = vpop.f32.mrf.mxu0  ;;  %v4491_v44 = vpop.f32.mrf.mxu2 }
0x111d   : > { %v4468_v18 = vadd.f32 %v4467_v47, %v4441_v14  ;;  %v4561_v51 = vpop.f32.mrf.mxu1  ;;  %v8631_v47 = vsub.f32 %v4050_v41, %v8623_v43 }
0x111e   : > { %v4515_v46 = vpop.f32.mrf.mxu3 }
0x111f   : > { %v4492_v33 = vadd.f32 %v4491_v44, %v4468_v18  ;;  %v8636_v14 = vand.u32 4294901760, %v8631_v47  ;;  %v8639_v18 = vsub.f32 %v4049_v24, %v8628_v42 }
0x1121   : > { %v4516_v31 = vadd.f32 %v4515_v46, %v4492_v33  ;;  %v5092_v44 = vsub.f32 %v8631_v47, %v8636_v14  ;;  %v8644_v33 = vand.u32 4294901760, %v8639_v18 }
0x1123   : > { %v8646_v46 = vand.u32 4294901760, %v5092_v44 }
0x1124   : > { %v4539_v48 = vpop.f32.mrf.mxu0 }
0x1125   : > { %v4540_v49 = vadd.f32 %v4539_v48, %v4516_v31  ;;  %v4669_v10 = vpop.f32.mrf.mxu1  ;;  %v5098_v31 = vsub.f32 %v8639_v18, %v8644_v33 }
0x1126   : > { %v4621_v19 = vpop.f32.mrf.mxu3 }
0x1127   : > { %v8579_v52 = vadd.f32 %v4561_v51, %v4540_v49  ;;  %v8651_v48 = vand.u32 4294901760, %v5098_v31 }
0x112c   : > { %v4595_v53 = vpop.f32.mrf.mxu2  ;;  %v4645_v58 = vpop.f32.mrf.mxu0 }
0x112d   : > { %v4622_v54 = vadd.f32 %v4621_v19, %v4595_v53 }
0x112e   : > { %v4715_v55 = vpop.f32.mrf.mxu3 }
0x112f   : > { %v4646_v34 = vadd.f32 %v4645_v58, %v4622_v54  ;;  %v5046_v58 = vsel %vm1258_vm0, %v8579_v52, 0 }
0x1131   : > { %v4670_v13 = vadd.f32 %v4669_v10, %v4646_v34 }
0x1134   : > { %v4693_v6 = vpop.f32.mrf.mxu2 }
0x1135   : > { %v4694_v56 = vadd.f32 %v4693_v6, %v4670_v13  ;;  %v5066_v13 = vand.u32 4294901760, %v5046_v58 }
0x1137   : > { %v4716_v9 = vadd.f32 %v4715_v55, %v4694_v56 }
0x1139   : > { %v4718_v57 = vmul.f32 0.25, %v4716_v9 }
0x113b   : > { %v4719_v36 = vsel %vm8152_vm2, %v4718_v57, -1e+09  ;;  %v5067_v57 = vsub.f32 %v5046_v58, %v5066_v13  ;;  %vm5208_vm2 = vcmask 257024  }
0x113c   : > { %v4720_v8 = vsel %vm4400_vm8, %v4719_v36, -inf }
0x113d   : > { %4721 = vmax.xlane.f32.xlu1 %v4720_v8 }
0x11b0   : > { %v4722_v40 = vpop.xlane.xlu1 %4721 }
0x11b1   : > { %v4723_v1 = vsub.f32 %v4719_v36, %v4722_v40  ;;  %v5068_v40 = vand.u32 4294901760, %v5067_v57 }
0x11b3   : > { %v4724_v25 = vmul.f32 1.442695, %v4723_v1  ;;  %v5069_v52 = vsub.f32 %v5067_v57, %v5068_v40 }
0x11b5   : > { %7731 = vpow2.f32 %v4724_v25 }
0x11bb   : > { %v7732_v35 = vpop.eup %7731 }
0x11bc   : > { %v4726_v26 = vsel %vm4400_vm8, %v7732_v35, 0.0 }
0x11bd   : > { %4727 = vadd.xlane.f32.xlu0 %v4726_v26 }
0x1230   : > { %v4728_v32 = vpop.xlane.xlu0 %4727 }
0x1231   : > { %7733 = vrcp.f32 %v4728_v32  ;;  %v5070_v32 = vand.u32 4294901760, %v5069_v52 }
0x1237   : > { %v7734_v60 = vpop.eup %7733 }
0x1238   : > { %v4730_v61 = vmul.f32 %v7734_v60, %v7732_v35 }
0x123a   : > { %v4735_v45 = vsel %vm1415_vm3, %v4730_v61, 0 }
0x123b   : > { %v4754_v62 = vand.u32 4294901760, %v4735_v45 }
0x123d   : > { %v4755_v0 = vsub.f32 %v4735_v45, %v4754_v62  ;;  %4785 = vmatmul.f32.vlgmr.msrb.gmra.mxu1 %v4754_v62 }
0x123e   : > { %4985 = vmatpush.msrb.mxu1 %v8587_v23 }
0x123f   : > { %4809 = vmatmul.f32.vlgmr.msra.gmra.mxu2 %v4755_v0  ;;  %v4756_v3 = vand.u32 4294901760, %v4755_v0 }
0x1240   : > { %4987 = vmatpush.msrb.mxu1 %v8593_v12  ;;  %5012 = vmatpush.msra.mxu2 %v8598_v20 }
0x1241   : > { %4833 = vmatmul.f32.vlgmr.msra.gmra.mxu3 %v4756_v3  ;;  %v4757_v4 = vsub.f32 %v4755_v0, %v4756_v3 }
0x1242   : > { %5016 = vmatpush.msra.mxu2 %v8609_v22  ;;  %5037 = vmatpush.msra.mxu3 %v8587_v23 }
0x1243   : > { %v4758_v5 = vand.u32 4294901760, %v4757_v4 }
0x1244   : > { %5039 = vmatpush.msra.mxu3 %v8593_v12 }
0x1245   : > { %4759 = vmatmul.f32.vlgmr.msrb.gmra.mxu0 %v4758_v5  ;;  %4879 = vmatmul.f32.vlgmr.msra.gmra.mxu1 %v4754_v62 }
0x1246   : > { %4960 = vmatpush.msrb.mxu0 %v8591_v28  ;;  %5094 = vmatpush.msra.mxu1 %v8646_v46 }
0x1248   : > { %4963 = vmatpush.msrb.mxu0 %v8601_v15  ;;  %5100 = vmatpush.msra.mxu1 %v8651_v48 }
0x124d   : > { %4857 = vmatmul.f32.vlgmr.msra.gmra.mxu0 %v4754_v62 }
0x124e   : > { %5063 = vmatpush.msra.mxu0 %v8623_v43 }
0x1250   : > { %5065 = vmatpush.msra.mxu0 %v8628_v42 }
0x12ba   : > { %v4786_v49 = vpop.f32.mrf.mxu1 }
0x12c2   : > { %v4760_v51 = vpop.f32.mrf.mxu0  ;;  %v4810_v53 = vpop.f32.mrf.mxu2 }
0x12c3   : > { %v4787_v19 = vadd.f32 %v4786_v49, %v4760_v51  ;;  %v4880_v55 = vpop.f32.mrf.mxu1 }
0x12c4   : > { %v4834_v34 = vpop.f32.mrf.mxu3 }
0x12c5   : > { %v4811_v54 = vadd.f32 %v4810_v53, %v4787_v19 }
0x12c7   : > { %v4835_v10 = vadd.f32 %v4834_v34, %v4811_v54 }
0x12ca   : > { %v4858_v6 = vpop.f32.mrf.mxu0 }
0x12cb   : > { %v4859_v56 = vadd.f32 %v4858_v6, %v4835_v10  ;;  %v3913_v6 = vadd.f32 %v8548_v59, %v8550_v63 }
0x12cd   : > { %v4881_v9 = vadd.f32 %v4880_v55, %v4859_v56  ;;  %v3948_v56 = vadd.f32 %v8552_v11, %v3913_v6  ;;  %v5238_v11 = vld [vmem:[%s8011_s28 + $0x18] sm:$0xff]  ;;  %v8693_v6 = vld [vmem:[%s8039_s14] sm:$0xf]  ;;  %s9100_s14 = sld [smem:[#allocation11_spill]] }
0x12cf   : > { %v4884_v36 = vsel %vm1258_vm0, %v4881_v9, 0  ;;  %v3981_v55 = vadd.f32 %v8554_v39, %v3948_v56  ;;  %v5258_v39 = vand.u32 4294901760, %v5238_v11  ;;  %v5233_v56 = vperm.slane %v8693_v6, 2 }
0x12d0   : > { %v4904_v8 = vand.u32 4294901760, %v4884_v36 }
0x12d1   : > { %v4018_v9 = vadd.f32 %v8564_v2, %v3981_v55  ;;  %v5237_v2 = vld [vmem:[%s8011_s28 + $0x10] sm:$0xff] }
0x12d2   : > { %v4905_v1 = vsub.f32 %v4884_v36, %v4904_v8  ;;  %4940 = vmatmul.f32.vlgmr.msrb.gmra.mxu3 %v4904_v8 }
0x12d3   : > { %5147 = vmatpush.msrb.mxu3 %v8623_v43  ;;  %p7658_p5 = scmp.eq.s32.totalorder %s9100_s14, 1 }
0x12d4   : > { %v4906_v25 = vand.u32 4294901760, %v4905_v1  ;;  %4966 = vmatmul.f32.vlgmr.msrb.gmra.mxu0 %v4905_v1 }
0x12d5   : > { %5149 = vmatpush.msrb.mxu3 %v8628_v42  ;;  %5174 = vmatpush.msrb.mxu0 %v8636_v14 }
0x12d6   : > { %v4907_v35 = vsub.f32 %v4905_v1, %v4906_v25  ;;  %4991 = vmatmul.f32.vlgmr.msrb.gmra.mxu1 %v4906_v25  ;;  %v5236_v1 = vld [vmem:[%s8011_s28 + $0x8] sm:$0xff] }
0x12d7   : > { %5178 = vmatpush.msrb.mxu0 %v8644_v33  ;;  %5199 = vmatpush.msrb.mxu1 %v8623_v43 }
0x12d8   : > { %v4908_v26 = vand.u32 4294901760, %v4907_v35  ;;  %v5262_v35 = vand.u32 4294901760, %v5236_v1 }
0x12d9   : > { %5201 = vmatpush.msrb.mxu1 %v8628_v42 }
0x12da   : > { %4909 = vmatmul.f32.vlgmr.msrb.gmra.mxu2 %v4908_v26  ;;  %5041 = vmatmul.f32.vlgmr.msra.gmra.mxu3 %v4904_v8  ;;  %v5235_v26 = vld [vmem:[%s8011_s28] sm:$0xff] }
0x12db   : > { %5122 = vmatpush.msrb.mxu2 %v8631_v47 }
0x12dc   : > { %5071 = vmatmul.f32.vlgmr.msra.gmra.mxu0 %v5070_v32 }
0x12dd   : > { %5125 = vmatpush.msrb.mxu2 %v8639_v18 }
0x12de   : > { %5102 = vmatmul.f32.vlgmr.msra.gmra.mxu1 %v5066_v13 }
0x12df   : > { %5359 = vmatpush.msra.mxu1 %v5258_v39 }
0x12e2   : > { %5018 = vmatmul.f32.vlgmr.msra.gmra.mxu2 %v4904_v8  ;;  %5153 = vmatmul.f32.vlgmr.msrb.gmra.mxu3 %v5068_v40  ;;  %v5260_v40 = vand.u32 4294901760, %v5237_v2 }
0x12e3   : > { %5259 = vmatpush.msra.mxu2 %v5258_v39 }
0x12e4   : > { %5180 = vmatmul.f32.vlgmr.msrb.gmra.mxu0 %v5066_v13  ;;  %v5294_v52 = vsub.f32 %v5237_v2, %v5260_v40  ;;  %5361 = vmatpush.msra.mxu1 %v5260_v40  ;;  %v5439_v2 = vld [vmem:[%s8022_s6 + $0x38] sm:$0xff] }
0x12e5   : > { %5261 = vmatpush.msra.mxu2 %v5260_v40 }
0x12e6   : > { %5203 = vmatmul.f32.vlgmr.msrb.gmra.mxu1 %v5066_v13 }
0x12e7   : > { %5363 = vmatpush.msra.mxu1 %v5262_v35  ;;  %5263 = vmatpush.msra.mxu2 %v5262_v35 }
0x12ea   : > { %5128 = vmatmul.f32.vlgmr.msrb.gmra.mxu2 %v5067_v57  ;;  %v8673_v57 = vadd.f32 %v8562_v37, %v4018_v9  ;;  %v5288_v37 = vsub.f32 %v5238_v11, %v5258_v39 }
0x12ec   : > { %v5289_v25 = vand.u32 4294901760, %v5288_v37  ;;  %5330 = vmatpush.msra.mxu0 %v5288_v37 }
0x12ee   : > { %v5290_v32 = vsub.f32 %v5288_v37, %v5289_v25  ;;  %5333 = vmatpush.msra.mxu0 %v5294_v52  ;;  %v8706_v37 = vand.u32 4294901760, %v5439_v2 }
0x1351   : > { %v4967_v61 = vpop.f32.mrf.mxu0 }
0x1353   : > { %v4992_v0 = vpop.f32.mrf.mxu1 }
0x1355   : > { %v4941_v60 = vpop.f32.mrf.mxu3 }
0x1359   : > { %v5072_v16 = vpop.f32.mrf.mxu0 }
0x135b   : > { %v5103_v41 = vpop.f32.mrf.mxu1 }
0x135d   : > { %v4910_v45 = vpop.f32.mrf.mxu2  ;;  %v5042_v5 = vpop.f32.mrf.mxu3 }
0x135e   : > { %v4942_v62 = vadd.f32 %v4941_v60, %v4910_v45  ;;  %v5295_v60 = vand.u32 4294901760, %v5294_v52  ;;  %v5264_v45 = vand.u32 4294901760, %v5235_v26 }
0x1360   : > { %v4968_v3 = vadd.f32 %v4967_v61, %v4942_v62  ;;  %v5300_v61 = vsub.f32 %v5236_v1, %v5262_v35  ;;  %v5291_v62 = vand.u32 4294901760, %v5290_v32  ;;  %5365 = vmatpush.msra.mxu1 %v5264_v45  ;;  %5265 = vmatpush.msra.mxu2 %v5264_v45  ;;  %v8710_v1 = vsub.f32 %v5439_v2, %v8706_v37 }
0x1361   : > { %v5181_v53 = vpop.f32.mrf.mxu0 }
0x1362   : > { %v4993_v4 = vadd.f32 %v4992_v0, %v4968_v3  ;;  %v5296_v0 = vsub.f32 %v5294_v52, %v5295_v60  ;;  %v5301_v3 = vand.u32 4294901760, %v5300_v61  ;;  %5336 = vmatpush.msra.mxu0 %v5300_v61  ;;  %5292 = vmatpush.msra.mxu3 %v5291_v62  ;;  %v5437_v52 = vld [vmem:[%s8022_s6 + $0x28] sm:$0xff] }
0x1363   : > { %v5204_v58 = vpop.f32.mrf.mxu1  ;;  %5388 = vmatpush.msrb.mxu2 %v5289_v25  ;;  %v8721_v32 = vand.u32 4294901760, %v5437_v52 }
0x1365   : > { %v5019_v7 = vpop.f32.mrf.mxu2  ;;  %v5154_v51 = vpop.f32.mrf.mxu3  ;;  %5392 = vmatpush.msrb.mxu2 %v5295_v60  ;;  %v5436_v60 = vld [vmem:[%s8022_s6 + $0x20] sm:$0xff]  ;;  %v8730_v62 = vsub.f32 %v5437_v52, %v8721_v32 }
0x1366   : > { %v5020_v17 = vadd.f32 %v5019_v7, %v4993_v4  ;;  %v5306_v4 = vsub.f32 %v5235_v26, %v5264_v45  ;;  %v5302_v7 = vsub.f32 %v5300_v61, %v5301_v3 }
0x1367   : > { %5396 = vmatpush.msrb.mxu2 %v5301_v3  ;;  %v5435_v3 = vld [vmem:[%s8022_s6 + $0x18] sm:$0xff] }
0x1368   : > { %v5043_v29 = vadd.f32 %v5042_v5, %v5020_v17  ;;  %v5297_v5 = vand.u32 4294901760, %v5296_v0  ;;  %v5307_v17 = vand.u32 4294901760, %v5306_v4  ;;  %5339 = vmatpush.msra.mxu0 %v5306_v4  ;;  %v8732_v0 = vand.u32 4294901760, %v5436_v60 }
0x136a   : > { %v5073_v24 = vadd.f32 %v5072_v16, %v5043_v29  ;;  %5298 = vmatpush.msra.mxu3 %v5297_v5  ;;  %v5303_v16 = vand.u32 4294901760, %v5302_v7  ;;  %v5308_v29 = vsub.f32 %v5306_v4, %v5307_v17  ;;  %5400 = vmatpush.msrb.mxu2 %v5307_v17  ;;  %v5502_v7 = vand.u32 4294901760, %v8730_v62 }
0x136b   : > { %5456 = vmatpush.msrb.mxu0 %v8706_v37  ;;  %v5507_v17 = vsub.f32 %v5436_v60, %v8732_v0 }
0x136c   : > { %v5104_v44 = vadd.f32 %v5103_v41, %v5073_v24  ;;  %5304 = vmatpush.msra.mxu3 %v5303_v16  ;;  %v5309_v41 = vand.u32 4294901760, %v5308_v29  ;;  %v8743_v16 = vand.u32 4294901760, %v5435_v3  ;;  %v5434_v29 = vld [vmem:[%s8022_s6 + $0x10] sm:$0xff] }
0x136d   : > { %v5129_v31 = vpop.f32.mrf.mxu2 }
0x136e   : > { %v5130_v49 = vadd.f32 %v5129_v31, %v5104_v44  ;;  %5310 = vmatpush.msra.mxu3 %v5309_v41 }
0x1370   : > { %v5155_v19 = vadd.f32 %v5154_v51, %v5130_v49  ;;  %5419 = vmatpush.msrb.mxu3 %v5258_v39 }
0x1372   : > { %v5182_v54 = vadd.f32 %v5181_v53, %v5155_v19  ;;  %5421 = vmatpush.msrb.mxu3 %v5260_v40  ;;  %v5438_v40 = vld [vmem:[%s8022_s6 + $0x30] sm:$0xff] }
0x1373   : > { %v8712_v25 = vand.u32 4294901760, %v5438_v40 }
0x1374   : > { %v5205_v34 = vadd.f32 %v5204_v58, %v5182_v54  ;;  %5423 = vmatpush.msrb.mxu3 %v5262_v35  ;;  %v5490_v35 = vand.u32 4294901760, %v8710_v1 }
0x1375   : > { %v8719_v26 = vsub.f32 %v5438_v40, %v8712_v25  ;;  %5458 = vmatpush.msrb.mxu0 %v8712_v25 }
0x1376   : > { %v5207_v10 = vadd.f32 %v5205_v34, %v8517_v21  ;;  %5425 = vmatpush.msrb.mxu3 %v5264_v45  ;;  %v8689_v34 = vld [vmem:[%s8034_s27] sm:$0xf]  ;;  %v5491_v61 = vsub.f32 %v8710_v1, %v5490_v35 }
0x1377   : > { %v5496_v45 = vand.u32 4294901760, %v8719_v26  ;;  %5460 = vmatpush.msrb.mxu0 %v8721_v32 }
0x1378   : > { %v5209_v13 = vsel %vm5208_vm2, %v5207_v10, 0.0  ;;  %v5492_v4 = vand.u32 4294901760, %v5491_v61 }
0x1379   : > { %5210 = vadd.xlane.f32.xlu2 %v5209_v13  ;;  %v5497_v5 = vsub.f32 %v8719_v26, %v5496_v45  ;;  %5462 = vmatpush.msrb.mxu0 %v8732_v0 }
0x137a   : > { %5493 = vmatpush.msrb.mxu1 %v5492_v4  ;;  %v5717_v4 = vld [vmem:[%s7996_s22 + $0x10] sm:$0xff] }
0x137b   : > { %v5498_v41 = vand.u32 4294901760, %v5497_v5  ;;  %5464 = vmatpush.msrb.mxu0 %v8743_v16  ;;  %v8778_v5 = vand.u32 4294901760, %v5717_v4 }
0x137d   : > { %5499 = vmatpush.msrb.mxu1 %v5498_v41 }
0x1391   : > { %6072 = vrot.lane.b32.xlu2 %v8673_v57, %s7828_s23 }
0x13ec   : > { %v5211_v21 = vpop.xlane.xlu2 %5210 }
0x13ed   : > { %v5212_v36 = vmul.f32 %v5211_v21, %v8337_v50 }
0x13ef   : > { %v8678_v8 = vsub.f32 %v5207_v10, %v5212_v36  ;;  %v5231_v10 = vperm.slane %v8689_v34, 2 }
0x13f1   : > { %v5214_v59 = vmul.f32 %v8678_v8, %v8678_v8 }
0x13f3   : > { %v5215_v63 = vsel %vm5208_vm2, %v5214_v59, 0.0 }
0x13f4   : > { %5216 = vadd.xlane.f32.xlu1 %v5215_v63 }
0x1467   : > { %v5217_v24 = vpop.xlane.xlu1 %5216 }
0x1468   : > { %v5218_v44 = vmul.f32 %v5217_v24, %v8337_v50  ;;  %v5503_v24 = vsub.f32 %v8730_v62, %v5502_v7 }
0x146a   : > { %v5219_v31 = vadd.f32 1e-06, %v5218_v44  ;;  %v5508_v44 = vand.u32 4294901760, %v5507_v17 }
0x146c   : > { %7735 = vrsqrt.f32 %v5219_v31  ;;  %vm5226_vm10 = vweird.f32 %v5219_v31 }
0x1472   : > { %v7736_v49 = vpop.eup %7735 }
0x1473   : > { %v5221_v51 = vmul.f32 %v7736_v49, %v5219_v31  ;;  %vm5227_vm9 = vweird.f32 %v7736_v49  ;;  %v8748_v31 = vand.u32 4294901760, %v5434_v29 }
0x1474   : > { %vm5228_vm11 = vmor %vm5226_vm10, %vm5227_vm9 }
0x1475   : > { %v5222_v19 = vmul.f32 %v7736_v49, %v5221_v51  ;;  %v5433_v51 = vld [vmem:[%s8022_s6 + $0x8] sm:$0xff]  ;;  %5466 = vmatpush.msrb.mxu0 %v8748_v31 }
0x1477   : > { %v5223_v53 = vmul.f32 0.5, %v5222_v19  ;;  %v5504_v19 = vand.u32 4294901760, %v5503_v24 }
0x1479   : > { %v5224_v54 = vsub.f32 1.5, %v5223_v53  ;;  %v5509_v53 = vsub.f32 %v5507_v17, %v5508_v44  ;;  %5505 = vmatpush.msrb.mxu1 %v5504_v19 }
0x147b   : > { %v5225_v58 = vmul.f32 %v7736_v49, %v5224_v54  ;;  %v5519_v54 = vsub.f32 %v5434_v29, %v8748_v31  ;;  %v5715_v29 = vld [vmem:[%s7996_s22] sm:$0xff] }
0x147c   : > { %v8796_v24 = vand.u32 4294901760, %v5715_v29 }
0x147d   : > { %v5229_v13 = vsel %vm5228_vm11, %v7736_v49, %v5225_v58  ;;  %v5513_v49 = vsub.f32 %v5435_v3, %v8743_v16  ;;  %v8755_v58 = vand.u32 4294901760, %v5433_v51  ;;  %v5718_v3 = vld [vmem:[%s7996_s22 + $0x18] sm:$0xff] }
0x147e   : > { %v5230_v55 = vmul.f32 %v5229_v13, %v8678_v8  ;;  %v8808_v19 = vsub.f32 %v5715_v29, %v8796_v24 }
0x147f   : > { %v5514_v13 = vand.u32 4294901760, %v5513_v49  ;;  %5468 = vmatpush.msrb.mxu0 %v8755_v58 }
0x1480   : > { %v5232_v9 = vmul.f32 %v5231_v10, %v5230_v55  ;;  %v5432_v55 = vld [vmem:[%s8022_s6] sm:$0xff] }
0x1482   : > { %v8701_v21 = vadd.f32 %v5233_v56, %v5232_v9  ;;  %v5510_v9 = vand.u32 4294901760, %v5509_v53 }
0x1484   : > { %v5244_v36 = vsel %vm1028_vm15, %v8701_v21, 0  ;;  %5511 = vmatpush.msrb.mxu1 %v5510_v9  ;;  %v7697_v9 = vld [vmem:[%s8017_s29] ss:$0 sm:$0xff] }
0x1485   : > { %v5266_v59 = vand.u32 4294901760, %v5244_v36 }
0x1487   : > { %5312 = vmatmul.f32.vlgmr.msra.gmra.mxu3 %v5266_v59  ;;  %v5267_v63 = vsub.f32 %v5244_v36, %v5266_v59  ;;  %v5520_v36 = vand.u32 4294901760, %v5519_v54 }
0x1488   : > { %5588 = vmatpush.msra.mxu3 %v8706_v37 }
0x1489   : > { %5342 = vmatmul.f32.vlgmr.msra.gmra.mxu0 %v5267_v63  ;;  %v5268_v11 = vand.u32 4294901760, %v5267_v63 }
0x148a   : > { %5590 = vmatpush.msra.mxu3 %v8712_v25 }
0x148b   : > { %5369 = vmatmul.f32.vlgmr.msra.gmra.mxu1 %v5268_v11  ;;  %v5269_v39 = vsub.f32 %v5267_v63, %v5268_v11  ;;  %v8760_v63 = vand.u32 4294901760, %v5432_v55  ;;  %v5515_v11 = vsub.f32 %v5513_v49, %v5514_v13 }
0x148c   : > { %5592 = vmatpush.msra.mxu3 %v8721_v32 }
0x148d   : > { %v5270_v8 = vand.u32 4294901760, %v5269_v39  ;;  %v5521_v39 = vsub.f32 %v5519_v54, %v5520_v36  ;;  %v5531_v2 = vsub.f32 %v5432_v55, %v8760_v63  ;;  %v5516_v40 = vand.u32 4294901760, %v5515_v11  ;;  %5470 = vmatpush.msrb.mxu0 %v8760_v63 }
0x148e   : > { %5594 = vmatpush.msra.mxu3 %v8732_v0 }
0x148f   : > { %5271 = vmatmul.f32.vlgmr.msra.gmra.mxu2 %v5270_v8  ;;  %5427 = vmatmul.f32.vlgmr.msrb.gmra.mxu3 %v5266_v59 }
0x1490   : > { %5551 = vmatpush.msra.mxu2 %v8710_v1  ;;  %5596 = vmatpush.msra.mxu3 %v8743_v16  ;;  %v5522_v1 = vand.u32 4294901760, %v5521_v39 }
0x1491   : > { %5621 = vmatpush.msra.mxu0 %v5490_v35  ;;  %5517 = vmatpush.msrb.mxu1 %v5516_v40  ;;  %v8770_v35 = vand.u32 4294901760, %v5718_v3 }
0x1492   : > { %5554 = vmatpush.msra.mxu2 %v8719_v26  ;;  %5598 = vmatpush.msra.mxu3 %v8748_v31  ;;  %v5532_v26 = vand.u32 4294901760, %v5531_v2 }
0x1493   : > { %5625 = vmatpush.msra.mxu0 %v5496_v45  ;;  %5523 = vmatpush.msrb.mxu1 %v5522_v1  ;;  %v8776_v45 = vsub.f32 %v5718_v3, %v8770_v35  ;;  %v5911_v3 = vsel %vm1258_vm0, %v8673_v57, 0 }
0x1494   : > { %5557 = vmatpush.msra.mxu2 %v8730_v62  ;;  %5600 = vmatpush.msra.mxu3 %v8755_v58  ;;  %v5533_v61 = vsub.f32 %v5531_v2, %v5532_v26  ;;  %v5928_v29 = vand.u32 4294901760, %v5911_v3 }
0x1495   : > { %5629 = vmatpush.msra.mxu0 %v5502_v7  ;;  %v5716_v7 = vld [vmem:[%s7996_s22 + $0x8] sm:$0xff]  ;;  %s7374_s22 = sshll.u32 %s7834_s26, 4  ;;  %s7375_s22 = int_to_ptr.vmem [resolvable:$true] %s7374_s22 }
0x1496   : > { %5560 = vmatpush.msra.mxu2 %v5507_v17  ;;  %5602 = vmatpush.msra.mxu3 %v8760_v63  ;;  %v5534_v62 = vand.u32 4294901760, %v5533_v61  ;;  %v8784_v17 = vand.u32 4294901760, %v5716_v7 }
0x1497   : > { %5402 = vmatmul.f32.vlgmr.msrb.gmra.mxu2 %v5266_v59  ;;  %v5525_v59 = vsub.f32 %v5433_v51, %v8755_v58  ;;  %5633 = vmatpush.msra.mxu0 %v5508_v44 }
0x1498   : > { %5563 = vmatpush.msra.mxu2 %v5513_v49  ;;  %v8799_v44 = vsub.f32 %v5716_v7, %v8784_v17 }
0x1499   : > { %v5526_v8 = vand.u32 4294901760, %v5525_v59  ;;  %5637 = vmatpush.msra.mxu0 %v5514_v13 }
0x149a   : > { %5566 = vmatpush.msra.mxu2 %v5519_v54  ;;  %v5777_v51 = vand.u32 4294901760, %v8799_v44  ;;  %v5783_v54 = vand.u32 4294901760, %v8808_v19 }
0x149b   : > { %v5527_v52 = vsub.f32 %v5525_v59, %v5526_v8  ;;  %5641 = vmatpush.msra.mxu0 %v5520_v36 }
0x149c   : > { %5569 = vmatpush.msra.mxu2 %v5525_v59  ;;  %v5784_v55 = vsub.f32 %v8808_v19, %v5783_v54 }
0x149d   : > { %v5528_v60 = vand.u32 4294901760, %v5527_v52  ;;  %5645 = vmatpush.msra.mxu0 %v5526_v8  ;;  %v8821_v8 = vld [vmem:[#allocation3 + $0x4] sm:$0xf] }
0x149e   : > { %5572 = vmatpush.msra.mxu2 %v5531_v2  ;;  %v5720_v1 = vsel %vm1028_vm15, %v8821_v8, 0 }
0x149f   : > { %5529 = vmatpush.msrb.mxu1 %v5528_v60  ;;  %5649 = vmatpush.msra.mxu0 %v5532_v26 }
0x14a0   : > { %5735 = vmatpush.msrb.mxu2 %v8770_v35 }
0x14a1   : > { %5535 = vmatpush.msrb.mxu1 %v5534_v62 }
0x14a2   : > { %5737 = vmatpush.msrb.mxu2 %v8778_v5 }
0x14a3   : > { %5664 = vmatpush.msra.mxu1 %v8706_v37  ;;  %v5765_v37 = vand.u32 4294901760, %v8776_v45 }
0x14a4   : > { %5739 = vmatpush.msrb.mxu2 %v8784_v17 }
0x14a5   : > { %5666 = vmatpush.msra.mxu1 %v8712_v25  ;;  %v8787_v25 = vsub.f32 %v5717_v4, %v8778_v5  ;;  %v5766_v41 = vsub.f32 %v8776_v45, %v5765_v37 }
0x14a6   : > { %5741 = vmatpush.msrb.mxu2 %v8796_v24 }
0x14a7   : > { %5668 = vmatpush.msra.mxu1 %v8721_v32  ;;  %v5771_v32 = vand.u32 4294901760, %v8787_v25  ;;  %v5767_v49 = vand.u32 4294901760, %v5766_v41  ;;  %v6073_v41 = vpop.permute.xlu2 %6072 }
0x14a9   : > { %5670 = vmatpush.msra.mxu1 %v8732_v0  ;;  %v5772_v0 = vsub.f32 %v8787_v25, %v5771_v32  ;;  %5768 = vmatpush.msrb.mxu3 %v5767_v49 }
0x14ab   : > { %5672 = vmatpush.msra.mxu1 %v8743_v16  ;;  %v5773_v53 = vand.u32 4294901760, %v5772_v0  ;;  %v5778_v16 = vsub.f32 %v8799_v44, %v5777_v51 }
0x14ad   : > { %5674 = vmatpush.msra.mxu1 %v8748_v31  ;;  %5774 = vmatpush.msrb.mxu3 %v5773_v53  ;;  %v5779_v13 = vand.u32 4294901760, %v5778_v16  ;;  %v5785_v31 = vand.u32 4294901760, %v5784_v55  ;;  %v8828_v16 = vand.u32 4294901760, %v6073_v41  ;;  %v5955_v55 = vsub.f32 %v5911_v3, %v5928_v29 }
0x14af   : > { %5676 = vmatpush.msra.mxu1 %v8755_v58  ;;  %5780 = vmatpush.msrb.mxu3 %v5779_v13 }
0x14b1   : > { %5678 = vmatpush.msra.mxu1 %v8760_v63  ;;  %5786 = vmatpush.msrb.mxu3 %v5785_v31  ;;  %v5742_v63 = vand.u32 4294901760, %v5720_v1 }
0x14b3   : > { %v5743_v7 = vsub.f32 %v5720_v1, %v5742_v63 }
0x14b5   : > { %v5744_v53 = vand.u32 4294901760, %v5743_v7 }
0x1506   : > { %v5343_v2 = vpop.f32.mrf.mxu0 }
0x1508   : > { %v5370_v40 = vpop.f32.mrf.mxu1 }
0x150a   : > { %v5313_v36 = vpop.f32.mrf.mxu3 }
0x1512   : > { %v5272_v59 = vpop.f32.mrf.mxu2  ;;  %v5428_v61 = vpop.f32.mrf.mxu3 }
0x1513   : > { %v5273_v11 = vadd.f32 %v7697_v9, %v5272_v59  ;;  %v5745_v9 = vsub.f32 %v5743_v7, %v5744_v53 }
0x1515   : > { %v5314_v39 = vadd.f32 %v5313_v36, %v5273_v11  ;;  %v8834_v36 = vsub.f32 %v6073_v41, %v8828_v16  ;;  %v5956_v11 = vand.u32 4294901760, %v5955_v55 }
0x1517   : > { %v5344_v58 = vadd.f32 %v5343_v2, %v5314_v39  ;;  %v5746_v2 = vand.u32 4294901760, %v5745_v9 }
0x1519   : > { %v5371_v52 = vadd.f32 %v5370_v40, %v5344_v58  ;;  %v6121_v58 = vand.u32 4294901760, %v8834_v36  ;;  %v5957_v40 = vsub.f32 %v5955_v55, %v5956_v11 }
0x151a   : > { %v5403_v26 = vpop.f32.mrf.mxu2 }
0x151b   : > { %v5404_v60 = vadd.f32 %v5403_v26, %v5371_v52 }
0x151d   : > { %v5429_v62 = vadd.f32 %v5428_v61, %v5404_v60 }
0x151f   : > { %v5431_v4 = vmax.f32 %v5429_v62, 0.0 }
0x1521   : > { %v5445_v49 = vsel %vm3492_vm12, %v5431_v4, 0 }
0x1522   : > { %v5471_v0 = vand.u32 4294901760, %v5445_v49 }
0x1524   : > { %v5472_v13 = vsub.f32 %v5445_v49, %v5471_v0  ;;  %5537 = vmatmul.f32.vlgmr.msrb.gmra.mxu1 %v5471_v0 }
0x1525   : > { %5895 = vmatpush.msrb.mxu1 %v8770_v35 }
0x1526   : > { %v5473_v31 = vand.u32 4294901760, %v5472_v13  ;;  %5575 = vmatmul.f32.vlgmr.msra.gmra.mxu2 %v5472_v13 }
0x1527   : > { %5806 = vmatpush.msra.mxu2 %v8776_v45  ;;  %5897 = vmatpush.msrb.mxu1 %v8778_v5  ;;  %v7698_v45 = vld [vmem:[%s8028_s7] ss:$0 sm:$0xff] }
0x1528   : > { %v5474_v59 = vsub.f32 %v5472_v13, %v5473_v31  ;;  %5606 = vmatmul.f32.vlgmr.msra.gmra.mxu3 %v5473_v31 }
0x1529   : > { %5809 = vmatpush.msra.mxu2 %v8787_v25  ;;  %5835 = vmatpush.msra.mxu3 %v8770_v35  ;;  %v6122_v35 = vsub.f32 %v8834_v36, %v6121_v58 }
0x152a   : > { %v5475_v39 = vand.u32 4294901760, %v5474_v59  ;;  %5899 = vmatpush.msrb.mxu1 %v8784_v17 }
0x152b   : > { %5812 = vmatpush.msra.mxu2 %v8799_v44  ;;  %5837 = vmatpush.msra.mxu3 %v8778_v5  ;;  %v5958_v5 = vand.u32 4294901760, %v5957_v40 }
0x152c   : > { %5901 = vmatpush.msrb.mxu1 %v8796_v24  ;;  %5476 = vmatmul.f32.vlgmr.msrb.gmra.mxu0 %v5475_v39 }
0x152d   : > { %5680 = vmatmul.f32.vlgmr.msra.gmra.mxu1 %v5471_v0  ;;  %5815 = vmatpush.msra.mxu2 %v8808_v19 }
0x152e   : > { %6005 = vmatpush.xpose.msra.mxu1 %v5928_v29  ;;  %5839 = vmatpush.msra.mxu3 %v8784_v17  ;;  %v6123_v17 = vand.u32 4294901760, %v6122_v35 }
0x152f   : > { %5864 = vmatpush.msrb.mxu0 %v5765_v37  ;;  %5747 = vmatmul.f32.vlgmr.msrb.gmra.mxu2 %v5746_v2 }
0x1530   : > { %5929 = vmatpush.xpose.msrb.mxu2 %v5928_v29  ;;  %5841 = vmatpush.msra.mxu3 %v8796_v24 }
0x1531   : > { %5868 = vmatpush.msrb.mxu0 %v5771_v32  ;;  %5788 = vmatmul.f32.vlgmr.msrb.gmra.mxu3 %v5742_v63 }
0x1532   : > { %5959 = vmatpush.xpose.msrb.mxu3 %v5958_v5 }
0x1533   : > { %5872 = vmatpush.msrb.mxu0 %v5777_v51 }
0x1534   : > { %5651 = vmatmul.f32.vlgmr.msra.gmra.mxu0 %v5471_v0 }
0x1535   : > { %5876 = vmatpush.msrb.mxu0 %v5783_v54  ;;  %5903 = vmatmul.f32.vlgmr.msrb.gmra.mxu1 %v5742_v63 }
0x1536   : > { %6124 = vmatpush.msrb.mxu1 %v6123_v17 }
0x1537   : > { %5982 = vmatpush.xpose.msra.mxu0 %v5955_v55  ;;  %5818 = vmatmul.f32.vlgmr.msra.gmra.mxu2 %v5743_v7 }
0x1538   : > { %6031 = vmatpush.xpose.msra.mxu2 %v5956_v11 }
0x1539   : > { %5845 = vmatmul.f32.vlgmr.msra.gmra.mxu3 %v5744_v53 }
0x153a   : > { %6053 = vmatpush.xpose.msra.mxu3 %v5928_v29 }
0x153c   : > { %5878 = vmatmul.f32.vlgmr.msrb.gmra.mxu0 %v5742_v63 }
0x153d   : > { %6094 = vmatpush.msrb.mxu0 %v8828_v16 }
0x15a1   : > { %v5538_v37 = vpop.f32.mrf.mxu1 }
0x15a9   : > { %v5477_v25 = vpop.f32.mrf.mxu0  ;;  %v5576_v32 = vpop.f32.mrf.mxu2 }
0x15aa   : > { %v5478_v24 = vadd.f32 %v7698_v45, %v5477_v25  ;;  %v5681_v60 = vpop.f32.mrf.mxu1 }
0x15ab   : > { %v5607_v44 = vpop.f32.mrf.mxu3 }
0x15ac   : > { %v5539_v51 = vadd.f32 %v5538_v37, %v5478_v24 }
0x15ae   : > { %v5577_v1 = vadd.f32 %v5576_v32, %v5539_v51 }
0x15b0   : > { %v5608_v19 = vadd.f32 %v5607_v44, %v5577_v1 }
0x15b1   : > { %v5652_v54 = vpop.f32.mrf.mxu0 }
0x15b2   : > { %v5653_v52 = vadd.f32 %v5652_v54, %v5608_v19  ;;  %v5748_v26 = vpop.f32.mrf.mxu2  ;;  %v5904_v49 = vpop.f32.mrf.mxu1 }
0x15b4   : > { %v8857_v61 = vadd.f32 %v5681_v60, %v5653_v52  ;;  %v5789_v62 = vpop.f32.mrf.mxu3 }
0x15b5   : > { %v5790_v3 = vadd.f32 %v5789_v62, %v5748_v26 }
0x15b9   : > { %v5879_v29 = vpop.f32.mrf.mxu0 }
0x15ba   : > { %v5819_v63 = vpop.f32.mrf.mxu2 }
0x15bb   : > { %v5820_v4 = vadd.f32 %v5819_v63, %v5790_v3 }
0x15bc   : > { %v5846_v7 = vpop.f32.mrf.mxu3 }
0x15bd   : > { %v5847_v41 = vadd.f32 %v5846_v7, %v5820_v4 }
0x15bf   : > { %v5880_v0 = vadd.f32 %v5879_v29, %v5847_v41 }
0x15c1   : > { %v5905_v53 = vadd.f32 %v5904_v49, %v5880_v0 }
0x15c3   : > { %v5908_v13 = vsel %vm1258_vm0, %v5905_v53, 0 }
0x15c4   : > { %v5930_v55 = vand.u32 4294901760, %v5908_v13 }
0x15c6   : > { %v5931_v31 = vsub.f32 %v5908_v13, %v5930_v55  ;;  %5961 = vmatmul.f32.vlgmr.msrb.gmra.mxu3 %v5930_v55 }
0x15c7   : > { %6170 = vmatpush.msrb.mxu3 %v8828_v16 }
0x15c8   : > { %v5932_v9 = vand.u32 4294901760, %v5931_v31  ;;  %5985 = vmatmul.f32.vlgmr.msra.gmra.mxu0 %v5931_v31 }
0x15c9   : > { %6196 = vmatpush.msra.mxu0 %v6121_v58 }
0x15ca   : > { %v5933_v59 = vsub.f32 %v5931_v31, %v5932_v9  ;;  %6009 = vmatmul.f32.vlgmr.msra.gmra.mxu1 %v5932_v9 }
0x15cb   : > { %6218 = vmatpush.msra.mxu1 %v8828_v16 }
0x15cc   : > { %v5934_v11 = vand.u32 4294901760, %v5933_v59 }
0x15ce   : > { %5935 = vmatmul.f32.vlgmr.msrb.gmra.mxu2 %v5934_v11  ;;  %6055 = vmatmul.f32.vlgmr.msra.gmra.mxu3 %v5930_v55 }
0x15cf   : > { %6147 = vmatpush.msrb.mxu2 %v8834_v36 }
0x15d6   : > { %6033 = vmatmul.f32.vlgmr.msra.gmra.mxu2 %v5930_v55 }
0x1645   : > { %v5986_v35 = vpop.f32.mrf.mxu0 }
0x1647   : > { %v6010_v17 = vpop.f32.mrf.mxu1 }
0x1649   : > { %v5962_v39 = vpop.f32.mrf.mxu3 }
0x1651   : > { %v5936_v2 = vpop.f32.mrf.mxu2  ;;  %v6056_v58 = vpop.f32.mrf.mxu3 }
0x1652   : > { %v5963_v40 = vadd.f32 %v5962_v39, %v5936_v2 }
0x1654   : > { %v5987_v5 = vadd.f32 %v5986_v35, %v5963_v40 }
0x1656   : > { %v6011_v45 = vadd.f32 %v6010_v17, %v5987_v5 }
0x1659   : > { %v6034_v37 = vpop.f32.mrf.mxu2 }
0x165a   : > { %v6035_v25 = vadd.f32 %v6034_v37, %v6011_v45 }
0x165c   : > { %v6057_v32 = vadd.f32 %v6056_v58, %v6035_v25 }
0x165e   : > { %v6059_v24 = vmul.f32 0.25, %v6057_v32 }
0x1660   : > { %v6060_v16 = vsel %vm8286_vm4, %v6059_v24, -1e+09 }
0x1661   : > { %v6061_v44 = vsel %vm4400_vm8, %v6060_v16, -inf }
0x1662   : > { %6062 = vmax.xlane.f32.xlu0 %v6061_v44 }
0x1676   : > { %6226 = vrot.lane.b32.xlu0 %v8673_v57, %s7829_s13 }
0x16d5   : > { %v6063_v36 = vpop.xlane.xlu0 %6062 }
0x16d6   : > { %v6064_v51 = vsub.f32 %v6060_v16, %v6063_v36 }
0x16d8   : > { %v6065_v1 = vmul.f32 1.442695, %v6064_v51 }
0x16da   : > { %7737 = vpow2.f32 %v6065_v1 }
0x16e0   : > { %v7738_v19 = vpop.eup %7737 }
0x16e1   : > { %v6067_v54 = vsel %vm4400_vm8, %v7738_v19, 0.0 }
0x16e2   : > { %6068 = vadd.xlane.f32.xlu1 %v6067_v54 }
0x16e8   : > { %v6227_v52 = vpop.permute.xlu0 %6226 }
0x16e9   : > { %v6230_v26 = vsel %vm1258_vm0, %v6227_v52, 0 }
0x16ea   : > { %v6247_v60 = vand.u32 4294901760, %v6230_v26 }
0x16ec   : > { %v6274_v62 = vsub.f32 %v6230_v26, %v6247_v60  ;;  %6248 = vmatpush.xpose.msra.mxu2 %v6247_v60 }
0x16ee   : > { %v6275_v3 = vand.u32 4294901760, %v6274_v62 }
0x16f0   : > { %v6276_v63 = vsub.f32 %v6274_v62, %v6275_v3 }
0x16f2   : > { %v6277_v4 = vand.u32 4294901760, %v6276_v63 }
0x16f4   : > { %6278 = vmatpush.xpose.msra.mxu3 %v6277_v4 }
0x16fb   : > { %6224 = vrot.lane.b32.xlu1 %v5905_v53, %s7829_s13  ;;  %s7837_s13 = smov [#allocation6]  }
0x16fc   : > { %s7388_s24 = sshll.u32 %s7837_s13, 4  ;;  %s7389_s24 = int_to_ptr.vmem [resolvable:$true] %s7388_s24 }
0x1703   : > { %6391 = vrot.lane.b32.xlu1 %v8673_v57, %s7827_s5  ;;  %s9102_s5 = sld [smem:[#allocation29_spill]] }
0x1709   : > { %s7390_s23 = sshll.u32 %s9102_s5, 4  ;;  %s7391_s23 = int_to_ptr.hbm [resolvable:$true] %s7390_s23 }
0x1755   : > { %v6069_v7 = vpop.xlane.xlu1 %6068 }
0x1756   : > { %7739 = vrcp.f32 %v6069_v7 }
0x175c   : > { %v7740_v29 = vpop.eup %7739 }
0x175d   : > { %v6071_v41 = vmul.f32 %v7740_v29, %v7738_v19 }
0x175f   : > { %v6076_v49 = vsel %vm1415_vm3, %v6071_v41, 0 }
0x1760   : > { %v6095_v0 = vand.u32 4294901760, %v6076_v49 }
0x1762   : > { %v6096_v13 = vsub.f32 %v6076_v49, %v6095_v0  ;;  %6126 = vmatmul.f32.vlgmr.msrb.gmra.mxu1 %v6095_v0 }
0x1763   : > { %6324 = vmatpush.xpose.msrb.mxu1 %v6247_v60 }
0x1764   : > { %6150 = vmatmul.f32.vlgmr.msrb.gmra.mxu2 %v6096_v13  ;;  %v6097_v55 = vand.u32 4294901760, %v6096_v13 }
0x1765   : > { %6350 = vmatpush.xpose.msrb.mxu2 %v6275_v3 }
0x1766   : > { %6174 = vmatmul.f32.vlgmr.msrb.gmra.mxu3 %v6097_v55  ;;  %v6098_v31 = vsub.f32 %v6096_v13, %v6097_v55 }
0x1767   : > { %6372 = vmatpush.xpose.msrb.mxu3 %v6247_v60 }
0x1768   : > { %v6099_v53 = vand.u32 4294901760, %v6098_v31 }
0x176a   : > { %6100 = vmatmul.f32.vlgmr.msrb.gmra.mxu0 %v6099_v53  ;;  %6220 = vmatmul.f32.vlgmr.msra.gmra.mxu1 %v6095_v0 }
0x176b   : > { %6301 = vmatpush.xpose.msrb.mxu0 %v6274_v62 }
0x176d   : > { %v6225_v57 = vpop.permute.xlu1 %6224 }
0x176e   : > { %v6228_v9 = vsel %vm1258_vm0, %v6225_v57, 0 }
0x176f   : > { %v6249_v59 = vand.u32 4294901760, %v6228_v9 }
0x1771   : > { %v6250_v11 = vsub.f32 %v6228_v9, %v6249_v59  ;;  %6280 = vmatmul.f32.vlgmr.msra.gmra.mxu3 %v6249_v59 }
0x1772   : > { %6198 = vmatmul.f32.vlgmr.msra.gmra.mxu0 %v6095_v0 }
0x1773   : > { %v6251_v39 = vand.u32 4294901760, %v6250_v11 }
0x1775   : > { %v6252_v2 = vsub.f32 %v6250_v11, %v6251_v39  ;;  %v6392_v40 = vpop.permute.xlu1 %6391  ;;  %6328 = vmatmul.f32.vlgmr.msrb.gmra.mxu1 %v6251_v39 }
0x1776   : > { %v6412_v35 = vand.u32 4294901760, %v6392_v40 }
0x1777   : > { %v6253_v5 = vand.u32 4294901760, %v6252_v2 }
0x1778   : > { %v6439_v17 = vsub.f32 %v6392_v40, %v6412_v35  ;;  %6413 = vmatpush.msra.mxu0 %v6412_v35  ;;  %6489 = vmatpush.msra.mxu3 %v6412_v35 }
0x1779   : > { %6254 = vmatmul.f32.vlgmr.msra.gmra.mxu2 %v6253_v5  ;;  %6374 = vmatmul.f32.vlgmr.msrb.gmra.mxu3 %v6249_v59 }
0x177a   : > { %v6440_v45 = vand.u32 4294901760, %v6439_v17  ;;  %6304 = vmatmul.f32.vlgmr.msrb.gmra.mxu0 %v6250_v11  ;;  %6466 = vmatpush.msra.mxu2 %v6439_v17 }
0x177b   : > { %6592 = vmatpush.msrb.mxu3 %v8613_v27 }
0x177c   : > { %v6441_v37 = vsub.f32 %v6439_v17, %v6440_v45  ;;  %6515 = vmatpush.msrb.mxu0 %v6440_v45 }
0x177d   : > { %6598 = vmatpush.msrb.mxu3 %v8619_v38 }
0x177e   : > { %v6442_v25 = vand.u32 4294901760, %v6441_v37 }
0x1780   : > { %6443 = vmatpush.msra.mxu1 %v6442_v25 }
0x1781   : > { %6352 = vmatmul.f32.vlgmr.msrb.gmra.mxu2 %v6249_v59  ;;  %v5684_v59 = vadd.f32 %v8857_v61, %v8701_v21 }
0x1782   : > { %6537 = vmatpush.msrb.mxu1 %v6412_v35  ;;  %6561 = vmatpush.msrb.mxu2 %v8587_v23 }
0x1783   : > { %v5685_v11 = vsel %vm5208_vm2, %v5684_v59, 0.0 }
0x1784   : > { %6563 = vmatpush.msrb.mxu2 %v8593_v12 }
0x17df   : > { %v6127_v58 = vpop.f32.mrf.mxu1 }
0x17e7   : > { %v6101_v32 = vpop.f32.mrf.mxu0  ;;  %v6151_v16 = vpop.f32.mrf.mxu2 }
0x17e8   : > { %v6128_v24 = vadd.f32 %v6127_v58, %v6101_v32  ;;  %v6221_v19 = vpop.f32.mrf.mxu1 }
0x17e9   : > { %v6175_v36 = vpop.f32.mrf.mxu3 }
0x17ea   : > { %v6152_v44 = vadd.f32 %v6151_v16, %v6128_v24 }
0x17ec   : > { %v6176_v51 = vadd.f32 %v6175_v36, %v6152_v44 }
0x17ef   : > { %v6199_v27 = vpop.f32.mrf.mxu0 }
0x17f0   : > { %v6200_v1 = vadd.f32 %v6199_v27, %v6176_v51 }
0x17f2   : > { %v8879_v54 = vadd.f32 %v6221_v19, %v6200_v1  ;;  %v6329_v3 = vpop.f32.mrf.mxu1  ;;  %v5707_v19 = vperm.slane %v8689_v34, 3 }
0x17f4   : > { %v6281_v38 = vpop.f32.mrf.mxu3  ;;  %v6706_v27 = vsel %vm1258_vm0, %v8879_v54, 0 }
0x17f7   : > { %v6305_v60 = vpop.f32.mrf.mxu0 }
0x17fc   : > { %v6255_v52 = vpop.f32.mrf.mxu2  ;;  %v6375_v29 = vpop.f32.mrf.mxu3 }
0x17fd   : > { %v6282_v26 = vadd.f32 %v6281_v38, %v6255_v52 }
0x17ff   : > { %v6306_v62 = vadd.f32 %v6305_v60, %v6282_v26  ;;  %v6726_v60 = vand.u32 4294901760, %v6706_v27 }
0x1801   : > { %v6330_v63 = vadd.f32 %v6329_v3, %v6306_v62  ;;  %v6727_v54 = vsub.f32 %v6706_v27, %v6726_v60 }
0x1804   : > { %v6353_v4 = vpop.f32.mrf.mxu2 }
0x1805   : > { %v6354_v7 = vadd.f32 %v6353_v4, %v6330_v63  ;;  %v5709_v63 = vperm.slane %v8693_v6, 3 }
0x1807   : > { %v6376_v41 = vadd.f32 %v6375_v29, %v6354_v7 }
0x1809   : > { %v6378_v49 = vmul.f32 0.25, %v6376_v41 }
0x180b   : > { %v6379_v0 = vsel %vm8286_vm4, %v6378_v49, -1e+09 }
0x180c   : > { %v6380_v13 = vsel %vm4400_vm8, %v6379_v0, -inf }
0x180d   : > { %6381 = vmax.xlane.f32.xlu0 %v6380_v13 }
0x1880   : > { %v6382_v55 = vpop.xlane.xlu0 %6381 }
0x1881   : > { %v6383_v31 = vsub.f32 %v6379_v0, %v6382_v55  ;;  %v6728_v55 = vand.u32 4294901760, %v6727_v54 }
0x1883   : > { %v6384_v53 = vmul.f32 1.442695, %v6383_v31 }
0x1885   : > { %7741 = vpow2.f32 %v6384_v53 }
0x188b   : > { %v7742_v57 = vpop.eup %7741 }
0x188c   : > { %v6386_v9 = vsel %vm4400_vm8, %v7742_v57, 0.0 }
0x188d   : > { %6387 = vadd.xlane.f32.xlu2 %v6386_v9 }
0x1895   : > { %5686 = vadd.xlane.f32.xlu2 %v5685_v11 }
0x1900   : > { %v6388_v39 = vpop.xlane.xlu2 %6387 }
0x1901   : > { %7743 = vrcp.f32 %v6388_v39 }
0x1907   : > { %v7744_v30 = vpop.eup %7743 }
0x1908   : > { %v6390_v2 = vmul.f32 %v7744_v30, %v7742_v57  ;;  %v5687_v40 = vpop.xlane.xlu2 %5686  ;;  %v6729_v57 = vsub.f32 %v6727_v54, %v6728_v55 }
0x1909   : > { %v5688_v35 = vmul.f32 %v5687_v40, %v8337_v50 }
0x190a   : > { %v6395_v5 = vsel %vm1415_vm3, %v6390_v2, 0  ;;  %v6730_v11 = vand.u32 4294901760, %v6729_v57 }
0x190b   : > { %v6414_v17 = vand.u32 4294901760, %v6395_v5  ;;  %v5689_v45 = vsub.f32 %v5684_v59, %v5688_v35 }
0x190d   : > { %v6415_v37 = vsub.f32 %v6395_v5, %v6414_v17  ;;  %6445 = vmatmul.f32.vlgmr.msra.gmra.mxu1 %v6414_v17  ;;  %v5690_v25 = vmul.f32 %v5689_v45, %v5689_v45 }
0x190e   : > { %6645 = vmatpush.msra.mxu1 %v8587_v23 }
0x190f   : > { %6469 = vmatmul.f32.vlgmr.msra.gmra.mxu2 %v6415_v37  ;;  %v5691_v21 = vsel %vm5208_vm2, %v5690_v25, 0.0  ;;  %v6416_v61 = vand.u32 4294901760, %v6415_v37 }
0x1910   : > { %5692 = vadd.xlane.f32.xlu2 %v5691_v21  ;;  %6647 = vmatpush.msra.mxu1 %v8593_v12 }
0x1911   : > { %6493 = vmatmul.f32.vlgmr.msra.gmra.mxu3 %v6416_v61  ;;  %v6417_v58 = vsub.f32 %v6415_v37, %v6416_v61  ;;  %6672 = vmatpush.msra.mxu2 %v8598_v20 }
0x1912   : > { %6697 = vmatpush.msra.mxu3 %v8587_v23 }
0x1913   : > { %v6418_v32 = vand.u32 4294901760, %v6417_v58  ;;  %6676 = vmatpush.msra.mxu2 %v8609_v22 }
0x1914   : > { %6699 = vmatpush.msra.mxu3 %v8593_v12 }
0x1915   : > { %6419 = vmatmul.f32.vlgmr.msra.gmra.mxu0 %v6418_v32  ;;  %6539 = vmatmul.f32.vlgmr.msrb.gmra.mxu1 %v6414_v17 }
0x1916   : > { %6620 = vmatpush.msra.mxu0 %v8591_v28  ;;  %6754 = vmatpush.msrb.mxu1 %v8646_v46 }
0x1918   : > { %6623 = vmatpush.msra.mxu0 %v8601_v15  ;;  %6760 = vmatpush.msrb.mxu1 %v8651_v48 }
0x191d   : > { %6517 = vmatmul.f32.vlgmr.msrb.gmra.mxu0 %v6414_v17 }
0x191e   : > { %6723 = vmatpush.msrb.mxu0 %v8623_v43 }
0x1920   : > { %6725 = vmatpush.msrb.mxu0 %v8628_v42 }
0x1983   : > { %v5693_v23 = vpop.xlane.xlu2 %5692 }
0x1984   : > { %v5694_v20 = vmul.f32 %v5693_v23, %v8337_v50 }
0x1986   : > { %v5695_v22 = vadd.f32 1e-06, %v5694_v20 }
0x1988   : > { %7745 = vrsqrt.f32 %v5695_v22  ;;  %vm5702_vm4 = vweird.f32 %v5695_v22 }
0x198a   : > { %v6446_v28 = vpop.f32.mrf.mxu1 }
0x198e   : > { %v7746_v12 = vpop.eup %7745 }
0x198f   : > { %v5697_v24 = vmul.f32 %v7746_v12, %v5695_v22  ;;  %vm5703_vm3 = vweird.f32 %v7746_v12 }
0x1990   : > { %vm5704_vm13 = vmor %vm5702_vm4, %vm5703_vm3 }
0x1991   : > { %v5698_v16 = vmul.f32 %v7746_v12, %v5697_v24 }
0x1992   : > { %v6420_v44 = vpop.f32.mrf.mxu0  ;;  %v6470_v15 = vpop.f32.mrf.mxu2 }
0x1993   : > { %v5699_v46 = vmul.f32 0.5, %v5698_v16  ;;  %v6447_v36 = vadd.f32 %v6446_v28, %v6420_v44  ;;  %v6540_v29 = vpop.f32.mrf.mxu1 }
0x1994   : > { %v6494_v38 = vpop.f32.mrf.mxu3 }
0x1995   : > { %v5700_v51 = vsub.f32 1.5, %v5699_v46  ;;  %v6471_v48 = vadd.f32 %v6470_v15, %v6447_v36  ;;  %v6895_v15 = vld [vmem:[%s8011_s28 + $0x18] sm:$0xff] }
0x1997   : > { %v5701_v1 = vmul.f32 %v7746_v12, %v5700_v51  ;;  %v6495_v26 = vadd.f32 %v6494_v38, %v6471_v48  ;;  %v6915_v51 = vand.u32 4294901760, %v6895_v15  ;;  %v6894_v48 = vld [vmem:[%s8011_s28 + $0x10] sm:$0xff] }
0x1998   : > { %v6917_v27 = vand.u32 4294901760, %v6894_v48 }
0x1999   : > { %v5705_v52 = vsel %vm5704_vm13, %v7746_v12, %v5701_v1  ;;  %v6893_v1 = vld [vmem:[%s8011_s28 + $0x8] sm:$0xff] }
0x199a   : > { %v5706_v62 = vmul.f32 %v5705_v52, %v5689_v45  ;;  %v6518_v3 = vpop.f32.mrf.mxu0  ;;  %v6951_v52 = vsub.f32 %v6894_v48, %v6917_v27 }
0x199b   : > { %v6519_v4 = vadd.f32 %v6518_v3, %v6495_v26  ;;  %v6919_v26 = vand.u32 4294901760, %v6893_v1 }
0x199c   : > { %v5708_v7 = vmul.f32 %v5707_v19, %v5706_v62  ;;  %v6952_v3 = vand.u32 4294901760, %v6951_v52 }
0x199d   : > { %v6541_v41 = vadd.f32 %v6540_v29, %v6519_v4  ;;  %v6957_v4 = vsub.f32 %v6893_v1, %v6919_v26 }
0x199e   : > { %v5710_v49 = vadd.f32 %v5709_v63, %v5708_v7 }
0x199f   : > { %v6544_v0 = vsel %vm1258_vm0, %v6541_v41, 0  ;;  %v6953_v41 = vsub.f32 %v6951_v52, %v6952_v3 }
0x19a0   : > { %v6564_v13 = vand.u32 4294901760, %v6544_v0  ;;  %5711 = vst.msk [vmem:[#allocation3] sm:$0xf] %vm5208_vm2, %v5710_v49 }
0x19a1   : > { %5712 = vst.msk [vmem:[#allocation6] sm:$0xf] %vm5208_vm2, %v5710_v49 }
0x19a2   : > { %v6565_v31 = vsub.f32 %v6544_v0, %v6564_v13  ;;  %6600 = vmatmul.f32.vlgmr.msrb.gmra.mxu3 %v6564_v13  ;;  %v6954_v0 = vand.u32 4294901760, %v6953_v41 }
0x19a3   : > { %6807 = vmatpush.msrb.mxu3 %v8623_v43 }
0x19a4   : > { %v6566_v53 = vand.u32 4294901760, %v6565_v31  ;;  %6626 = vmatmul.f32.vlgmr.msra.gmra.mxu0 %v6565_v31 }
0x19a5   : > { %6809 = vmatpush.msrb.mxu3 %v8628_v42  ;;  %6834 = vmatpush.msra.mxu0 %v8636_v14 }
0x19a6   : > { %v6567_v9 = vsub.f32 %v6565_v31, %v6566_v53  ;;  %6651 = vmatmul.f32.vlgmr.msra.gmra.mxu1 %v6566_v53 }
0x19a7   : > { %6838 = vmatpush.msra.mxu0 %v8644_v33  ;;  %6859 = vmatpush.msra.mxu1 %v8623_v43 }
0x19a8   : > { %v6568_v59 = vand.u32 4294901760, %v6567_v9 }
0x19a9   : > { %6861 = vmatpush.msra.mxu1 %v8628_v42 }
0x19aa   : > { %6569 = vmatmul.f32.vlgmr.msrb.gmra.mxu2 %v6568_v59  ;;  %6701 = vmatmul.f32.vlgmr.msra.gmra.mxu3 %v6564_v13 }
0x19ab   : > { %6782 = vmatpush.msrb.mxu2 %v8631_v47 }
0x19ac   : > { %6731 = vmatmul.f32.vlgmr.msrb.gmra.mxu0 %v6730_v11 }
0x19ad   : > { %6785 = vmatpush.msrb.mxu2 %v8639_v18 }
0x19ae   : > { %6762 = vmatmul.f32.vlgmr.msrb.gmra.mxu1 %v6726_v60 }
0x19af   : > { %7016 = vmatpush.msrb.mxu1 %v6915_v51 }
0x19b1   : > { %7018 = vmatpush.msrb.mxu1 %v6917_v27 }
0x19b2   : > { %6678 = vmatmul.f32.vlgmr.msra.gmra.mxu2 %v6564_v13  ;;  %6813 = vmatmul.f32.vlgmr.msrb.gmra.mxu3 %v6728_v55 }
0x19b3   : > { %6916 = vmatpush.msra.mxu2 %v6915_v51  ;;  %7020 = vmatpush.msrb.mxu1 %v6919_v26 }
0x19b4   : > { %6840 = vmatmul.f32.vlgmr.msra.gmra.mxu0 %v6726_v60 }
0x19b5   : > { %6918 = vmatpush.msra.mxu2 %v6917_v27 }
0x19b6   : > { %6863 = vmatmul.f32.vlgmr.msra.gmra.mxu1 %v6726_v60  ;;  %v6892_v60 = vld [vmem:[%s8011_s28] sm:$0xff]  ;;  %s9101_s28 = sld [smem:[#allocation28_spill]] }
0x19b7   : > { %v6921_v7 = vand.u32 4294901760, %v6892_v60  ;;  %6920 = vmatpush.msra.mxu2 %v6919_v26 }
0x19b9   : > { %v6963_v49 = vsub.f32 %v6892_v60, %v6921_v7  ;;  %7022 = vmatpush.msrb.mxu1 %v6921_v7  ;;  %6922 = vmatpush.msra.mxu2 %v6921_v7 }
0x19ba   : > { %6788 = vmatmul.f32.vlgmr.msrb.gmra.mxu2 %v6727_v54  ;;  %v6958_v54 = vand.u32 4294901760, %v6957_v4 }
0x19bb   : > { %v6964_v55 = vand.u32 4294901760, %v6963_v49 }
0x19bc   : > { %v6959_v13 = vsub.f32 %v6957_v4, %v6958_v54 }
0x19bd   : > { %v6965_v53 = vsub.f32 %v6963_v49, %v6964_v55 }
0x19be   : > { %v6960_v31 = vand.u32 4294901760, %v6959_v13 }
0x19bf   : > { %v6966_v57 = vand.u32 4294901760, %v6965_v53 }
0x1a21   : > { %v6627_v33 = vpop.f32.mrf.mxu0 }
0x1a23   : > { %v6652_v30 = vpop.f32.mrf.mxu1 }
0x1a25   : > { %v6601_v14 = vpop.f32.mrf.mxu3 }
0x1a29   : > { %v6732_v47 = vpop.f32.mrf.mxu0 }
0x1a2b   : > { %v6763_v45 = vpop.f32.mrf.mxu1 }
0x1a2d   : > { %v6570_v43 = vpop.f32.mrf.mxu2  ;;  %v6702_v40 = vpop.f32.mrf.mxu3 }
0x1a2e   : > { %v6602_v39 = vadd.f32 %v6601_v14, %v6570_v43 }
0x1a30   : > { %v6628_v42 = vadd.f32 %v6627_v33, %v6602_v39 }
0x1a31   : > { %v6841_v32 = vpop.f32.mrf.mxu0 }
0x1a32   : > { %v6653_v2 = vadd.f32 %v6652_v30, %v6628_v42 }
0x1a33   : > { %v6864_v20 = vpop.f32.mrf.mxu1 }
0x1a35   : > { %v6679_v35 = vpop.f32.mrf.mxu2  ;;  %v6814_v61 = vpop.f32.mrf.mxu3 }
0x1a36   : > { %v6680_v5 = vadd.f32 %v6679_v35, %v6653_v2 }
0x1a38   : > { %v6703_v17 = vadd.f32 %v6702_v40, %v6680_v5 }
0x1a3a   : > { %v6733_v18 = vadd.f32 %v6732_v47, %v6703_v17 }
0x1a3c   : > { %v6764_v37 = vadd.f32 %v6763_v45, %v6733_v18 }
0x1a3d   : > { %v6789_v25 = vpop.f32.mrf.mxu2 }
0x1a3e   : > { %v6790_v21 = vadd.f32 %v6789_v25, %v6764_v37 }
0x1a40   : > { %v6815_v58 = vadd.f32 %v6814_v61, %v6790_v21 }
0x1a42   : > { %v6842_v23 = vadd.f32 %v6841_v32, %v6815_v58  ;;  %v7094_v32 = vld [vmem:[%s8022_s6 + $0x28] sm:$0xff] }
0x1a44   : > { %v6865_v22 = vadd.f32 %v6864_v20, %v6842_v23 }
0x1a46   : > { %v6867_v12 = vadd.f32 %v6865_v22, %v8821_v8  ;;  %v6945_v8 = vsub.f32 %v6895_v15, %v6915_v51  ;;  %v8961_v22 = vand.u32 4294901760, %v7094_v32 }
0x1a48   : > { %v6868_v24 = vsel %vm5208_vm2, %v6867_v12, 0.0  ;;  %v6946_v38 = vand.u32 4294901760, %v6945_v8  ;;  %6987 = vmatpush.msrb.mxu0 %v6945_v8 }
0x1a49   : > { %6869 = vadd.xlane.f32.xlu1 %v6868_v24 }
0x1a4a   : > { %v6947_v62 = vsub.f32 %v6945_v8, %v6946_v38  ;;  %6990 = vmatpush.msrb.mxu0 %v6951_v52  ;;  %7045 = vmatpush.msrb.mxu2 %v6946_v38 }
0x1a4c   : > { %v6948_v29 = vand.u32 4294901760, %v6947_v62  ;;  %6993 = vmatpush.msrb.mxu0 %v6957_v4  ;;  %7049 = vmatpush.msrb.mxu2 %v6952_v3  ;;  %v7090_v62 = vld [vmem:[%s8022_s6 + $0x8] sm:$0xff] }
0x1a4e   : > { %6949 = vmatpush.msra.mxu3 %v6948_v29  ;;  %6996 = vmatpush.msrb.mxu0 %v6963_v49  ;;  %v7124_v29 = vand.u32 4294901760, %v7090_v62 }
0x1a4f   : > { %7053 = vmatpush.msrb.mxu2 %v6958_v54  ;;  %v7089_v54 = vld [vmem:[%s8022_s6] sm:$0xff] }
0x1a50   : > { %6955 = vmatpush.msra.mxu3 %v6954_v0  ;;  %v7182_v13 = vsub.f32 %v7090_v62, %v7124_v29 }
0x1a51   : > { %7057 = vmatpush.msrb.mxu2 %v6964_v55  ;;  %v7126_v55 = vand.u32 4294901760, %v7089_v54 }
0x1a52   : > { %6961 = vmatpush.msra.mxu3 %v6960_v31 }
0x1a54   : > { %6967 = vmatpush.msra.mxu3 %v6966_v57  ;;  %v7183_v57 = vand.u32 4294901760, %v7182_v13 }
0x1a56   : > { %7076 = vmatpush.msrb.mxu3 %v6915_v51 }
0x1a58   : > { %7078 = vmatpush.msrb.mxu3 %v6917_v27  ;;  %v7091_v27 = vld [vmem:[%s8022_s6 + $0x10] sm:$0xff] }
0x1a5a   : > { %7080 = vmatpush.msrb.mxu3 %v6919_v26  ;;  %v7122_v26 = vand.u32 4294901760, %v7091_v27 }
0x1a5c   : > { %7082 = vmatpush.msrb.mxu3 %v6921_v7  ;;  %v7176_v7 = vsub.f32 %v7091_v27, %v7122_v26 }
0x1a5e   : > { %v7177_v0 = vand.u32 4294901760, %v7176_v7 }
0x1a60   : > { %v7178_v53 = vsub.f32 %v7176_v7, %v7177_v0 }
0x1abc   : > { %v6870_v16 = vpop.xlane.xlu1 %6869 }
0x1abd   : > { %v6871_v28 = vmul.f32 %v6870_v16, %v8337_v50 }
0x1abf   : > { %v8926_v44 = vsub.f32 %v6867_v12, %v6871_v28  ;;  %v7093_v12 = vld [vmem:[%s8022_s6 + $0x20] sm:$0xff]  ;;  %v8970_v28 = vsub.f32 %v7094_v32, %v8961_v22 }
0x1ac1   : > { %v6873_v46 = vmul.f32 %v8926_v44, %v8926_v44  ;;  %v7159_v51 = vand.u32 4294901760, %v8970_v28 }
0x1ac3   : > { %v6874_v36 = vsel %vm5208_vm2, %v6873_v46, 0.0  ;;  %v7092_v46 = vld [vmem:[%s8022_s6 + $0x18] sm:$0xff]  ;;  %v7160_v38 = vsub.f32 %v8970_v28, %v7159_v51 }
0x1ac4   : > { %6875 = vadd.xlane.f32.xlu0 %v6874_v36  ;;  %v7120_v8 = vand.u32 4294901760, %v7092_v46 }
0x1ac5   : > { %v7161_v3 = vand.u32 4294901760, %v7160_v38 }
0x1ac6   : > { %v7170_v60 = vsub.f32 %v7092_v46, %v7120_v8 }
0x1ac8   : > { %v7171_v41 = vand.u32 4294901760, %v7170_v60 }
0x1aca   : > { %v7172_v31 = vsub.f32 %v7170_v60, %v7171_v41 }
0x1b37   : > { %v6876_v9 = vpop.xlane.xlu0 %6875 }
0x1b38   : > { %v6877_v59 = vmul.f32 %v6876_v9, %v8337_v50  ;;  %v7188_v9 = vsub.f32 %v7089_v54, %v7126_v55 }
0x1b3a   : > { %v6878_v11 = vadd.f32 1e-06, %v6877_v59  ;;  %v7173_v59 = vand.u32 4294901760, %v7172_v31 }
0x1b3c   : > { %7747 = vrsqrt.f32 %v6878_v11  ;;  %vm6885_vm14 = vweird.f32 %v6878_v11 }
0x1b42   : > { %v7748_v14 = vpop.eup %7747 }
0x1b43   : > { %v6880_v33 = vmul.f32 %v7748_v14, %v6878_v11  ;;  %vm6886_vm0 = vweird.f32 %v7748_v14  ;;  %v7179_v11 = vand.u32 4294901760, %v7178_v53 }
0x1b44   : > { %vm6887_vm1 = vmor %vm6885_vm14, %vm6886_vm0 }
0x1b45   : > { %v6881_v43 = vmul.f32 %v7748_v14, %v6880_v33  ;;  %v7189_v33 = vand.u32 4294901760, %v7188_v9 }
0x1b47   : > { %v6882_v39 = vmul.f32 0.5, %v6881_v43 }
0x1b49   : > { %v6883_v30 = vsub.f32 1.5, %v6882_v39  ;;  %v7190_v39 = vsub.f32 %v7188_v9, %v7189_v33 }
0x1b4b   : > { %v6884_v42 = vmul.f32 %v7748_v14, %v6883_v30  ;;  %v7191_v30 = vand.u32 4294901760, %v7190_v39 }
0x1b4d   : > { %v6888_v2 = vsel %vm6887_vm1, %v7748_v14, %v6884_v42  ;;  %v7184_v14 = vsub.f32 %v7182_v13, %v7183_v57  ;;  %v7699_v42 = vld [vmem:[%s8017_s29] ss:$0 sm:$0xff]  ;;  %s7376_s29 = sshll.u32 %s9101_s28, 4  ;;  %s7377_s29 = int_to_ptr.hbm [resolvable:$true] %s7376_s29 }
0x1b4e   : > { %v6889_v40 = vmul.f32 %v6888_v2, %v8926_v44  ;;  %v8972_v44 = vand.u32 4294901760, %v7093_v12 }
0x1b4f   : > { %v7185_v43 = vand.u32 4294901760, %v7184_v14 }
0x1b50   : > { %v6890_v35 = vmul.f32 %v6889_v40, %v5231_v10  ;;  %v7096_v10 = vld [vmem:[%s8022_s6 + $0x38] sm:$0xff]  ;;  %v7164_v48 = vsub.f32 %v7093_v12, %v8972_v44 }
0x1b51   : > { %v8946_v21 = vand.u32 4294901760, %v7096_v10 }
0x1b52   : > { %v8941_v5 = vadd.f32 %v6890_v35, %v5233_v56  ;;  %v7095_v56 = vld [vmem:[%s8022_s6 + $0x30] sm:$0xff]  ;;  %v7165_v52 = vand.u32 4294901760, %v7164_v48  ;;  %s7835_s6 = smov 128  }
0x1b53   : > { %v8950_v61 = vsub.f32 %v7096_v10, %v8946_v21  ;;  %v8952_v58 = vand.u32 4294901760, %v7095_v56  ;;  %7113 = vmatpush.msra.mxu0 %v8946_v21 }
0x1b54   : > { %v6901_v47 = vsel %vm1028_vm15, %v8941_v5, 0  ;;  %v7166_v4 = vsub.f32 %v7164_v48, %v7165_v52 }
0x1b55   : > { %v6923_v17 = vand.u32 4294901760, %v6901_v47  ;;  %v7147_v23 = vand.u32 4294901760, %v8950_v61  ;;  %v8959_v20 = vsub.f32 %v7095_v56, %v8952_v58  ;;  %7115 = vmatpush.msra.mxu0 %v8952_v58 }
0x1b56   : > { %v7167_v49 = vand.u32 4294901760, %v7166_v4 }
0x1b57   : > { %6969 = vmatmul.f32.vlgmr.msra.gmra.mxu3 %v6923_v17  ;;  %v6924_v45 = vsub.f32 %v6901_v47, %v6923_v17  ;;  %v7148_v24 = vsub.f32 %v8950_v61, %v7147_v23  ;;  %v7153_v16 = vand.u32 4294901760, %v8959_v20  ;;  %7117 = vmatpush.msra.mxu0 %v8961_v22 }
0x1b58   : > { %7245 = vmatpush.msra.mxu3 %v8946_v21 }
0x1b59   : > { %6999 = vmatmul.f32.vlgmr.msrb.gmra.mxu0 %v6924_v45  ;;  %v6925_v18 = vand.u32 4294901760, %v6924_v45  ;;  %v7149_v36 = vand.u32 4294901760, %v7148_v24  ;;  %v7154_v15 = vsub.f32 %v8959_v20, %v7153_v16  ;;  %v7700_v24 = vld [vmem:[%s8028_s7] ss:$0 sm:$0xff]  ;;  %s7836_s7 = smov 8  }
0x1b5a   : > { %7247 = vmatpush.msra.mxu3 %v8952_v58  ;;  %7119 = vmatpush.msra.mxu0 %v8972_v44  ;;  %7651 = dma.vmem_to_hbm [thread:$0]  (%p7658_p5), %s7375_s22, 256, %s7377_s29, [#allocation5], %s7835_s6, %s7835_s6, %s7836_s7  }
0x1b5b   : > { %7026 = vmatmul.f32.vlgmr.msrb.gmra.mxu1 %v6925_v18  ;;  %v6926_v37 = vsub.f32 %v6924_v45, %v6925_v18  ;;  %v7155_v1 = vand.u32 4294901760, %v7154_v15 }
0x1b5c   : > { %7249 = vmatpush.msra.mxu3 %v8961_v22  ;;  %7150 = vmatpush.msra.mxu1 %v7149_v36 }
0x1b5d   : > { %v6927_v25 = vand.u32 4294901760, %v6926_v37  ;;  %7121 = vmatpush.msra.mxu0 %v7120_v8 }
0x1b5e   : > { %7251 = vmatpush.msra.mxu3 %v8972_v44  ;;  %7156 = vmatpush.msra.mxu1 %v7155_v1 }
0x1b5f   : > { %6928 = vmatmul.f32.vlgmr.msra.gmra.mxu2 %v6927_v25  ;;  %7084 = vmatmul.f32.vlgmr.msrb.gmra.mxu3 %v6923_v17 }
0x1b60   : > { %7208 = vmatpush.msra.mxu2 %v8950_v61  ;;  %7253 = vmatpush.msra.mxu3 %v7120_v8 }
0x1b61   : > { %7123 = vmatpush.msra.mxu0 %v7122_v26  ;;  %7162 = vmatpush.msra.mxu1 %v7161_v3 }
0x1b62   : > { %7211 = vmatpush.msra.mxu2 %v8959_v20  ;;  %7255 = vmatpush.msra.mxu3 %v7122_v26 }
0x1b63   : > { %7125 = vmatpush.msra.mxu0 %v7124_v29  ;;  %7168 = vmatpush.msra.mxu1 %v7167_v49 }
0x1b64   : > { %7214 = vmatpush.msra.mxu2 %v8970_v28  ;;  %7257 = vmatpush.msra.mxu3 %v7124_v29 }
0x1b65   : > { %7127 = vmatpush.msra.mxu0 %v7126_v55  ;;  %7174 = vmatpush.msra.mxu1 %v7173_v59 }
0x1b66   : > { %7217 = vmatpush.msra.mxu2 %v7164_v48  ;;  %7259 = vmatpush.msra.mxu3 %v7126_v55 }
0x1b67   : > { %7059 = vmatmul.f32.vlgmr.msrb.gmra.mxu2 %v6923_v17  ;;  %7278 = vmatpush.msrb.mxu0 %v7147_v23 }
0x1b68   : > { %7220 = vmatpush.msra.mxu2 %v7170_v60  ;;  %7180 = vmatpush.msra.mxu1 %v7179_v11 }
0x1b69   : > { %7282 = vmatpush.msrb.mxu0 %v7153_v16 }
0x1b6a   : > { %7223 = vmatpush.msra.mxu2 %v7176_v7  ;;  %7186 = vmatpush.msra.mxu1 %v7185_v43 }
0x1b6b   : > { %7286 = vmatpush.msrb.mxu0 %v7159_v51 }
0x1b6c   : > { %7226 = vmatpush.msra.mxu2 %v7182_v13  ;;  %7192 = vmatpush.msra.mxu1 %v7191_v30 }
0x1b6d   : > { %7290 = vmatpush.msrb.mxu0 %v7165_v52 }
0x1b6e   : > { %7229 = vmatpush.msra.mxu2 %v7188_v9  ;;  %7321 = vmatpush.msrb.mxu1 %v8946_v21 }
0x1b6f   : > { %7294 = vmatpush.msrb.mxu0 %v7171_v41 }
0x1b70   : > { %7323 = vmatpush.msrb.mxu1 %v8952_v58 }
0x1b71   : > { %7298 = vmatpush.msrb.mxu0 %v7177_v0 }
0x1b72   : > { %7325 = vmatpush.msrb.mxu1 %v8961_v22 }
0x1b73   : > { %7302 = vmatpush.msrb.mxu0 %v7183_v57 }
0x1b74   : > { %7327 = vmatpush.msrb.mxu1 %v8972_v44 }
0x1b75   : > { %7306 = vmatpush.msrb.mxu0 %v7189_v33 }
0x1b76   : > { %7329 = vmatpush.msrb.mxu1 %v7120_v8 }
0x1b78   : > { %7331 = vmatpush.msrb.mxu1 %v7122_v26 }
0x1b7a   : > { %7333 = vmatpush.msrb.mxu1 %v7124_v29 }
0x1b7c   : > { %7335 = vmatpush.msrb.mxu1 %v7126_v55 }
0x1bd6   : > { %v7000_v17 = vpop.f32.mrf.mxu0 }
0x1bd8   : > { %v7027_v18 = vpop.f32.mrf.mxu1 }
0x1bda   : > { %v6970_v2 = vpop.f32.mrf.mxu3 }
0x1be2   : > { %v6929_v40 = vpop.f32.mrf.mxu2  ;;  %v7085_v21 = vpop.f32.mrf.mxu3 }
0x1be3   : > { %v6930_v35 = vadd.f32 %v7699_v42, %v6929_v40 }
0x1be5   : > { %v6971_v47 = vadd.f32 %v6970_v2, %v6930_v35 }
0x1be7   : > { %v7001_v45 = vadd.f32 %v7000_v17, %v6971_v47 }
0x1be9   : > { %v7028_v37 = vadd.f32 %v7027_v18, %v7001_v45 }
0x1bea   : > { %v7060_v25 = vpop.f32.mrf.mxu2 }
0x1beb   : > { %v7061_v10 = vadd.f32 %v7060_v25, %v7028_v37 }
0x1bed   : > { %v7086_v56 = vadd.f32 %v7085_v21, %v7061_v10 }
0x1bef   : > { %v7088_v61 = vmax.f32 %v7086_v56, 0.0 }
0x1bf1   : > { %v7102_v58 = vsel %vm3492_vm12, %v7088_v61, 0 }
0x1bf2   : > { %v7128_v32 = vand.u32 4294901760, %v7102_v58 }
0x1bf4   : > { %v7129_v23 = vsub.f32 %v7102_v58, %v7128_v32  ;;  %7194 = vmatmul.f32.vlgmr.msra.gmra.mxu1 %v7128_v32 }
0x1bf6   : > { %v7130_v20 = vand.u32 4294901760, %v7129_v23  ;;  %7232 = vmatmul.f32.vlgmr.msra.gmra.mxu2 %v7129_v23 }
0x1bf8   : > { %v7131_v22 = vsub.f32 %v7129_v23, %v7130_v20  ;;  %7263 = vmatmul.f32.vlgmr.msra.gmra.mxu3 %v7130_v20 }
0x1bfa   : > { %v7132_v12 = vand.u32 4294901760, %v7131_v22 }
0x1bfc   : > { %7133 = vmatmul.f32.vlgmr.msra.gmra.mxu0 %v7132_v12  ;;  %7337 = vmatmul.f32.vlgmr.msrb.gmra.mxu1 %v7128_v32 }
0x1c04   : > { %7308 = vmatmul.f32.vlgmr.msrb.gmra.mxu0 %v7128_v32 }
0x1c71   : > { %v7195_v16 = vpop.f32.mrf.mxu1 }
0x1c79   : > { %v7134_v28 = vpop.f32.mrf.mxu0  ;;  %v7233_v36 = vpop.f32.mrf.mxu2 }
0x1c7a   : > { %v7135_v44 = vadd.f32 %v7700_v24, %v7134_v28  ;;  %v7338_v1 = vpop.f32.mrf.mxu1 }
0x1c7b   : > { %v7264_v51 = vpop.f32.mrf.mxu3 }
0x1c7c   : > { %v7196_v46 = vadd.f32 %v7195_v16, %v7135_v44 }
0x1c7e   : > { %v7234_v15 = vadd.f32 %v7233_v36, %v7196_v46 }
0x1c80   : > { %v7265_v48 = vadd.f32 %v7264_v51, %v7234_v15 }
0x1c81   : > { %v7309_v8 = vpop.f32.mrf.mxu0 }
0x1c82   : > { %v7310_v27 = vadd.f32 %v7309_v8, %v7265_v48 }
0x1c84   : > { %v7339_v38 = vadd.f32 %v7338_v1, %v7310_v27 }
0x1c86   : > { %v7341_v52 = vadd.f32 %v7339_v38, %v8941_v5 }
0x1c88   : > { %v7342_v26 = vsel %vm5208_vm2, %v7341_v52, 0.0 }
0x1c89   : > { %7343 = vadd.xlane.f32.xlu0 %v7342_v26 }
0x1cfc   : > { %v7344_v60 = vpop.xlane.xlu0 %7343 }
0x1cfd   : > { %v7345_v62 = vmul.f32 %v7344_v60, %v8337_v50 }
0x1cff   : > { %v7346_v3 = vsub.f32 %v7341_v52, %v7345_v62 }
0x1d01   : > { %v7347_v4 = vmul.f32 %v7346_v3, %v7346_v3 }
0x1d03   : > { %v7348_v7 = vsel %vm5208_vm2, %v7347_v4, 0.0 }
0x1d04   : > { %7349 = vadd.xlane.f32.xlu0 %v7348_v7 }
0x1d77   : > { %v7350_v5 = vpop.xlane.xlu0 %7349 }
0x1d78   : > { %v7351_v29 = vmul.f32 %v7350_v5, %v8337_v50 }
0x1d7a   : > { %v7352_v41 = vadd.f32 1e-06, %v7351_v29 }
0x1d7c   : > { %7749 = vrsqrt.f32 %v7352_v41  ;;  %vm7359_vm12 = vweird.f32 %v7352_v41 }
0x1d82   : > { %v7750_v54 = vpop.eup %7749 }
0x1d83   : > { %v7354_v49 = vmul.f32 %v7750_v54, %v7352_v41  ;;  %vm7360_vm15 = vweird.f32 %v7750_v54 }
0x1d84   : > { %vm7361_vm5 = vmor %vm7359_vm12, %vm7360_vm15 }
0x1d85   : > { %v7355_v0 = vmul.f32 %v7750_v54, %v7354_v49 }
0x1d87   : > { %v7356_v13 = vmul.f32 0.5, %v7355_v0 }
0x1d89   : > { %v7357_v55 = vsub.f32 1.5, %v7356_v13 }
0x1d8b   : > { %v7358_v31 = vmul.f32 %v7750_v54, %v7357_v55 }
0x1d8d   : > { %v7362_v53 = vsel %vm7361_vm5, %v7750_v54, %v7358_v31 }
0x1d8e   : > { %v7363_v57 = vmul.f32 %v7362_v53, %v7346_v3 }
0x1d90   : > { %v7364_v50 = vmul.f32 %v7363_v57, %v5707_v19 }
0x1d92   : > { %v7365_v9 = vadd.f32 %v7364_v50, %v5709_v63 }
0x1d94   : > { %7366 = vst.msk [vmem:[#allocation3 + $0x4] sm:$0xf] %vm5208_vm2, %v7365_v9 }
0x1d95   : > { %7368 = vst.msk [vmem:[#allocation6 + $0x4] sm:$0xf] %vm5208_vm2, %v7365_v9 }
0x1d96   : > { %7653 = dma.vmem_to_hbm [thread:$0]  (%p7658_p5), %s7389_s24, 128, %s7391_s23, [#allocation7], %s7832_s4, %s7832_s4, %s7838_s15  }
0x1d97   : > { %7815 = dma.done.wait (%p7658_p5), [#allocation5], 256  }
0x1d98   : > { %7817 = vsyncadd (%p7658_p5), [#allocation5], 4294967040 }
0x1d99   : > { %7819 = dma.done.wait (%p7658_p5), [#allocation7], 128  }
0x1d9a   : > { %7821 = vsyncadd (%p7658_p5), [#allocation7], 4294967168 }
0x1d9b PF: > { %s9103_s9 = sld [smem:[#allocation10_spill]] }
0x1da1   : > { %s34_s2 = sadd.s32 1, %s9103_s9  }
0x1da2   : > { %p31_p6 = scmp.ge.s32.totalorder %s34_s2, 4  }
0x1da4   :  { %33 = sbr.rel (!%p31_p6) target bundleno = 21 (0x15), region = 185 }
0x1da9   :  { %7412 = vsyncpa [#allocation5], 1 }
0x1daa   :  { %7414 = vsyncpa [#allocation5 + $0x1], 1 }
0x1dab   :  { %7415 = vsyncpa [#allocation7], 1 }

</bundles_post_ra>
